<compile_context>
chip_gen: v6e
topology: v6e:2x2x1
jax: 0.10.0
libtpu: 0.0.40
codegen_flags: <defaults>
</compile_context>

<pallas_src>
import numpy as np
import jax
import jax.numpy as jnp
from jax.experimental import pallas as pl
from jax.experimental.pallas import tpu as pltpu

MXU_DTYPE = jnp.bfloat16   # MXU operand dtype; accumulation is always f32.


# ---------------------------------------------------------------- small helpers

def _round_up(v, m):
    return (v + m - 1) // m * m


def _row_tiles(M, target=256, min_grid=2):
    """Row tile TM (multiple of 8). Prefers >= min_grid grid steps so the 'parallel'
    axis can shard across both v7x TensorCores and the tile DMA overlaps compute."""
    TM = min(target, _round_up(M, 8))
    if M > 8 and _round_up(M, TM) // TM < min_grid:
        TM = _round_up(-(-M // min_grid), 8)
    Mp = _round_up(M, TM)
    return TM, Mp, Mp // TM


def _pad_rows(x, Mp):
    M = x.shape[0]
    return x if Mp == M else jnp.pad(x, ((0, Mp - M), (0, 0)))


def _ln(x, g, b, eps=1e-5):
    mu = jnp.mean(x, axis=-1, keepdims=True)
    xc = x - mu
    var = jnp.mean(xc * xc, axis=-1, keepdims=True)
    return xc * jax.lax.rsqrt(var + eps) * g + b


def _erf(x):
    # Abramowitz & Stegun 7.1.26 (|err| < 1.5e-7); only exp/mul/add -> safe Mosaic lowering.
    a1, a2, a3, a4, a5 = 0.254829592, -0.284496736, 1.421413741, -1.453152027, 1.061405429
    p = 0.3275911
    ax = jnp.abs(x)
    t = 1.0 / (1.0 + p * ax)
    poly = ((((a5 * t + a4) * t + a3) * t + a2) * t + a1) * t
    y = 1.0 - poly * jnp.exp(-ax * ax)
    return jnp.where(x >= 0, y, -y)


def _gelu_exact(x):
    # matches nn.GELU() (erf form) to f32 precision
    return 0.5 * x * (1.0 + _erf(x * 0.7071067811865476))


# ---------------------------------------------------------------- patch embed kernel

def _embed_kernel(x_ref, w_ref, b_ref, g_ref, beta_ref, o_ref):
    y = jnp.dot(x_ref[...].astype(MXU_DTYPE), w_ref[...],
                preferred_element_type=jnp.float32) + b_ref[...]
    o_ref[...] = _ln(y, g_ref[...], beta_ref[...])


def patch_embed_matmul_ln(x, w, b, gamma, beta, tile_m=256):
    """Fused Conv3d-as-matmul + LayerNorm, row-tiled, weight VMEM-resident."""
    M, K = x.shape
    N = w.shape[1]
    TM, Mp, gm = _row_tiles(M, tile_m)
    out = pl.pallas_call(
        _embed_kernel,
        out_shape=jax.ShapeDtypeStruct((Mp, N), jnp.float32),
        grid=(gm,),
        in_specs=[
            pl.BlockSpec((TM, K), lambda i: (i, 0)),
            pl.BlockSpec((K, N), lambda i: (0, 0)),
            pl.BlockSpec((1, N), lambda i: (0, 0)),
            pl.BlockSpec((1, N), lambda i: (0, 0)),
            pl.BlockSpec((1, N), lambda i: (0, 0)),
        ],
        out_specs=pl.BlockSpec((TM, N), lambda i: (i, 0)),
        compiler_params=pltpu.CompilerParams(dimension_semantics=("parallel",)),
    )(_pad_rows(x, Mp), w, b.reshape(1, N), gamma.reshape(1, N), beta.reshape(1, N))
    return out[:M]


# ---------------------------------------------------------------- patch merging kernel

def _merge_kernel(x_ref, g_ref, b_ref, w_ref, o_ref):
    xn = _ln(x_ref[...], g_ref[...], b_ref[...])
    o_ref[...] = jnp.dot(xn.astype(MXU_DTYPE), w_ref[...],
                         preferred_element_type=jnp.float32)


def patch_merge_ln_linear(x, gamma, beta, w, tile_m=256):
    """Fused patch-merging: LayerNorm(4C) -> Linear(4C -> 2C, no bias)."""
    M, K = x.shape
    N = w.shape[1]
    TM, Mp, gm = _row_tiles(M, tile_m)
    out = pl.pallas_call(
        _merge_kernel,
        out_shape=jax.ShapeDtypeStruct((Mp, N), jnp.float32),
        grid=(gm,),
        in_specs=[
            pl.BlockSpec((TM, K), lambda i: (i, 0)),
            pl.BlockSpec((1, K), lambda i: (0, 0)),
            pl.BlockSpec((1, K), lambda i: (0, 0)),
            pl.BlockSpec((K, N), lambda i: (0, 0)),
        ],
        out_specs=pl.BlockSpec((TM, N), lambda i: (i, 0)),
        compiler_params=pltpu.CompilerParams(dimension_semantics=("parallel",)),
    )(_pad_rows(x, Mp), gamma.reshape(1, K), beta.reshape(1, K), w)
    return out[:M]


# ---------------------------------------------------------------- fused Swin block kernel

def _make_block_kernel(nW, N, C, heads, Dh):
    M = nW * N

    def kernel(x_ref, g1_ref, b1_ref, wqkv_ref, bqkv_ref, bias_ref,
               projw_ref, projb_ref, g2_ref, b2_ref,
               w1_ref, bm1_ref, w2_ref, bm2_ref, o_ref):
        x = x_ref[...].reshape(M, C)                               # all tokens of one sample
        # --- attention branch: LN1 -> QKV -> windowed MHA -> proj (accumulated per head)
        xn = _ln(x, g1_ref[...], b1_ref[...])
        qkv = jnp.dot(xn.astype(MXU_DTYPE), wqkv_ref[...],
                      preferred_element_type=jnp.float32) + bqkv_ref[...]
        attn_proj = jnp.zeros((M, C), jnp.float32)
        for h in range(heads):                                     # small static unroll
            q_h = qkv[:, h * Dh:(h + 1) * Dh].reshape(nW, N, Dh)   # scale folded into Wq
            k_h = qkv[:, C + h * Dh:C + (h + 1) * Dh].reshape(nW, N, Dh)
            v_h = qkv[:, 2 * C + h * Dh:2 * C + (h + 1) * Dh].reshape(nW, N, Dh)
            s = jnp.einsum("wqd,wkd->wqk", q_h, k_h,
                           preferred_element_type=jnp.float32)
            s = s + bias_ref[h]                                    # rel-pos bias (+ shift mask)
            s = s - jnp.max(s, axis=-1, keepdims=True)
            p = jnp.exp(s)
            p = p * pl.reciprocal(jnp.sum(p, axis=-1, keepdims=True), approx=True)
            o_h = jnp.einsum("wqk,wkd->wqd", p, v_h,
                             preferred_element_type=jnp.float32)
            # accumulate this head's slice of the output projection (no concatenate)
            attn_proj = attn_proj + jnp.dot(
                o_h.reshape(M, Dh).astype(MXU_DTYPE),
                projw_ref[h * Dh:(h + 1) * Dh, :],
                preferred_element_type=jnp.float32)
        y = x + attn_proj + projb_ref[...]                         # residual 1
        # --- MLP branch: LN2 -> W1 -> GELU -> W2 -> residual (hidden never leaves VMEM)
        yn = _ln(y, g2_ref[...], b2_ref[...])
        hid = jnp.dot(yn.astype(MXU_DTYPE), w1_ref[...],
                      preferred_element_type=jnp.float32) + bm1_ref[...]
        hid = _gelu_exact(hid)
        z = y + jnp.dot(hid.astype(MXU_DTYPE), w2_ref[...],
                        preferred_element_type=jnp.float32) + bm2_ref[...]
        o_ref[...] = z.reshape(nW, N, C)

    return kernel


def fused_swin_block_windows(xw, p, heads, B, nW, N, C):
    """xw: (B*nW, N, C) window-partitioned tokens. One grid step = one sample; all
    weights + bias tensors stay VMEM-resident across the batch grid."""
    Dh = C // heads
    Hd = p["mlp_w1"].shape[1]
    nWb = p["bias_all"].shape[1]           # 1 (unshifted) or nW (shifted: mask folded in)
    tile = pl.BlockSpec((nW, N, C), lambda b: (b, 0, 0))
    vecC = pl.BlockSpec((1, C), lambda b: (0, 0))
    # NOTE: for real Swin dims (C up to 768, hidden 3072) set
    # pltpu.CompilerParams(vmem_limit_bytes=...) and/or tile the MLP hidden dim;
    # at these toy shapes everything is a few KB.
    return pl.pallas_call(
        _make_block_kernel(nW, N, C, heads, Dh),
        out_shape=jax.ShapeDtypeStruct((B * nW, N, C), jnp.float32),
        grid=(B,),
        in_specs=[
            tile,
            vecC, vecC,
            pl.BlockSpec((C, 3 * C), lambda b: (0, 0)),
            pl.BlockSpec((1, 3 * C), lambda b: (0, 0)),
            pl.BlockSpec((heads, nWb, N, N), lambda b: (0, 0, 0, 0)),
            pl.BlockSpec((C, C), lambda b: (0, 0)),
            vecC,
            vecC, vecC,
            pl.BlockSpec((C, Hd), lambda b: (0, 0)),
            pl.BlockSpec((1, Hd), lambda b: (0, 0)),
            pl.BlockSpec((Hd, C), lambda b: (0, 0)),
            vecC,
        ],
        out_specs=tile,
        compiler_params=pltpu.CompilerParams(dimension_semantics=("parallel",)),
    )(xw,
      p["norm1_g"].reshape(1, C), p["norm1_b"].reshape(1, C),
      p["wqkv"], p["bqkv"].reshape(1, 3 * C), p["bias_all"],
      p["proj_w"], p["proj_b"].reshape(1, C),
      p["norm2_g"].reshape(1, C), p["norm2_b"].reshape(1, C),
      p["mlp_w1"], p["mlp_b1"].reshape(1, Hd),
      p["mlp_w2"], p["mlp_b2"].reshape(1, C))


# ---------------------------------------------------------------- final LN + pool + head

def _pool_head_kernel(x_ref, g_ref, b_ref, w_ref, hb_ref, o_ref):
    xn = _ln(x_ref[...], g_ref[...], b_ref[...])          # (T*H*W, C)
    feat = jnp.mean(xn, axis=0, keepdims=True)            # AdaptiveAvgPool3d(1) + Flatten
    o_ref[...] = jnp.dot(feat.astype(MXU_DTYPE), w_ref[...],
                         preferred_element_type=jnp.float32) + hb_ref[...]


def pool_head(x, norm_g, norm_b, head_w, head_b):
    B, T, H, W, C = x.shape
    rows = T * H * W
    nT = head_w.shape[1]
    xr = x.reshape(B, rows, C)
    out = pl.pallas_call(
        _pool_head_kernel,
        out_shape=jax.ShapeDtypeStruct((B, 1, nT), jnp.float32),
        grid=(B,),
        in_specs=[
            pl.BlockSpec((None, rows, C), lambda b: (b, 0, 0)),
            pl.BlockSpec((1, C), lambda b: (0, 0)),
            pl.BlockSpec((1, C), lambda b: (0, 0)),
            pl.BlockSpec((C, nT), lambda b: (0, 0)),
            pl.BlockSpec((1, nT), lambda b: (0, 0)),
        ],
        out_specs=pl.BlockSpec((None, 1, nT), lambda b: (b, 0, 0)),
        compiler_params=pltpu.CompilerParams(dimension_semantics=("parallel",)),
    )(xr, norm_g.reshape(1, C), norm_b.reshape(1, C), head_w, head_b.reshape(1, nT))
    return out.reshape(B, nT)


# ---------------------------------------------------------------- Swin3D glue (XLA layout only)

def relative_position_index(ws):
    wt, wh, ww = ws
    coords = np.stack(np.meshgrid(np.arange(wt), np.arange(wh), np.arange(ww), indexing="ij"))
    cf = coords.reshape(3, -1)
    rel = (cf[:, :, None] - cf[:, None, :]).transpose(1, 2, 0).astype(np.int64)
    rel[..., 0] += wt - 1
    rel[..., 1] += wh - 1
    rel[..., 2] += ww - 1
    rel[..., 0] *= (2 * wh - 1) * (2 * ww - 1)
    rel[..., 1] *= (2 * ww - 1)
    return rel.sum(-1).reshape(-1)


def relative_position_bias(table, ws, num_heads):
    N = ws[0] * ws[1] * ws[2]
    idx = relative_position_index(ws)
    bias = table[jnp.asarray(idx)]                              # (N*N, heads)
    return bias.reshape(N, N, num_heads).transpose(2, 0, 1)     # (heads, N, N)


def compute_attn_mask(size, ws, ss):
    """torchvision-style shift attention mask: (num_windows, N, N) of {0, -100}."""
    T, H, W = size
    mask = np.zeros((T, H, W), np.float32)
    slices = [((0, -ws[i]), (-ws[i], -ss[i]), (-ss[i], None)) for i in range(3)]
    cnt = 0
    for t0, t1 in slices[0]:
        for h0, h1 in slices[1]:
            for w0, w1 in slices[2]:
                mask[t0:t1, h0:h1, w0:w1] = cnt
                cnt += 1
    nT, nH, nW_ = T // ws[0], H // ws[1], W // ws[2]
    m = mask.reshape(nT, ws[0], nH, ws[1], nW_, ws[2]).transpose(0, 2, 4, 1, 3, 5)
    m = m.reshape(nT * nH * nW_, -1)
    am = m[:, None, :] - m[:, :, None]
    am = np.where(am != 0, -100.0, 0.0).astype(np.float32)
    return jnp.asarray(am)


def window_partition(x, ws):
    B, T, H, W, C = x.shape
    nT, nH, nW_ = T // ws[0], H // ws[1], W // ws[2]
    xw = x.reshape(B, nT, ws[0], nH, ws[1], nW_, ws[2], C)
    xw = xw.transpose(0, 1, 3, 5, 2, 4, 6, 7)
    return xw.reshape(B * nT * nH * nW_, ws[0] * ws[1] * ws[2], C)


def window_reverse(xw, ws, B, T, H, W, C):
    nT, nH, nW_ = T // ws[0], H // ws[1], W // ws[2]
    x = xw.reshape(B, nT, nH, nW_, ws[0], ws[1], ws[2], C)
    x = x.transpose(0, 1, 4, 2, 5, 3, 6, 7)
    return x.reshape(B, T, H, W, C)


def swin_block(x, p, num_heads, ws, ss):
    """Full Swin block. LN / attention / proj / MLP and both residuals are per-token,
    so they commute with the roll + window partition permutations: the whole block
    runs in window-major layout inside ONE pallas_call; only the layout permutations
    (roll, partition, reverse) stay in XLA."""
    B, T, H, W, C = x.shape
    do_shift = any(s > 0 for s in ss)
    xin = jnp.roll(x, shift=(-ss[0], -ss[1], -ss[2]), axis=(1, 2, 3)) if do_shift else x
    xw = window_partition(xin, ws)                     # (B*nW, N, C)
    nW = xw.shape[0] // B
    N = xw.shape[1]
    yw = fused_swin_block_windows(xw, p, num_heads, B, nW, N, C)
    y = window_reverse(yw, ws, B, T, H, W, C)
    if do_shift:
        y = jnp.roll(y, shift=(ss[0], ss[1], ss[2]), axis=(1, 2, 3))
    return y


def patch_merging(x, p):
    B, T, H, W, C = x.shape
    x0 = x[:, :, 0::2, 0::2, :]
    x1 = x[:, :, 1::2, 0::2, :]
    x2 = x[:, :, 0::2, 1::2, :]
    x3 = x[:, :, 1::2, 1::2, :]
    xc = jnp.concatenate([x0, x1, x2, x3], axis=-1)              # (B, T, H/2, W/2, 4C)
    xf = patch_merge_ln_linear(xc.reshape(-1, 4 * C), p["norm_g"], p["norm_b"], p["red_w"])
    return xf.reshape(B, T, H // 2, W // 2, 2 * C)


def patch_embed(x, p, patch_size):
    # Conv3d(3, C, kernel=stride=patch_size) as patchify + fused matmul+LN kernel.
    B, Ci, T, H, W = x.shape
    pt, ph, pw = patch_size
    Tp, Hp, Wp = T // pt, H // ph, W // pw
    xp = x.reshape(B, Ci, Tp, pt, Hp, ph, Wp, pw)
    xp = xp.transpose(0, 2, 4, 6, 1, 3, 5, 7).reshape(B * Tp * Hp * Wp, Ci * pt * ph * pw)
    y = patch_embed_matmul_ln(xp, p["proj_w"], p["proj_b"], p["norm_g"], p["norm_b"])
    return y.reshape(B, Tp, Hp, Wp, p["proj_w"].shape[1])


def swin_transformer_forward(x, params, meta, cfg):
    """x: (B, 3, T, H, W) NCDHW -> (B, timesteps)."""
    x = patch_embed(x, params["patch_embed"], cfg["patch_size"])
    nstages = len(cfg["depths"])
    for s in range(nstages):
        for b in range(cfg["depths"][s]):
            ws, ss = meta[s][b]
            x = swin_block(x, params["stages"][s]["blocks"][b], cfg["num_heads"][s], ws, ss)
        if s < nstages - 1:
            x = patch_merging(x, params["stages"][s]["merge"])
    # final LayerNorm + AdaptiveAvgPool3d(1) + Flatten + output Linear, fused in one kernel.
    # TODO(synk): create_pytorch_segmentation_output_layers is not defined in the source;
    #             a plain Linear(features -> timesteps) head stands in for it.
    return pool_head(x, params["norm_g"], params["norm_b"],
                     params["head_w"], params["head_b"])


# ---------------------------------------------------------------- deterministic params

def init_params(key, cfg):
    ks = iter(jax.random.split(key, 512))

    def nrm(shape, scale=0.02):
        return (scale * jax.random.normal(next(ks), shape)).astype(jnp.float32)

    pt, ph, pw = cfg["patch_size"]
    ed = cfg["embed_dim"]
    size = [cfg["timesteps"] // pt, cfg["dim"] // ph, cfg["dim"] // pw]

    conv_w = nrm((ed, 3, pt, ph, pw))
    params = {
        "patch_embed": dict(
            proj_w=conv_w.reshape(ed, -1).T.astype(MXU_DTYPE),   # conv-as-matmul, folded at init
            proj_b=jnp.zeros((ed,), jnp.float32),
            norm_g=jnp.ones((ed,), jnp.float32),
            norm_b=jnp.zeros((ed,), jnp.float32),
        )
    }
    stages, meta = [], []
    nstages = len(cfg["depths"])
    for s in range(nstages):
        D = ed * (2 ** s)
        Hh = cfg["num_heads"][s]
        scale = float(D // Hh) ** -0.5
        blocks, bmeta = [], []
        for b in range(cfg["depths"][s]):
            ws = list(cfg["window_size"])
            ss = [w // 2 if (b % 2 == 1) else 0 for w in ws]
            for i in range(3):                       # torchvision adjustment rule
                if size[i] <= ws[i]:
                    ws[i] = size[i]
                    ss[i] = 0
            assert all(size[i] % ws[i] == 0 for i in range(3))
            N = ws[0] * ws[1] * ws[2]
            wt, wh, ww_ = ws
            tbl = nrm(((2 * wt - 1) * (2 * wh - 1) * (2 * ww_ - 1), Hh))
            rel_bias = relative_position_bias(tbl, ws, Hh)            # (heads, N, N)
            if any(v > 0 for v in ss):
                attn_mask = compute_attn_mask(size, ws, ss)           # (nW, N, N)
                bias_all = rel_bias[:, None, :, :] + attn_mask[None, :, :, :]
            else:
                bias_all = rel_bias[:, None, :, :]   # (heads, 1, N, N): broadcast, no mask DMA
            wq, wk, wv = nrm((D, D)), nrm((D, D)), nrm((D, D))
            bq = jnp.zeros((D,), jnp.float32)
            bk = jnp.zeros((D,), jnp.float32)
            bv = jnp.zeros((D,), jnp.float32)
            blocks.append(dict(
                norm1_g=jnp.ones((D,), jnp.float32), norm1_b=jnp.zeros((D,), jnp.float32),
                # single concatenated QKV weight; softmax scale folded into the Q columns
                wqkv=jnp.concatenate([wq * scale, wk, wv], axis=1).astype(MXU_DTYPE),
                bqkv=jnp.concatenate([bq * scale, bk, bv], axis=0),
                bias_all=bias_all,
                proj_w=nrm((D, D)).astype(MXU_DTYPE),
                proj_b=jnp.zeros((D,), jnp.float32),
                norm2_g=jnp.ones((D,), jnp.float32), norm2_b=jnp.zeros((D,), jnp.float32),
                mlp_w1=nrm((D, cfg["mlp_ratio"] * D)).astype(MXU_DTYPE),
                mlp_b1=jnp.zeros((cfg["mlp_ratio"] * D,), jnp.float32),
                mlp_w2=nrm((cfg["mlp_ratio"] * D, D)).astype(MXU_DTYPE),
                mlp_b2=jnp.zeros((D,), jnp.float32),
            ))
            bmeta.append((tuple(ws), tuple(ss)))
        st = dict(blocks=blocks)
        if s < nstages - 1:
            st["merge"] = dict(
                norm_g=jnp.ones((4 * D,), jnp.float32),
                norm_b=jnp.zeros((4 * D,), jnp.float32),
                red_w=nrm((4 * D, 2 * D)).astype(MXU_DTYPE),
            )
            size = [size[0], size[1] // 2, size[2] // 2]
        stages.append(st)
        meta.append(tuple(bmeta))
    params["stages"] = stages
    Df = ed * (2 ** (nstages - 1))
    params["norm_g"] = jnp.ones((Df,), jnp.float32)
    params["norm_b"] = jnp.zeros((Df,), jnp.float32)
    params["head_w"] = nrm((Df, cfg["timesteps"])).astype(MXU_DTYPE)
    params["head_b"] = jnp.zeros((cfg["timesteps"],), jnp.float32)
    return params, tuple(meta)


# ---------------------------------------------------------------- main

if __name__ == "__main__":
    cfg = dict(
        patch_size=(2, 4, 4),     # Swin3D patch-embed kernel/stride
        embed_dim=32,
        depths=(2, 2),
        num_heads=(2, 4),
        window_size=(2, 2, 2),
        mlp_ratio=4,
        timesteps=4,              # modelinfo['timesteps'] (T of the video clip)
        dim=16,                   # modelinfo['dim']  (spatial H = W)
    )
    key = jax.random.PRNGKey(0)
    pkey, xkey = jax.random.split(key)
    params, meta = init_params(pkey, cfg)

    # layout: NCDHW, like the PyTorch module: (B, 3, timesteps, dim, dim)
    x = jax.random.normal(xkey, (2, 3, cfg["timesteps"], cfg["dim"], cfg["dim"]), jnp.float32)

    fwd = jax.jit(lambda xx, pp: swin_transformer_forward(xx, pp, meta, cfg))
    out = jax.block_until_ready(fwd(x, params))
    assert out.shape == (2, cfg["timesteps"])
    assert bool(jnp.all(jnp.isfinite(out)))
    print("KERNEL_OK")
</pallas_src>

<mosaic_0001>
module attributes {stable_mosaic.version = 11 : i64} {
  func.func @_embed_kernel(%arg0: i32, %arg1: memref<32x96xf32, #tpu.memory_space<vmem>>, %arg2: memref<96x32xbf16, #tpu.memory_space<vmem>>, %arg3: memref<1x32xf32, #tpu.memory_space<vmem>>, %arg4: memref<1x32xf32, #tpu.memory_space<vmem>>, %arg5: memref<1x32xf32, #tpu.memory_space<vmem>>, %arg6: memref<32x32xf32, #tpu.memory_space<vmem>>) attributes {dimension_semantics = [#tpu.dimension_semantics<parallel>], iteration_bounds = array<i64: 2>, scalar_prefetch = 0 : i64, scratch_operands = 0 : i64, tpu.core_type = #tpu.core_type<tc>, window_params = [{transform_indices = @transform_0, window_bounds = array<i64: 32, 96>}, {pipeline_mode = #tpu.pipeline_mode<synchronous>, transform_indices = @transform_1, window_bounds = array<i64: 96, 32>}, {pipeline_mode = #tpu.pipeline_mode<synchronous>, transform_indices = @transform_2, window_bounds = array<i64: 1, 32>}, {pipeline_mode = #tpu.pipeline_mode<synchronous>, transform_indices = @transform_3, window_bounds = array<i64: 1, 32>}, {pipeline_mode = #tpu.pipeline_mode<synchronous>, transform_indices = @transform_4, window_bounds = array<i64: 1, 32>}, {transform_indices = @transform_5, window_bounds = array<i64: 32, 32>}]} {
    %c0 = arith.constant 0 : index
    %c0_0 = arith.constant 0 : index
    %0 = vector.load %arg1[%c0, %c0_0] : memref<32x96xf32, #tpu.memory_space<vmem>>, vector<32x96xf32>
    %1 = arith.truncf %0 : vector<32x96xf32> to vector<32x96xbf16>
    %c0_1 = arith.constant 0 : index
    %c0_2 = arith.constant 0 : index
    %2 = vector.load %arg2[%c0_1, %c0_2] : memref<96x32xbf16, #tpu.memory_space<vmem>>, vector<96x32xbf16>
    %cst = arith.constant dense<0.000000e+00> : vector<32x32xf32>
    %3 = tpu.matmul %1, %2, %cst {dimension_numbers = #tpu.dot_dimension_numbers<[1], [0], [0], [1], [0, 0, 1, 1], [], []>} : vector<32x96xbf16>, vector<96x32xbf16>, vector<32x32xf32> -> vector<32x32xf32>
    %c0_3 = arith.constant 0 : index
    %c0_4 = arith.constant 0 : index
    %4 = vector.load %arg3[%c0_3, %c0_4] : memref<1x32xf32, #tpu.memory_space<vmem>>, vector<1x32xf32>
    %5 = vector.broadcast %4 : vector<1x32xf32> to vector<32x32xf32>
    %6 = arith.addf %3, %5 : vector<32x32xf32>
    %c0_5 = arith.constant 0 : index
    %c0_6 = arith.constant 0 : index
    %7 = vector.load %arg4[%c0_5, %c0_6] : memref<1x32xf32, #tpu.memory_space<vmem>>, vector<1x32xf32>
    %c0_7 = arith.constant 0 : index
    %c0_8 = arith.constant 0 : index
    %8 = vector.load %arg5[%c0_7, %c0_8] : memref<1x32xf32, #tpu.memory_space<vmem>>, vector<1x32xf32>
    %cst_9 = arith.constant dense<0.000000e+00> : vector<32xf32>
    %9 = vector.multi_reduction <add>, %6, %cst_9 [1] : vector<32x32xf32> to vector<32xf32>
    %10 = vector.shape_cast %9 : vector<32xf32> to vector<32x1xf32>
    %cst_10 = arith.constant 3.200000e+01 : f32
    %11 = vector.broadcast %cst_10 : f32 to vector<32x1xf32>
    %12 = arith.divf %10, %11 : vector<32x1xf32>
    %13 = vector.broadcast %12 : vector<32x1xf32> to vector<32x32xf32>
    %14 = arith.subf %6, %13 : vector<32x32xf32>
    %15 = arith.mulf %14, %14 : vector<32x32xf32>
    %cst_11 = arith.constant dense<0.000000e+00> : vector<32xf32>
    %16 = vector.multi_reduction <add>, %15, %cst_11 [1] : vector<32x32xf32> to vector<32xf32>
    %17 = vector.shape_cast %16 : vector<32xf32> to vector<32x1xf32>
    %cst_12 = arith.constant 3.200000e+01 : f32
    %18 = vector.broadcast %cst_12 : f32 to vector<32x1xf32>
    %19 = arith.divf %17, %18 : vector<32x1xf32>
    %cst_13 = arith.constant 9.99999974E-6 : f32
    %20 = vector.broadcast %cst_13 : f32 to vector<32x1xf32>
    %21 = arith.addf %19, %20 : vector<32x1xf32>
    %22 = math.rsqrt %21 : vector<32x1xf32>
    %23 = vector.broadcast %22 : vector<32x1xf32> to vector<32x32xf32>
    %24 = arith.mulf %14, %23 : vector<32x32xf32>
    %25 = vector.broadcast %7 : vector<1x32xf32> to vector<32x32xf32>
    %26 = arith.mulf %24, %25 : vector<32x32xf32>
    %27 = vector.broadcast %8 : vector<1x32xf32> to vector<32x32xf32>
    %28 = arith.addf %26, %27 : vector<32x32xf32>
    %c0_14 = arith.constant 0 : index
    %c0_15 = arith.constant 0 : index
    %29 = vector.load %arg6[%c0_14, %c0_15] : memref<32x32xf32, #tpu.memory_space<vmem>>, vector<32x32xf32>
    tpu.vector_store %arg6[%c0_14, %c0_15], %28 {strides = array<i32>} : memref<32x32xf32, #tpu.memory_space<vmem>>, vector<32x32xf32>,
    return
  }
  func.func @transform_0(%arg0: i32) -> (i32, i32) {
    %c0_i32 = arith.constant 0 : i32
    %c0_i32_0 = arith.constant 0 : i32
    return %arg0, %c0_i32 : i32, i32
  }
  func.func @transform_1(%arg0: i32) -> (i32, i32) {
    %c0_i32 = arith.constant 0 : i32
    %c0_i32_0 = arith.constant 0 : i32
    %c0_i32_1 = arith.constant 0 : i32
    return %c0_i32, %c0_i32_0 : i32, i32
  }
  func.func @transform_2(%arg0: i32) -> (i32, i32) {
    %c0_i32 = arith.constant 0 : i32
    %c0_i32_0 = arith.constant 0 : i32
    %c0_i32_1 = arith.constant 0 : i32
    return %c0_i32, %c0_i32_0 : i32, i32
  }
  func.func @transform_3(%arg0: i32) -> (i32, i32) {
    %c0_i32 = arith.constant 0 : i32
    %c0_i32_0 = arith.constant 0 : i32
    %c0_i32_1 = arith.constant 0 : i32
    return %c0_i32, %c0_i32_0 : i32, i32
  }
  func.func @transform_4(%arg0: i32) -> (i32, i32) {
    %c0_i32 = arith.constant 0 : i32
    %c0_i32_0 = arith.constant 0 : i32
    %c0_i32_1 = arith.constant 0 : i32
    return %c0_i32, %c0_i32_0 : i32, i32
  }
  func.func @transform_5(%arg0: i32) -> (i32, i32) {
    %c0_i32 = arith.constant 0 : i32
    %c0_i32_0 = arith.constant 0 : i32
    return %arg0, %c0_i32 : i32, i32
  }
}

module attributes {stable_mosaic.version = 11 : i64} {
  func.func @kernel(%arg0: i32, %arg1: memref<4x8x32xf32, #tpu.memory_space<vmem>>, %arg2: memref<1x32xf32, #tpu.memory_space<vmem>>, %arg3: memref<1x32xf32, #tpu.memory_space<vmem>>, %arg4: memref<32x96xbf16, #tpu.memory_space<vmem>>, %arg5: memref<1x96xf32, #tpu.memory_space<vmem>>, %arg6: memref<2x1x8x8xf32, #tpu.memory_space<vmem>>, %arg7: memref<32x32xbf16, #tpu.memory_space<vmem>>, %arg8: memref<1x32xf32, #tpu.memory_space<vmem>>, %arg9: memref<1x32xf32, #tpu.memory_space<vmem>>, %arg10: memref<1x32xf32, #tpu.memory_space<vmem>>, %arg11: memref<32x128xbf16, #tpu.memory_space<vmem>>, %arg12: memref<1x128xf32, #tpu.memory_space<vmem>>, %arg13: memref<128x32xbf16, #tpu.memory_space<vmem>>, %arg14: memref<1x32xf32, #tpu.memory_space<vmem>>, %arg15: memref<4x8x32xf32, #tpu.memory_space<vmem>>) attributes {dimension_semantics = [#tpu.dimension_semantics<parallel>], iteration_bounds = array<i64: 2>, scalar_prefetch = 0 : i64, scratch_operands = 0 : i64, tpu.core_type = #tpu.core_type<tc>, window_params = [{transform_indices = @transform_0, window_bounds = array<i64: 4, 8, 32>}, {pipeline_mode = #tpu.pipeline_mode<synchronous>, transform_indices = @transform_1, window_bounds = array<i64: 1, 32>}, {pipeline_mode = #tpu.pipeline_mode<synchronous>, transform_indices = @transform_2, window_bounds = array<i64: 1, 32>}, {pipeline_mode = #tpu.pipeline_mode<synchronous>, transform_indices = @transform_3, window_bounds = array<i64: 32, 96>}, {pipeline_mode = #tpu.pipeline_mode<synchronous>, transform_indices = @transform_4, window_bounds = array<i64: 1, 96>}, {pipeline_mode = #tpu.pipeline_mode<synchronous>, transform_indices = @transform_5, window_bounds = array<i64: 2, 1, 8, 8>}, {pipeline_mode = #tpu.pipeline_mode<synchronous>, transform_indices = @transform_6, window_bounds = array<i64: 32, 32>}, {pipeline_mode = #tpu.pipeline_mode<synchronous>, transform_indices = @transform_7, window_bounds = array<i64: 1, 32>}, {pipeline_mode = #tpu.pipeline_mode<synchronous>, transform_indices = @transform_8, window_bounds = array<i64: 1, 32>}, {pipeline_mode = #tpu.pipeline_mode<synchronous>, transform_indices = @transform_9, window_bounds = array<i64: 1, 32>}, {pipeline_mode = #tpu.pipeline_mode<synchronous>, transform_indices = @transform_10, window_bounds = array<i64: 32, 128>}, {pipeline_mode = #tpu.pipeline_mode<synchronous>, transform_indices = @transform_11, window_bounds = array<i64: 1, 128>}, {pipeline_mode = #tpu.pipeline_mode<synchronous>, transform_indices = @transform_12, window_bounds = array<i64: 128, 32>}, {pipeline_mode = #tpu.pipeline_mode<synchronous>, transform_indices = @transform_13, window_bounds = array<i64: 1, 32>}, {transform_indices = @transform_14, window_bounds = array<i64: 4, 8, 32>}]} {
    %c0 = arith.constant 0 : index
    %c0_0 = arith.constant 0 : index
    %c0_1 = arith.constant 0 : index
    %0 = vector.load %arg1[%c0, %c0_0, %c0_1] : memref<4x8x32xf32, #tpu.memory_space<vmem>>, vector<4x8x32xf32>
    %1 = vector.shape_cast %0 : vector<4x8x32xf32> to vector<32x32xf32>
    %c0_2 = arith.constant 0 : index
    %c0_3 = arith.constant 0 : index
    %2 = vector.load %arg2[%c0_2, %c0_3] : memref<1x32xf32, #tpu.memory_space<vmem>>, vector<1x32xf32>
    %c0_4 = arith.constant 0 : index
    %c0_5 = arith.constant 0 : index
    %3 = vector.load %arg3[%c0_4, %c0_5] : memref<1x32xf32, #tpu.memory_space<vmem>>, vector<1x32xf32>
    %cst = arith.constant dense<0.000000e+00> : vector<32xf32>
    %4 = vector.multi_reduction <add>, %1, %cst [1] : vector<32x32xf32> to vector<32xf32>
    %5 = vector.shape_cast %4 : vector<32xf32> to vector<32x1xf32>
    %cst_6 = arith.constant 3.200000e+01 : f32
    %6 = vector.broadcast %cst_6 : f32 to vector<32x1xf32>
    %7 = arith.divf %5, %6 : vector<32x1xf32>
    %8 = vector.broadcast %7 : vector<32x1xf32> to vector<32x32xf32>
    %9 = arith.subf %1, %8 : vector<32x32xf32>
    %10 = arith.mulf %9, %9 : vector<32x32xf32>
    %cst_7 = arith.constant dense<0.000000e+00> : vector<32xf32>
    %11 = vector.multi_reduction <add>, %10, %cst_7 [1] : vector<32x32xf32> to vector<32xf32>
    %12 = vector.shape_cast %11 : vector<32xf32> to vector<32x1xf32>
    %cst_8 = arith.constant 3.200000e+01 : f32
    %13 = vector.broadcast %cst_8 : f32 to vector<32x1xf32>
    %14 = arith.divf %12, %13 : vector<32x1xf32>
    %cst_9 = arith.constant 9.99999974E-6 : f32
    %15 = vector.broadcast %cst_9 : f32 to vector<32x1xf32>
    %16 = arith.addf %14, %15 : vector<32x1xf32>
    %17 = math.rsqrt %16 : vector<32x1xf32>
    %18 = vector.broadcast %17 : vector<32x1xf32> to vector<32x32xf32>
    %19 = arith.mulf %9, %18 : vector<32x32xf32>
    %20 = vector.broadcast %2 : vector<1x32xf32> to vector<32x32xf32>
    %21 = arith.mulf %19, %20 : vector<32x32xf32>
    %22 = vector.broadcast %3 : vector<1x32xf32> to vector<32x32xf32>
    %23 = arith.addf %21, %22 : vector<32x32xf32>
    %24 = arith.truncf %23 : vector<32x32xf32> to vector<32x32xbf16>
    %c0_10 = arith.constant 0 : index
    %c0_11 = arith.constant 0 : index
    %25 = vector.load %arg4[%c0_10, %c0_11] : memref<32x96xbf16, #tpu.memory_space<vmem>>, vector<32x96xbf16>
    %cst_12 = arith.constant dense<0.000000e+00> : vector<32x96xf32>
    %26 = tpu.matmul %24, %25, %cst_12 {dimension_numbers = #tpu.dot_dimension_numbers<[1], [0], [0], [1], [0, 0, 1, 1], [], []>} : vector<32x32xbf16>, vector<32x96xbf16>, vector<32x96xf32> -> vector<32x96xf32>
    %c0_13 = arith.constant 0 : index
    %c0_14 = arith.constant 0 : index
    %27 = vector.load %arg5[%c0_13, %c0_14] : memref<1x96xf32, #tpu.memory_space<vmem>>, vector<1x96xf32>
    %28 = vector.broadcast %27 : vector<1x96xf32> to vector<32x96xf32>
    %29 = arith.addf %26, %28 : vector<32x96xf32>
    %cst_15 = arith.constant 0.000000e+00 : f32
    %30 = vector.broadcast %cst_15 : f32 to vector<32x32xf32>
    %31 = vector.extract_strided_slice %29 {offsets = [0, 0], sizes = [32, 16], strides = [1, 1]} : vector<32x96xf32> to vector<32x16xf32>
    %32 = vector.shape_cast %31 : vector<32x16xf32> to vector<4x8x16xf32>
    %33 = vector.extract_strided_slice %29 {offsets = [0, 32], sizes = [32, 16], strides = [1, 1]} : vector<32x96xf32> to vector<32x16xf32>
    %34 = vector.shape_cast %33 : vector<32x16xf32> to vector<4x8x16xf32>
    %35 = vector.extract_strided_slice %29 {offsets = [0, 64], sizes = [32, 16], strides = [1, 1]} : vector<32x96xf32> to vector<32x16xf32>
    %36 = vector.shape_cast %35 : vector<32x16xf32> to vector<4x8x16xf32>
    "tpu.trace_start"() <{level = 10 : i32, message = "wqd,wkd->wqk"}> : () -> ()
    %cst_16 = arith.constant dense<0.000000e+00> : vector<4x8x8xf32>
    %37 = tpu.matmul %32, %34, %cst_16 {dimension_numbers = #tpu.dot_dimension_numbers<[2], [2], [1], [1], [0, 0, 0, 1, 1, 1], [0], [0]>} : vector<4x8x16xf32>, vector<4x8x16xf32>, vector<4x8x8xf32> -> vector<4x8x8xf32>
    "tpu.trace_stop"() : () -> ()
    %c0_17 = arith.constant 0 : index
    %c0_18 = arith.constant 0 : index
    %c0_19 = arith.constant 0 : index
    %c0_20 = arith.constant 0 : index
    %38 = vector.load %arg6[%c0_17, %c0_18, %c0_19, %c0_20] : memref<2x1x8x8xf32, #tpu.memory_space<vmem>>, vector<1x1x8x8xf32>
    %39 = vector.shape_cast %38 : vector<1x1x8x8xf32> to vector<1x8x8xf32>
    %40 = vector.broadcast %39 : vector<1x8x8xf32> to vector<4x8x8xf32>
    %41 = arith.addf %37, %40 : vector<4x8x8xf32>
    %cst_21 = arith.constant dense<0xFF800000> : vector<4x8xf32>
    %42 = vector.multi_reduction <maximumf>, %41, %cst_21 [2] : vector<4x8x8xf32> to vector<4x8xf32>
    %43 = vector.shape_cast %42 : vector<4x8xf32> to vector<4x8x1xf32>
    %44 = vector.broadcast %43 : vector<4x8x1xf32> to vector<4x8x8xf32>
    %45 = arith.subf %41, %44 : vector<4x8x8xf32>
    %46 = math.exp %45 : vector<4x8x8xf32>
    %cst_22 = arith.constant dense<0.000000e+00> : vector<4x8xf32>
    %47 = vector.multi_reduction <add>, %46, %cst_22 [2] : vector<4x8x8xf32> to vector<4x8xf32>
    %48 = vector.shape_cast %47 : vector<4x8xf32> to vector<4x8x1xf32>
    %49 = tpu.reciprocal %48 {approx = true} : vector<4x8x1xf32> -> vector<4x8x1xf32>
    %50 = vector.broadcast %49 : vector<4x8x1xf32> to vector<4x8x8xf32>
    %51 = arith.mulf %46, %50 : vector<4x8x8xf32>
    "tpu.trace_start"() <{level = 10 : i32, message = "wqk,wkd->wqd"}> : () -> ()
    %cst_23 = arith.constant dense<0.000000e+00> : vector<4x8x16xf32>
    %52 = tpu.matmul %51, %36, %cst_23 {dimension_numbers = #tpu.dot_dimension_numbers<[2], [1], [1], [2], [0, 0, 0, 1, 1, 2], [0], [0]>} : vector<4x8x8xf32>, vector<4x8x16xf32>, vector<4x8x16xf32> -> vector<4x8x16xf32>
    "tpu.trace_stop"() : () -> ()
    %53 = vector.shape_cast %52 : vector<4x8x16xf32> to vector<32x16xf32>
    %54 = arith.truncf %53 : vector<32x16xf32> to vector<32x16xbf16>
    %c0_24 = arith.constant 0 : index
    %c0_25 = arith.constant 0 : index
    %55 = vector.load %arg7[%c0_24, %c0_25] : memref<32x32xbf16, #tpu.memory_space<vmem>>, vector<16x32xbf16>
    %cst_26 = arith.constant dense<0.000000e+00> : vector<32x32xf32>
    %56 = tpu.matmul %54, %55, %cst_26 {dimension_numbers = #tpu.dot_dimension_numbers<[1], [0], [0], [1], [0, 0, 1, 1], [], []>} : vector<32x16xbf16>, vector<16x32xbf16>, vector<32x32xf32> -> vector<32x32xf32>
    %57 = arith.addf %30, %56 : vector<32x32xf32>
    %58 = vector.extract_strided_slice %29 {offsets = [0, 16], sizes = [32, 16], strides = [1, 1]} : vector<32x96xf32> to vector<32x16xf32>
    %59 = vector.shape_cast %58 : vector<32x16xf32> to vector<4x8x16xf32>
    %60 = vector.extract_strided_slice %29 {offsets = [0, 48], sizes = [32, 16], strides = [1, 1]} : vector<32x96xf32> to vector<32x16xf32>
    %61 = vector.shape_cast %60 : vector<32x16xf32> to vector<4x8x16xf32>
    %62 = vector.extract_strided_slice %29 {offsets = [0, 80], sizes = [32, 16], strides = [1, 1]} : vector<32x96xf32> to vector<32x16xf32>
    %63 = vector.shape_cast %62 : vector<32x16xf32> to vector<4x8x16xf32>
    "tpu.trace_start"() <{level = 10 : i32, message = "wqd,wkd->wqk"}> : () -> ()
    %cst_27 = arith.constant dense<0.000000e+00> : vector<4x8x8xf32>
    %64 = tpu.matmul %59, %61, %cst_27 {dimension_numbers = #tpu.dot_dimension_numbers<[2], [2], [1], [1], [0, 0, 0, 1, 1, 1], [0], [0]>} : vector<4x8x16xf32>, vector<4x8x16xf32>, vector<4x8x8xf32> -> vector<4x8x8xf32>
    "tpu.trace_stop"() : () -> ()
    %c1 = arith.constant 1 : index
    %c0_28 = arith.constant 0 : index
    %c0_29 = arith.constant 0 : index
    %c0_30 = arith.constant 0 : index
    %65 = vector.load %arg6[%c1, %c0_28, %c0_29, %c0_30] : memref<2x1x8x8xf32, #tpu.memory_space<vmem>>, vector<1x1x8x8xf32>
    %66 = vector.shape_cast %65 : vector<1x1x8x8xf32> to vector<1x8x8xf32>
    %67 = vector.broadcast %66 : vector<1x8x8xf32> to vector<4x8x8xf32>
    %68 = arith.addf %64, %67 : vector<4x8x8xf32>
    %cst_31 = arith.constant dense<0xFF800000> : vector<4x8xf32>
    %69 = vector.multi_reduction <maximumf>, %68, %cst_31 [2] : vector<4x8x8xf32> to vector<4x8xf32>
    %70 = vector.shape_cast %69 : vector<4x8xf32> to vector<4x8x1xf32>
    %71 = vector.broadcast %70 : vector<4x8x1xf32> to vector<4x8x8xf32>
    %72 = arith.subf %68, %71 : vector<4x8x8xf32>
    %73 = math.exp %72 : vector<4x8x8xf32>
    %cst_32 = arith.constant dense<0.000000e+00> : vector<4x8xf32>
    %74 = vector.multi_reduction <add>, %73, %cst_32 [2] : vector<4x8x8xf32> to vector<4x8xf32>
    %75 = vector.shape_cast %74 : vector<4x8xf32> to vector<4x8x1xf32>
    %76 = tpu.reciprocal %75 {approx = true} : vector<4x8x1xf32> -> vector<4x8x1xf32>
    %77 = vector.broadcast %76 : vector<4x8x1xf32> to vector<4x8x8xf32>
    %78 = arith.mulf %73, %77 : vector<4x8x8xf32>
    "tpu.trace_start"() <{level = 10 : i32, message = "wqk,wkd->wqd"}> : () -> ()
    %cst_33 = arith.constant dense<0.000000e+00> : vector<4x8x16xf32>
    %79 = tpu.matmul %78, %63, %cst_33 {dimension_numbers = #tpu.dot_dimension_numbers<[2], [1], [1], [2], [0, 0, 0, 1, 1, 2], [0], [0]>} : vector<4x8x8xf32>, vector<4x8x16xf32>, vector<4x8x16xf32> -> vector<4x8x16xf32>
    "tpu.trace_stop"() : () -> ()
    %80 = vector.shape_cast %79 : vector<4x8x16xf32> to vector<32x16xf32>
    %81 = arith.truncf %80 : vector<32x16xf32> to vector<32x16xbf16>
    %c16 = arith.constant 16 : index
    %c0_34 = arith.constant 0 : index
    %82 = vector.load %arg7[%c16, %c0_34] : memref<32x32xbf16, #tpu.memory_space<vmem>>, vector<16x32xbf16>
    %cst_35 = arith.constant dense<0.000000e+00> : vector<32x32xf32>
    %83 = tpu.matmul %81, %82, %cst_35 {dimension_numbers = #tpu.dot_dimension_numbers<[1], [0], [0], [1], [0, 0, 1, 1], [], []>} : vector<32x16xbf16>, vector<16x32xbf16>, vector<32x32xf32> -> vector<32x32xf32>
    %84 = arith.addf %57, %83 : vector<32x32xf32>
    %85 = arith.addf %1, %84 : vector<32x32xf32>
    %c0_36 = arith.constant 0 : index
    %c0_37 = arith.constant 0 : index
    %86 = vector.load %arg8[%c0_36, %c0_37] : memref<1x32xf32, #tpu.memory_space<vmem>>, vector<1x32xf32>
    %87 = vector.broadcast %86 : vector<1x32xf32> to vector<32x32xf32>
    %88 = arith.addf %85, %87 : vector<32x32xf32>
    %c0_38 = arith.constant 0 : index
    %c0_39 = arith.constant 0 : index
    %89 = vector.load %arg9[%c0_38, %c0_39] : memref<1x32xf32, #tpu.memory_space<vmem>>, vector<1x32xf32>
    %c0_40 = arith.constant 0 : index
    %c0_41 = arith.constant 0 : index
    %90 = vector.load %arg10[%c0_40, %c0_41] : memref<1x32xf32, #tpu.memory_space<vmem>>, vector<1x32xf32>
    %cst_42 = arith.constant dense<0.000000e+00> : vector<32xf32>
    %91 = vector.multi_reduction <add>, %88, %cst_42 [1] : vector<32x32xf32> to vector<32xf32>
    %92 = vector.shape_cast %91 : vector<32xf32> to vector<32x1xf32>
    %cst_43 = arith.constant 3.200000e+01 : f32
    %93 = vector.broadcast %cst_43 : f32 to vector<32x1xf32>
    %94 = arith.divf %92, %93 : vector<32x1xf32>
    %95 = vector.broadcast %94 : vector<32x1xf32> to vector<32x32xf32>
    %96 = arith.subf %88, %95 : vector<32x32xf32>
    %97 = arith.mulf %96, %96 : vector<32x32xf32>
    %cst_44 = arith.constant dense<0.000000e+00> : vector<32xf32>
    %98 = vector.multi_reduction <add>, %97, %cst_44 [1] : vector<32x32xf32> to vector<32xf32>
    %99 = vector.shape_cast %98 : vector<32xf32> to vector<32x1xf32>
    %cst_45 = arith.constant 3.200000e+01 : f32
    %100 = vector.broadcast %cst_45 : f32 to vector<32x1xf32>
    %101 = arith.divf %99, %100 : vector<32x1xf32>
    %cst_46 = arith.constant 9.99999974E-6 : f32
    %102 = vector.broadcast %cst_46 : f32 to vector<32x1xf32>
    %103 = arith.addf %101, %102 : vector<32x1xf32>
    %104 = math.rsqrt %103 : vector<32x1xf32>
    %105 = vector.broadcast %104 : vector<32x1xf32> to vector<32x32xf32>
    %106 = arith.mulf %96, %105 : vector<32x32xf32>
    %107 = vector.broadcast %89 : vector<1x32xf32> to vector<32x32xf32>
    %108 = arith.mulf %106, %107 : vector<32x32xf32>
    %109 = vector.broadcast %90 : vector<1x32xf32> to vector<32x32xf32>
    %110 = arith.addf %108, %109 : vector<32x32xf32>
    %111 = arith.truncf %110 : vector<32x32xf32> to vector<32x32xbf16>
    %c0_47 = arith.constant 0 : index
    %c0_48 = arith.constant 0 : index
    %112 = vector.load %arg11[%c0_47, %c0_48] : memref<32x128xbf16, #tpu.memory_space<vmem>>, vector<32x128xbf16>
    %cst_49 = arith.constant dense<0.000000e+00> : vector<32x128xf32>
    %113 = tpu.matmul %111, %112, %cst_49 {dimension_numbers = #tpu.dot_dimension_numbers<[1], [0], [0], [1], [0, 0, 1, 1], [], []>} : vector<32x32xbf16>, vector<32x128xbf16>, vector<32x128xf32> -> vector<32x128xf32>
    %c0_50 = arith.constant 0 : index
    %c0_51 = arith.constant 0 : index
    %114 = vector.load %arg12[%c0_50, %c0_51] : memref<1x128xf32, #tpu.memory_space<vmem>>, vector<1x128xf32>
    %115 = vector.broadcast %114 : vector<1x128xf32> to vector<32x128xf32>
    %116 = arith.addf %113, %115 : vector<32x128xf32>
    %cst_52 = arith.constant 5.000000e-01 : f32
    %117 = vector.broadcast %cst_52 : f32 to vector<32x128xf32>
    %118 = arith.mulf %117, %116 : vector<32x128xf32>
    %cst_53 = arith.constant 0.707106769 : f32
    %119 = vector.broadcast %cst_53 : f32 to vector<32x128xf32>
    %120 = arith.mulf %116, %119 : vector<32x128xf32>
    %121 = math.absf %120 : vector<32x128xf32>
    %cst_54 = arith.constant 0.327591091 : f32
    %122 = vector.broadcast %cst_54 : f32 to vector<32x128xf32>
    %123 = arith.mulf %122, %121 : vector<32x128xf32>
    %cst_55 = arith.constant 1.000000e+00 : f32
    %124 = vector.broadcast %cst_55 : f32 to vector<32x128xf32>
    %125 = arith.addf %124, %123 : vector<32x128xf32>
    %cst_56 = arith.constant 1.000000e+00 : f32
    %126 = vector.broadcast %cst_56 : f32 to vector<32x128xf32>
    %127 = arith.divf %126, %125 : vector<32x128xf32>
    %cst_57 = arith.constant 1.06140542 : f32
    %128 = vector.broadcast %cst_57 : f32 to vector<32x128xf32>
    %129 = arith.mulf %128, %127 : vector<32x128xf32>
    %cst_58 = arith.constant -1.45315206 : f32
    %130 = vector.broadcast %cst_58 : f32 to vector<32x128xf32>
    %131 = arith.addf %129, %130 : vector<32x128xf32>
    %132 = arith.mulf %131, %127 : vector<32x128xf32>
    %cst_59 = arith.constant 1.42141378 : f32
    %133 = vector.broadcast %cst_59 : f32 to vector<32x128xf32>
    %134 = arith.addf %132, %133 : vector<32x128xf32>
    %135 = arith.mulf %134, %127 : vector<32x128xf32>
    %cst_60 = arith.constant -0.284496725 : f32
    %136 = vector.broadcast %cst_60 : f32 to vector<32x128xf32>
    %137 = arith.addf %135, %136 : vector<32x128xf32>
    %138 = arith.mulf %137, %127 : vector<32x128xf32>
    %cst_61 = arith.constant 0.254829586 : f32
    %139 = vector.broadcast %cst_61 : f32 to vector<32x128xf32>
    %140 = arith.addf %138, %139 : vector<32x128xf32>
    %141 = arith.mulf %140, %127 : vector<32x128xf32>
    %cst_62 = arith.constant 0.000000e+00 : f32
    %142 = vector.broadcast %cst_62 : f32 to vector<32x128xf32>
    %143 = arith.subf %142, %121 : vector<32x128xf32>
    %144 = arith.mulf %143, %121 : vector<32x128xf32>
    %145 = math.exp %144 : vector<32x128xf32>
    %146 = arith.mulf %141, %145 : vector<32x128xf32>
    %cst_63 = arith.constant 1.000000e+00 : f32
    %147 = vector.broadcast %cst_63 : f32 to vector<32x128xf32>
    %148 = arith.subf %147, %146 : vector<32x128xf32>
    %cst_64 = arith.constant 0.000000e+00 : f32
    %149 = vector.broadcast %cst_64 : f32 to vector<32x128xf32>
    %150 = arith.cmpf oge, %120, %149 : vector<32x128xf32>
    %cst_65 = arith.constant 0.000000e+00 : f32
    %151 = vector.broadcast %cst_65 : f32 to vector<32x128xf32>
    %152 = arith.subf %151, %148 : vector<32x128xf32>
    %153 = arith.select %150, %148, %152 : vector<32x128xi1>, vector<32x128xf32>
    %cst_66 = arith.constant 1.000000e+00 : f32
    %154 = vector.broadcast %cst_66 : f32 to vector<32x128xf32>
    %155 = arith.addf %154, %153 : vector<32x128xf32>
    %156 = arith.mulf %118, %155 : vector<32x128xf32>
    %157 = arith.truncf %156 : vector<32x128xf32> to vector<32x128xbf16>
    %c0_67 = arith.constant 0 : index
    %c0_68 = arith.constant 0 : index
    %158 = vector.load %arg13[%c0_67, %c0_68] : memref<128x32xbf16, #tpu.memory_space<vmem>>, vector<128x32xbf16>
    %cst_69 = arith.constant dense<0.000000e+00> : vector<32x32xf32>
    %159 = tpu.matmul %157, %158, %cst_69 {dimension_numbers = #tpu.dot_dimension_numbers<[1], [0], [0], [1], [0, 0, 1, 1], [], []>} : vector<32x128xbf16>, vector<128x32xbf16>, vector<32x32xf32> -> vector<32x32xf32>
    %160 = arith.addf %88, %159 : vector<32x32xf32>
    %c0_70 = arith.constant 0 : index
    %c0_71 = arith.constant 0 : index
    %161 = vector.load %arg14[%c0_70, %c0_71] : memref<1x32xf32, #tpu.memory_space<vmem>>, vector<1x32xf32>
    %162 = vector.broadcast %161 : vector<1x32xf32> to vector<32x32xf32>
    %163 = arith.addf %160, %162 : vector<32x32xf32>
    %164 = vector.shape_cast %163 : vector<32x32xf32> to vector<4x8x32xf32>
    %c0_72 = arith.constant 0 : index
    %c0_73 = arith.constant 0 : index
    %c0_74 = arith.constant 0 : index
    %165 = vector.load %arg15[%c0_72, %c0_73, %c0_74] : memref<4x8x32xf32, #tpu.memory_space<vmem>>, vector<4x8x32xf32>
    tpu.vector_store %arg15[%c0_72, %c0_73, %c0_74], %164 {strides = array<i32>} : memref<4x8x32xf32, #tpu.memory_space<vmem>>, vector<4x8x32xf32>,
    return
  }
  func.func @transform_0(%arg0: i32) -> (i32, i32, i32) {
    %c0_i32 = arith.constant 0 : i32
    %c0_i32_0 = arith.constant 0 : i32
    %c0_i32_1 = arith.constant 0 : i32
    return %arg0, %c0_i32, %c0_i32_0 : i32, i32, i32
  }
  func.func @transform_1(%arg0: i32) -> (i32, i32) {
    %c0_i32 = arith.constant 0 : i32
    %c0_i32_0 = arith.constant 0 : i32
    %c0_i32_1 = arith.constant 0 : i32
    return %c0_i32, %c0_i32_0 : i32, i32
  }
  func.func @transform_2(%arg0: i32) -> (i32, i32) {
    %c0_i32 = arith.constant 0 : i32
    %c0_i32_0 = arith.constant 0 : i32
    %c0_i32_1 = arith.constant 0 : i32
    return %c0_i32, %c0_i32_0 : i32, i32
  }
  func.func @transform_3(%arg0: i32) -> (i32, i32) {
    %c0_i32 = arith.constant 0 : i32
    %c0_i32_0 = arith.constant 0 : i32
    %c0_i32_1 = arith.constant 0 : i32
    return %c0_i32, %c0_i32_0 : i32, i32
  }
  func.func @transform_4(%arg0: i32) -> (i32, i32) {
    %c0_i32 = arith.constant 0 : i32
    %c0_i32_0 = arith.constant 0 : i32
    %c0_i32_1 = arith.constant 0 : i32
    return %c0_i32, %c0_i32_0 : i32, i32
  }
  func.func @transform_5(%arg0: i32) -> (i32, i32, i32, i32) {
    %c0_i32 = arith.constant 0 : i32
    %c0_i32_0 = arith.constant 0 : i32
    %c0_i32_1 = arith.constant 0 : i32
    %c0_i32_2 = arith.constant 0 : i32
    %c0_i32_3 = arith.constant 0 : i32
    return %c0_i32, %c0_i32_0, %c0_i32_1, %c0_i32_2 : i32, i32, i32, i32
  }
  func.func @transform_6(%arg0: i32) -> (i32, i32) {
    %c0_i32 = arith.constant 0 : i32
    %c0_i32_0 = arith.constant 0 : i32
    %c0_i32_1 = arith.constant 0 : i32
    return %c0_i32, %c0_i32_0 : i32, i32
  }
  func.func @transform_7(%arg0: i32) -> (i32, i32) {
    %c0_i32 = arith.constant 0 : i32
    %c0_i32_0 = arith.constant 0 : i32
    %c0_i32_1 = arith.constant 0 : i32
    return %c0_i32, %c0_i32_0 : i32, i32
  }
  func.func @transform_8(%arg0: i32) -> (i32, i32) {
    %c0_i32 = arith.constant 0 : i32
    %c0_i32_0 = arith.constant 0 : i32
    %c0_i32_1 = arith.constant 0 : i32
    return %c0_i32, %c0_i32_0 : i32, i32
  }
  func.func @transform_9(%arg0: i32) -> (i32, i32) {
    %c0_i32 = arith.constant 0 : i32
    %c0_i32_0 = arith.constant 0 : i32
    %c0_i32_1 = arith.constant 0 : i32
    return %c0_i32, %c0_i32_0 : i32, i32
  }
  func.func @transform_10(%arg0: i32) -> (i32, i32) {
    %c0_i32 = arith.constant 0 : i32
    %c0_i32_0 = arith.constant 0 : i32
    %c0_i32_1 = arith.constant 0 : i32
    return %c0_i32, %c0_i32_0 : i32, i32
  }
  func.func @transform_11(%arg0: i32) -> (i32, i32) {
    %c0_i32 = arith.constant 0 : i32
    %c0_i32_0 = arith.constant 0 : i32
    %c0_i32_1 = arith.constant 0 : i32
    return %c0_i32, %c0_i32_0 : i32, i32
  }
  func.func @transform_12(%arg0: i32) -> (i32, i32) {
    %c0_i32 = arith.constant 0 : i32
    %c0_i32_0 = arith.constant 0 : i32
    %c0_i32_1 = arith.constant 0 : i32
    return %c0_i32, %c0_i32_0 : i32, i32
  }
  func.func @transform_13(%arg0: i32) -> (i32, i32) {
    %c0_i32 = arith.constant 0 : i32
    %c0_i32_0 = arith.constant 0 : i32
    %c0_i32_1 = arith.constant 0 : i32
    return %c0_i32, %c0_i32_0 : i32, i32
  }
  func.func @transform_14(%arg0: i32) -> (i32, i32, i32) {
    %c0_i32 = arith.constant 0 : i32
    %c0_i32_0 = arith.constant 0 : i32
    %c0_i32_1 = arith.constant 0 : i32
    return %arg0, %c0_i32, %c0_i32_0 : i32, i32, i32
  }
}

module attributes {stable_mosaic.version = 11 : i64} {
  func.func @kernel(%arg0: i32, %arg1: memref<4x8x32xf32, #tpu.memory_space<vmem>>, %arg2: memref<1x32xf32, #tpu.memory_space<vmem>>, %arg3: memref<1x32xf32, #tpu.memory_space<vmem>>, %arg4: memref<32x96xbf16, #tpu.memory_space<vmem>>, %arg5: memref<1x96xf32, #tpu.memory_space<vmem>>, %arg6: memref<2x4x8x8xf32, #tpu.memory_space<vmem>>, %arg7: memref<32x32xbf16, #tpu.memory_space<vmem>>, %arg8: memref<1x32xf32, #tpu.memory_space<vmem>>, %arg9: memref<1x32xf32, #tpu.memory_space<vmem>>, %arg10: memref<1x32xf32, #tpu.memory_space<vmem>>, %arg11: memref<32x128xbf16, #tpu.memory_space<vmem>>, %arg12: memref<1x128xf32, #tpu.memory_space<vmem>>, %arg13: memref<128x32xbf16, #tpu.memory_space<vmem>>, %arg14: memref<1x32xf32, #tpu.memory_space<vmem>>, %arg15: memref<4x8x32xf32, #tpu.memory_space<vmem>>) attributes {dimension_semantics = [#tpu.dimension_semantics<parallel>], iteration_bounds = array<i64: 2>, scalar_prefetch = 0 : i64, scratch_operands = 0 : i64, tpu.core_type = #tpu.core_type<tc>, window_params = [{transform_indices = @transform_0, window_bounds = array<i64: 4, 8, 32>}, {pipeline_mode = #tpu.pipeline_mode<synchronous>, transform_indices = @transform_1, window_bounds = array<i64: 1, 32>}, {pipeline_mode = #tpu.pipeline_mode<synchronous>, transform_indices = @transform_2, window_bounds = array<i64: 1, 32>}, {pipeline_mode = #tpu.pipeline_mode<synchronous>, transform_indices = @transform_3, window_bounds = array<i64: 32, 96>}, {pipeline_mode = #tpu.pipeline_mode<synchronous>, transform_indices = @transform_4, window_bounds = array<i64: 1, 96>}, {pipeline_mode = #tpu.pipeline_mode<synchronous>, transform_indices = @transform_5, window_bounds = array<i64: 2, 4, 8, 8>}, {pipeline_mode = #tpu.pipeline_mode<synchronous>, transform_indices = @transform_6, window_bounds = array<i64: 32, 32>}, {pipeline_mode = #tpu.pipeline_mode<synchronous>, transform_indices = @transform_7, window_bounds = array<i64: 1, 32>}, {pipeline_mode = #tpu.pipeline_mode<synchronous>, transform_indices = @transform_8, window_bounds = array<i64: 1, 32>}, {pipeline_mode = #tpu.pipeline_mode<synchronous>, transform_indices = @transform_9, window_bounds = array<i64: 1, 32>}, {pipeline_mode = #tpu.pipeline_mode<synchronous>, transform_indices = @transform_10, window_bounds = array<i64: 32, 128>}, {pipeline_mode = #tpu.pipeline_mode<synchronous>, transform_indices = @transform_11, window_bounds = array<i64: 1, 128>}, {pipeline_mode = #tpu.pipeline_mode<synchronous>, transform_indices = @transform_12, window_bounds = array<i64: 128, 32>}, {pipeline_mode = #tpu.pipeline_mode<synchronous>, transform_indices = @transform_13, window_bounds = array<i64: 1, 32>}, {transform_indices = @transform_14, window_bounds = array<i64: 4, 8, 32>}]} {
    %c0 = arith.constant 0 : index
    %c0_0 = arith.constant 0 : index
    %c0_1 = arith.constant 0 : index
    %0 = vector.load %arg1[%c0, %c0_0, %c0_1] : memref<4x8x32xf32, #tpu.memory_space<vmem>>, vector<4x8x32xf32>
    %1 = vector.shape_cast %0 : vector<4x8x32xf32> to vector<32x32xf32>
    %c0_2 = arith.constant 0 : index
    %c0_3 = arith.constant 0 : index
    %2 = vector.load %arg2[%c0_2, %c0_3] : memref<1x32xf32, #tpu.memory_space<vmem>>, vector<1x32xf32>
    %c0_4 = arith.constant 0 : index
    %c0_5 = arith.constant 0 : index
    %3 = vector.load %arg3[%c0_4, %c0_5] : memref<1x32xf32, #tpu.memory_space<vmem>>, vector<1x32xf32>
    %cst = arith.constant dense<0.000000e+00> : vector<32xf32>
    %4 = vector.multi_reduction <add>, %1, %cst [1] : vector<32x32xf32> to vector<32xf32>
    %5 = vector.shape_cast %4 : vector<32xf32> to vector<32x1xf32>
    %cst_6 = arith.constant 3.200000e+01 : f32
    %6 = vector.broadcast %cst_6 : f32 to vector<32x1xf32>
    %7 = arith.divf %5, %6 : vector<32x1xf32>
    %8 = vector.broadcast %7 : vector<32x1xf32> to vector<32x32xf32>
    %9 = arith.subf %1, %8 : vector<32x32xf32>
    %10 = arith.mulf %9, %9 : vector<32x32xf32>
    %cst_7 = arith.constant dense<0.000000e+00> : vector<32xf32>
    %11 = vector.multi_reduction <add>, %10, %cst_7 [1] : vector<32x32xf32> to vector<32xf32>
    %12 = vector.shape_cast %11 : vector<32xf32> to vector<32x1xf32>
    %cst_8 = arith.constant 3.200000e+01 : f32
    %13 = vector.broadcast %cst_8 : f32 to vector<32x1xf32>
    %14 = arith.divf %12, %13 : vector<32x1xf32>
    %cst_9 = arith.constant 9.99999974E-6 : f32
    %15 = vector.broadcast %cst_9 : f32 to vector<32x1xf32>
    %16 = arith.addf %14, %15 : vector<32x1xf32>
    %17 = math.rsqrt %16 : vector<32x1xf32>
    %18 = vector.broadcast %17 : vector<32x1xf32> to vector<32x32xf32>
    %19 = arith.mulf %9, %18 : vector<32x32xf32>
    %20 = vector.broadcast %2 : vector<1x32xf32> to vector<32x32xf32>
    %21 = arith.mulf %19, %20 : vector<32x32xf32>
    %22 = vector.broadcast %3 : vector<1x32xf32> to vector<32x32xf32>
    %23 = arith.addf %21, %22 : vector<32x32xf32>
    %24 = arith.truncf %23 : vector<32x32xf32> to vector<32x32xbf16>
    %c0_10 = arith.constant 0 : index
    %c0_11 = arith.constant 0 : index
    %25 = vector.load %arg4[%c0_10, %c0_11] : memref<32x96xbf16, #tpu.memory_space<vmem>>, vector<32x96xbf16>
    %cst_12 = arith.constant dense<0.000000e+00> : vector<32x96xf32>
    %26 = tpu.matmul %24, %25, %cst_12 {dimension_numbers = #tpu.dot_dimension_numbers<[1], [0], [0], [1], [0, 0, 1, 1], [], []>} : vector<32x32xbf16>, vector<32x96xbf16>, vector<32x96xf32> -> vector<32x96xf32>
    %c0_13 = arith.constant 0 : index
    %c0_14 = arith.constant 0 : index
    %27 = vector.load %arg5[%c0_13, %c0_14] : memref<1x96xf32, #tpu.memory_space<vmem>>, vector<1x96xf32>
    %28 = vector.broadcast %27 : vector<1x96xf32> to vector<32x96xf32>
    %29 = arith.addf %26, %28 : vector<32x96xf32>
    %cst_15 = arith.constant 0.000000e+00 : f32
    %30 = vector.broadcast %cst_15 : f32 to vector<32x32xf32>
    %31 = vector.extract_strided_slice %29 {offsets = [0, 0], sizes = [32, 16], strides = [1, 1]} : vector<32x96xf32> to vector<32x16xf32>
    %32 = vector.shape_cast %31 : vector<32x16xf32> to vector<4x8x16xf32>
    %33 = vector.extract_strided_slice %29 {offsets = [0, 32], sizes = [32, 16], strides = [1, 1]} : vector<32x96xf32> to vector<32x16xf32>
    %34 = vector.shape_cast %33 : vector<32x16xf32> to vector<4x8x16xf32>
    %35 = vector.extract_strided_slice %29 {offsets = [0, 64], sizes = [32, 16], strides = [1, 1]} : vector<32x96xf32> to vector<32x16xf32>
    %36 = vector.shape_cast %35 : vector<32x16xf32> to vector<4x8x16xf32>
    "tpu.trace_start"() <{level = 10 : i32, message = "wqd,wkd->wqk"}> : () -> ()
    %cst_16 = arith.constant dense<0.000000e+00> : vector<4x8x8xf32>
    %37 = tpu.matmul %32, %34, %cst_16 {dimension_numbers = #tpu.dot_dimension_numbers<[2], [2], [1], [1], [0, 0, 0, 1, 1, 1], [0], [0]>} : vector<4x8x16xf32>, vector<4x8x16xf32>, vector<4x8x8xf32> -> vector<4x8x8xf32>
    "tpu.trace_stop"() : () -> ()
    %c0_17 = arith.constant 0 : index
    %c0_18 = arith.constant 0 : index
    %c0_19 = arith.constant 0 : index
    %c0_20 = arith.constant 0 : index
    %38 = vector.load %arg6[%c0_17, %c0_18, %c0_19, %c0_20] : memref<2x4x8x8xf32, #tpu.memory_space<vmem>>, vector<1x4x8x8xf32>
    %39 = vector.shape_cast %38 : vector<1x4x8x8xf32> to vector<4x8x8xf32>
    %40 = arith.addf %37, %39 : vector<4x8x8xf32>
    %cst_21 = arith.constant dense<0xFF800000> : vector<4x8xf32>
    %41 = vector.multi_reduction <maximumf>, %40, %cst_21 [2] : vector<4x8x8xf32> to vector<4x8xf32>
    %42 = vector.shape_cast %41 : vector<4x8xf32> to vector<4x8x1xf32>
    %43 = vector.broadcast %42 : vector<4x8x1xf32> to vector<4x8x8xf32>
    %44 = arith.subf %40, %43 : vector<4x8x8xf32>
    %45 = math.exp %44 : vector<4x8x8xf32>
    %cst_22 = arith.constant dense<0.000000e+00> : vector<4x8xf32>
    %46 = vector.multi_reduction <add>, %45, %cst_22 [2] : vector<4x8x8xf32> to vector<4x8xf32>
    %47 = vector.shape_cast %46 : vector<4x8xf32> to vector<4x8x1xf32>
    %48 = tpu.reciprocal %47 {approx = true} : vector<4x8x1xf32> -> vector<4x8x1xf32>
    %49 = vector.broadcast %48 : vector<4x8x1xf32> to vector<4x8x8xf32>
    %50 = arith.mulf %45, %49 : vector<4x8x8xf32>
    "tpu.trace_start"() <{level = 10 : i32, message = "wqk,wkd->wqd"}> : () -> ()
    %cst_23 = arith.constant dense<0.000000e+00> : vector<4x8x16xf32>
    %51 = tpu.matmul %50, %36, %cst_23 {dimension_numbers = #tpu.dot_dimension_numbers<[2], [1], [1], [2], [0, 0, 0, 1, 1, 2], [0], [0]>} : vector<4x8x8xf32>, vector<4x8x16xf32>, vector<4x8x16xf32> -> vector<4x8x16xf32>
    "tpu.trace_stop"() : () -> ()
    %52 = vector.shape_cast %51 : vector<4x8x16xf32> to vector<32x16xf32>
    %53 = arith.truncf %52 : vector<32x16xf32> to vector<32x16xbf16>
    %c0_24 = arith.constant 0 : index
    %c0_25 = arith.constant 0 : index
    %54 = vector.load %arg7[%c0_24, %c0_25] : memref<32x32xbf16, #tpu.memory_space<vmem>>, vector<16x32xbf16>
    %cst_26 = arith.constant dense<0.000000e+00> : vector<32x32xf32>
    %55 = tpu.matmul %53, %54, %cst_26 {dimension_numbers = #tpu.dot_dimension_numbers<[1], [0], [0], [1], [0, 0, 1, 1], [], []>} : vector<32x16xbf16>, vector<16x32xbf16>, vector<32x32xf32> -> vector<32x32xf32>
    %56 = arith.addf %30, %55 : vector<32x32xf32>
    %57 = vector.extract_strided_slice %29 {offsets = [0, 16], sizes = [32, 16], strides = [1, 1]} : vector<32x96xf32> to vector<32x16xf32>
    %58 = vector.shape_cast %57 : vector<32x16xf32> to vector<4x8x16xf32>
    %59 = vector.extract_strided_slice %29 {offsets = [0, 48], sizes = [32, 16], strides = [1, 1]} : vector<32x96xf32> to vector<32x16xf32>
    %60 = vector.shape_cast %59 : vector<32x16xf32> to vector<4x8x16xf32>
    %61 = vector.extract_strided_slice %29 {offsets = [0, 80], sizes = [32, 16], strides = [1, 1]} : vector<32x96xf32> to vector<32x16xf32>
    %62 = vector.shape_cast %61 : vector<32x16xf32> to vector<4x8x16xf32>
    "tpu.trace_start"() <{level = 10 : i32, message = "wqd,wkd->wqk"}> : () -> ()
    %cst_27 = arith.constant dense<0.000000e+00> : vector<4x8x8xf32>
    %63 = tpu.matmul %58, %60, %cst_27 {dimension_numbers = #tpu.dot_dimension_numbers<[2], [2], [1], [1], [0, 0, 0, 1, 1, 1], [0], [0]>} : vector<4x8x16xf32>, vector<4x8x16xf32>, vector<4x8x8xf32> -> vector<4x8x8xf32>
    "tpu.trace_stop"() : () -> ()
    %c1 = arith.constant 1 : index
    %c0_28 = arith.constant 0 : index
    %c0_29 = arith.constant 0 : index
    %c0_30 = arith.constant 0 : index
    %64 = vector.load %arg6[%c1, %c0_28, %c0_29, %c0_30] : memref<2x4x8x8xf32, #tpu.memory_space<vmem>>, vector<1x4x8x8xf32>
    %65 = vector.shape_cast %64 : vector<1x4x8x8xf32> to vector<4x8x8xf32>
    %66 = arith.addf %63, %65 : vector<4x8x8xf32>
    %cst_31 = arith.constant dense<0xFF800000> : vector<4x8xf32>
    %67 = vector.multi_reduction <maximumf>, %66, %cst_31 [2] : vector<4x8x8xf32> to vector<4x8xf32>
    %68 = vector.shape_cast %67 : vector<4x8xf32> to vector<4x8x1xf32>
    %69 = vector.broadcast %68 : vector<4x8x1xf32> to vector<4x8x8xf32>
    %70 = arith.subf %66, %69 : vector<4x8x8xf32>
    %71 = math.exp %70 : vector<4x8x8xf32>
    %cst_32 = arith.constant dense<0.000000e+00> : vector<4x8xf32>
    %72 = vector.multi_reduction <add>, %71, %cst_32 [2] : vector<4x8x8xf32> to vector<4x8xf32>
    %73 = vector.shape_cast %72 : vector<4x8xf32> to vector<4x8x1xf32>
    %74 = tpu.reciprocal %73 {approx = true} : vector<4x8x1xf32> -> vector<4x8x1xf32>
    %75 = vector.broadcast %74 : vector<4x8x1xf32> to vector<4x8x8xf32>
    %76 = arith.mulf %71, %75 : vector<4x8x8xf32>
    "tpu.trace_start"() <{level = 10 : i32, message = "wqk,wkd->wqd"}> : () -> ()
    %cst_33 = arith.constant dense<0.000000e+00> : vector<4x8x16xf32>
    %77 = tpu.matmul %76, %62, %cst_33 {dimension_numbers = #tpu.dot_dimension_numbers<[2], [1], [1], [2], [0, 0, 0, 1, 1, 2], [0], [0]>} : vector<4x8x8xf32>, vector<4x8x16xf32>, vector<4x8x16xf32> -> vector<4x8x16xf32>
    "tpu.trace_stop"() : () -> ()
    %78 = vector.shape_cast %77 : vector<4x8x16xf32> to vector<32x16xf32>
    %79 = arith.truncf %78 : vector<32x16xf32> to vector<32x16xbf16>
    %c16 = arith.constant 16 : index
    %c0_34 = arith.constant 0 : index
    %80 = vector.load %arg7[%c16, %c0_34] : memref<32x32xbf16, #tpu.memory_space<vmem>>, vector<16x32xbf16>
    %cst_35 = arith.constant dense<0.000000e+00> : vector<32x32xf32>
    %81 = tpu.matmul %79, %80, %cst_35 {dimension_numbers = #tpu.dot_dimension_numbers<[1], [0], [0], [1], [0, 0, 1, 1], [], []>} : vector<32x16xbf16>, vector<16x32xbf16>, vector<32x32xf32> -> vector<32x32xf32>
    %82 = arith.addf %56, %81 : vector<32x32xf32>
    %83 = arith.addf %1, %82 : vector<32x32xf32>
    %c0_36 = arith.constant 0 : index
    %c0_37 = arith.constant 0 : index
    %84 = vector.load %arg8[%c0_36, %c0_37] : memref<1x32xf32, #tpu.memory_space<vmem>>, vector<1x32xf32>
    %85 = vector.broadcast %84 : vector<1x32xf32> to vector<32x32xf32>
    %86 = arith.addf %83, %85 : vector<32x32xf32>
    %c0_38 = arith.constant 0 : index
    %c0_39 = arith.constant 0 : index
    %87 = vector.load %arg9[%c0_38, %c0_39] : memref<1x32xf32, #tpu.memory_space<vmem>>, vector<1x32xf32>
    %c0_40 = arith.constant 0 : index
    %c0_41 = arith.constant 0 : index
    %88 = vector.load %arg10[%c0_40, %c0_41] : memref<1x32xf32, #tpu.memory_space<vmem>>, vector<1x32xf32>
    %cst_42 = arith.constant dense<0.000000e+00> : vector<32xf32>
    %89 = vector.multi_reduction <add>, %86, %cst_42 [1] : vector<32x32xf32> to vector<32xf32>
    %90 = vector.shape_cast %89 : vector<32xf32> to vector<32x1xf32>
    %cst_43 = arith.constant 3.200000e+01 : f32
    %91 = vector.broadcast %cst_43 : f32 to vector<32x1xf32>
    %92 = arith.divf %90, %91 : vector<32x1xf32>
    %93 = vector.broadcast %92 : vector<32x1xf32> to vector<32x32xf32>
    %94 = arith.subf %86, %93 : vector<32x32xf32>
    %95 = arith.mulf %94, %94 : vector<32x32xf32>
    %cst_44 = arith.constant dense<0.000000e+00> : vector<32xf32>
    %96 = vector.multi_reduction <add>, %95, %cst_44 [1] : vector<32x32xf32> to vector<32xf32>
    %97 = vector.shape_cast %96 : vector<32xf32> to vector<32x1xf32>
    %cst_45 = arith.constant 3.200000e+01 : f32
    %98 = vector.broadcast %cst_45 : f32 to vector<32x1xf32>
    %99 = arith.divf %97, %98 : vector<32x1xf32>
    %cst_46 = arith.constant 9.99999974E-6 : f32
    %100 = vector.broadcast %cst_46 : f32 to vector<32x1xf32>
    %101 = arith.addf %99, %100 : vector<32x1xf32>
    %102 = math.rsqrt %101 : vector<32x1xf32>
    %103 = vector.broadcast %102 : vector<32x1xf32> to vector<32x32xf32>
    %104 = arith.mulf %94, %103 : vector<32x32xf32>
    %105 = vector.broadcast %87 : vector<1x32xf32> to vector<32x32xf32>
    %106 = arith.mulf %104, %105 : vector<32x32xf32>
    %107 = vector.broadcast %88 : vector<1x32xf32> to vector<32x32xf32>
    %108 = arith.addf %106, %107 : vector<32x32xf32>
    %109 = arith.truncf %108 : vector<32x32xf32> to vector<32x32xbf16>
    %c0_47 = arith.constant 0 : index
    %c0_48 = arith.constant 0 : index
    %110 = vector.load %arg11[%c0_47, %c0_48] : memref<32x128xbf16, #tpu.memory_space<vmem>>, vector<32x128xbf16>
    %cst_49 = arith.constant dense<0.000000e+00> : vector<32x128xf32>
    %111 = tpu.matmul %109, %110, %cst_49 {dimension_numbers = #tpu.dot_dimension_numbers<[1], [0], [0], [1], [0, 0, 1, 1], [], []>} : vector<32x32xbf16>, vector<32x128xbf16>, vector<32x128xf32> -> vector<32x128xf32>
    %c0_50 = arith.constant 0 : index
    %c0_51 = arith.constant 0 : index
    %112 = vector.load %arg12[%c0_50, %c0_51] : memref<1x128xf32, #tpu.memory_space<vmem>>, vector<1x128xf32>
    %113 = vector.broadcast %112 : vector<1x128xf32> to vector<32x128xf32>
    %114 = arith.addf %111, %113 : vector<32x128xf32>
    %cst_52 = arith.constant 5.000000e-01 : f32
    %115 = vector.broadcast %cst_52 : f32 to vector<32x128xf32>
    %116 = arith.mulf %115, %114 : vector<32x128xf32>
    %cst_53 = arith.constant 0.707106769 : f32
    %117 = vector.broadcast %cst_53 : f32 to vector<32x128xf32>
    %118 = arith.mulf %114, %117 : vector<32x128xf32>
    %119 = math.absf %118 : vector<32x128xf32>
    %cst_54 = arith.constant 0.327591091 : f32
    %120 = vector.broadcast %cst_54 : f32 to vector<32x128xf32>
    %121 = arith.mulf %120, %119 : vector<32x128xf32>
    %cst_55 = arith.constant 1.000000e+00 : f32
    %122 = vector.broadcast %cst_55 : f32 to vector<32x128xf32>
    %123 = arith.addf %122, %121 : vector<32x128xf32>
    %cst_56 = arith.constant 1.000000e+00 : f32
    %124 = vector.broadcast %cst_56 : f32 to vector<32x128xf32>
    %125 = arith.divf %124, %123 : vector<32x128xf32>
    %cst_57 = arith.constant 1.06140542 : f32
    %126 = vector.broadcast %cst_57 : f32 to vector<32x128xf32>
    %127 = arith.mulf %126, %125 : vector<32x128xf32>
    %cst_58 = arith.constant -1.45315206 : f32
    %128 = vector.broadcast %cst_58 : f32 to vector<32x128xf32>
    %129 = arith.addf %127, %128 : vector<32x128xf32>
    %130 = arith.mulf %129, %125 : vector<32x128xf32>
    %cst_59 = arith.constant 1.42141378 : f32
    %131 = vector.broadcast %cst_59 : f32 to vector<32x128xf32>
    %132 = arith.addf %130, %131 : vector<32x128xf32>
    %133 = arith.mulf %132, %125 : vector<32x128xf32>
    %cst_60 = arith.constant -0.284496725 : f32
    %134 = vector.broadcast %cst_60 : f32 to vector<32x128xf32>
    %135 = arith.addf %133, %134 : vector<32x128xf32>
    %136 = arith.mulf %135, %125 : vector<32x128xf32>
    %cst_61 = arith.constant 0.254829586 : f32
    %137 = vector.broadcast %cst_61 : f32 to vector<32x128xf32>
    %138 = arith.addf %136, %137 : vector<32x128xf32>
    %139 = arith.mulf %138, %125 : vector<32x128xf32>
    %cst_62 = arith.constant 0.000000e+00 : f32
    %140 = vector.broadcast %cst_62 : f32 to vector<32x128xf32>
    %141 = arith.subf %140, %119 : vector<32x128xf32>
    %142 = arith.mulf %141, %119 : vector<32x128xf32>
    %143 = math.exp %142 : vector<32x128xf32>
    %144 = arith.mulf %139, %143 : vector<32x128xf32>
    %cst_63 = arith.constant 1.000000e+00 : f32
    %145 = vector.broadcast %cst_63 : f32 to vector<32x128xf32>
    %146 = arith.subf %145, %144 : vector<32x128xf32>
    %cst_64 = arith.constant 0.000000e+00 : f32
    %147 = vector.broadcast %cst_64 : f32 to vector<32x128xf32>
    %148 = arith.cmpf oge, %118, %147 : vector<32x128xf32>
    %cst_65 = arith.constant 0.000000e+00 : f32
    %149 = vector.broadcast %cst_65 : f32 to vector<32x128xf32>
    %150 = arith.subf %149, %146 : vector<32x128xf32>
    %151 = arith.select %148, %146, %150 : vector<32x128xi1>, vector<32x128xf32>
    %cst_66 = arith.constant 1.000000e+00 : f32
    %152 = vector.broadcast %cst_66 : f32 to vector<32x128xf32>
    %153 = arith.addf %152, %151 : vector<32x128xf32>
    %154 = arith.mulf %116, %153 : vector<32x128xf32>
    %155 = arith.truncf %154 : vector<32x128xf32> to vector<32x128xbf16>
    %c0_67 = arith.constant 0 : index
    %c0_68 = arith.constant 0 : index
    %156 = vector.load %arg13[%c0_67, %c0_68] : memref<128x32xbf16, #tpu.memory_space<vmem>>, vector<128x32xbf16>
    %cst_69 = arith.constant dense<0.000000e+00> : vector<32x32xf32>
    %157 = tpu.matmul %155, %156, %cst_69 {dimension_numbers = #tpu.dot_dimension_numbers<[1], [0], [0], [1], [0, 0, 1, 1], [], []>} : vector<32x128xbf16>, vector<128x32xbf16>, vector<32x32xf32> -> vector<32x32xf32>
    %158 = arith.addf %86, %157 : vector<32x32xf32>
    %c0_70 = arith.constant 0 : index
    %c0_71 = arith.constant 0 : index
    %159 = vector.load %arg14[%c0_70, %c0_71] : memref<1x32xf32, #tpu.memory_space<vmem>>, vector<1x32xf32>
    %160 = vector.broadcast %159 : vector<1x32xf32> to vector<32x32xf32>
    %161 = arith.addf %158, %160 : vector<32x32xf32>
    %162 = vector.shape_cast %161 : vector<32x32xf32> to vector<4x8x32xf32>
    %c0_72 = arith.constant 0 : index
    %c0_73 = arith.constant 0 : index
    %c0_74 = arith.constant 0 : index
    %163 = vector.load %arg15[%c0_72, %c0_73, %c0_74] : memref<4x8x32xf32, #tpu.memory_space<vmem>>, vector<4x8x32xf32>
    tpu.vector_store %arg15[%c0_72, %c0_73, %c0_74], %162 {strides = array<i32>} : memref<4x8x32xf32, #tpu.memory_space<vmem>>, vector<4x8x32xf32>,
    return
  }
  func.func @transform_0(%arg0: i32) -> (i32, i32, i32) {
    %c0_i32 = arith.constant 0 : i32
    %c0_i32_0 = arith.constant 0 : i32
    %c0_i32_1 = arith.constant 0 : i32
    return %arg0, %c0_i32, %c0_i32_0 : i32, i32, i32
  }
  func.func @transform_1(%arg0: i32) -> (i32, i32) {
    %c0_i32 = arith.constant 0 : i32
    %c0_i32_0 = arith.constant 0 : i32
    %c0_i32_1 = arith.constant 0 : i32
    return %c0_i32, %c0_i32_0 : i32, i32
  }
  func.func @transform_2(%arg0: i32) -> (i32, i32) {
    %c0_i32 = arith.constant 0 : i32
    %c0_i32_0 = arith.constant 0 : i32
    %c0_i32_1 = arith.constant 0 : i32
    return %c0_i32, %c0_i32_0 : i32, i32
  }
  func.func @transform_3(%arg0: i32) -> (i32, i32) {
    %c0_i32 = arith.constant 0 : i32
    %c0_i32_0 = arith.constant 0 : i32
    %c0_i32_1 = arith.constant 0 : i32
    return %c0_i32, %c0_i32_0 : i32, i32
  }
  func.func @transform_4(%arg0: i32) -> (i32, i32) {
    %c0_i32 = arith.constant 0 : i32
    %c0_i32_0 = arith.constant 0 : i32
    %c0_i32_1 = arith.constant 0 : i32
    return %c0_i32, %c0_i32_0 : i32, i32
  }
  func.func @transform_5(%arg0: i32) -> (i32, i32, i32, i32) {
    %c0_i32 = arith.constant 0 : i32
    %c0_i32_0 = arith.constant 0 : i32
    %c0_i32_1 = arith.constant 0 : i32
    %c0_i32_2 = arith.constant 0 : i32
    %c0_i32_3 = arith.constant 0 : i32
    return %c0_i32, %c0_i32_0, %c0_i32_1, %c0_i32_2 : i32, i32, i32, i32
  }
  func.func @transform_6(%arg0: i32) -> (i32, i32) {
    %c0_i32 = arith.constant 0 : i32
    %c0_i32_0 = arith.constant 0 : i32
    %c0_i32_1 = arith.constant 0 : i32
    return %c0_i32, %c0_i32_0 : i32, i32
  }
  func.func @transform_7(%arg0: i32) -> (i32, i32) {
    %c0_i32 = arith.constant 0 : i32
    %c0_i32_0 = arith.constant 0 : i32
    %c0_i32_1 = arith.constant 0 : i32
    return %c0_i32, %c0_i32_0 : i32, i32
  }
  func.func @transform_8(%arg0: i32) -> (i32, i32) {
    %c0_i32 = arith.constant 0 : i32
    %c0_i32_0 = arith.constant 0 : i32
    %c0_i32_1 = arith.constant 0 : i32
    return %c0_i32, %c0_i32_0 : i32, i32
  }
  func.func @transform_9(%arg0: i32) -> (i32, i32) {
    %c0_i32 = arith.constant 0 : i32
    %c0_i32_0 = arith.constant 0 : i32
    %c0_i32_1 = arith.constant 0 : i32
    return %c0_i32, %c0_i32_0 : i32, i32
  }
  func.func @transform_10(%arg0: i32) -> (i32, i32) {
    %c0_i32 = arith.constant 0 : i32
    %c0_i32_0 = arith.constant 0 : i32
    %c0_i32_1 = arith.constant 0 : i32
    return %c0_i32, %c0_i32_0 : i32, i32
  }
  func.func @transform_11(%arg0: i32) -> (i32, i32) {
    %c0_i32 = arith.constant 0 : i32
    %c0_i32_0 = arith.constant 0 : i32
    %c0_i32_1 = arith.constant 0 : i32
    return %c0_i32, %c0_i32_0 : i32, i32
  }
  func.func @transform_12(%arg0: i32) -> (i32, i32) {
    %c0_i32 = arith.constant 0 : i32
    %c0_i32_0 = arith.constant 0 : i32
    %c0_i32_1 = arith.constant 0 : i32
    return %c0_i32, %c0_i32_0 : i32, i32
  }
  func.func @transform_13(%arg0: i32) -> (i32, i32) {
    %c0_i32 = arith.constant 0 : i32
    %c0_i32_0 = arith.constant 0 : i32
    %c0_i32_1 = arith.constant 0 : i32
    return %c0_i32, %c0_i32_0 : i32, i32
  }
  func.func @transform_14(%arg0: i32) -> (i32, i32, i32) {
    %c0_i32 = arith.constant 0 : i32
    %c0_i32_0 = arith.constant 0 : i32
    %c0_i32_1 = arith.constant 0 : i32
    return %arg0, %c0_i32, %c0_i32_0 : i32, i32, i32
  }
}

module attributes {stable_mosaic.version = 11 : i64} {
  func.func @_merge_kernel(%arg0: i32, %arg1: memref<8x128xf32, #tpu.memory_space<vmem>>, %arg2: memref<1x128xf32, #tpu.memory_space<vmem>>, %arg3: memref<1x128xf32, #tpu.memory_space<vmem>>, %arg4: memref<128x64xbf16, #tpu.memory_space<vmem>>, %arg5: memref<8x64xf32, #tpu.memory_space<vmem>>) attributes {dimension_semantics = [#tpu.dimension_semantics<parallel>], iteration_bounds = array<i64: 2>, scalar_prefetch = 0 : i64, scratch_operands = 0 : i64, tpu.core_type = #tpu.core_type<tc>, window_params = [{transform_indices = @transform_0, window_bounds = array<i64: 8, 128>}, {pipeline_mode = #tpu.pipeline_mode<synchronous>, transform_indices = @transform_1, window_bounds = array<i64: 1, 128>}, {pipeline_mode = #tpu.pipeline_mode<synchronous>, transform_indices = @transform_2, window_bounds = array<i64: 1, 128>}, {pipeline_mode = #tpu.pipeline_mode<synchronous>, transform_indices = @transform_3, window_bounds = array<i64: 128, 64>}, {transform_indices = @transform_4, window_bounds = array<i64: 8, 64>}]} {
    %c0 = arith.constant 0 : index
    %c0_0 = arith.constant 0 : index
    %0 = vector.load %arg1[%c0, %c0_0] : memref<8x128xf32, #tpu.memory_space<vmem>>, vector<8x128xf32>
    %c0_1 = arith.constant 0 : index
    %c0_2 = arith.constant 0 : index
    %1 = vector.load %arg2[%c0_1, %c0_2] : memref<1x128xf32, #tpu.memory_space<vmem>>, vector<1x128xf32>
    %c0_3 = arith.constant 0 : index
    %c0_4 = arith.constant 0 : index
    %2 = vector.load %arg3[%c0_3, %c0_4] : memref<1x128xf32, #tpu.memory_space<vmem>>, vector<1x128xf32>
    %cst = arith.constant dense<0.000000e+00> : vector<8xf32>
    %3 = vector.multi_reduction <add>, %0, %cst [1] : vector<8x128xf32> to vector<8xf32>
    %4 = vector.shape_cast %3 : vector<8xf32> to vector<8x1xf32>
    %cst_5 = arith.constant 1.280000e+02 : f32
    %5 = vector.broadcast %cst_5 : f32 to vector<8x1xf32>
    %6 = arith.divf %4, %5 : vector<8x1xf32>
    %7 = vector.broadcast %6 : vector<8x1xf32> to vector<8x128xf32>
    %8 = arith.subf %0, %7 : vector<8x128xf32>
    %9 = arith.mulf %8, %8 : vector<8x128xf32>
    %cst_6 = arith.constant dense<0.000000e+00> : vector<8xf32>
    %10 = vector.multi_reduction <add>, %9, %cst_6 [1] : vector<8x128xf32> to vector<8xf32>
    %11 = vector.shape_cast %10 : vector<8xf32> to vector<8x1xf32>
    %cst_7 = arith.constant 1.280000e+02 : f32
    %12 = vector.broadcast %cst_7 : f32 to vector<8x1xf32>
    %13 = arith.divf %11, %12 : vector<8x1xf32>
    %cst_8 = arith.constant 9.99999974E-6 : f32
    %14 = vector.broadcast %cst_8 : f32 to vector<8x1xf32>
    %15 = arith.addf %13, %14 : vector<8x1xf32>
    %16 = math.rsqrt %15 : vector<8x1xf32>
    %17 = vector.broadcast %16 : vector<8x1xf32> to vector<8x128xf32>
    %18 = arith.mulf %8, %17 : vector<8x128xf32>
    %19 = vector.broadcast %1 : vector<1x128xf32> to vector<8x128xf32>
    %20 = arith.mulf %18, %19 : vector<8x128xf32>
    %21 = vector.broadcast %2 : vector<1x128xf32> to vector<8x128xf32>
    %22 = arith.addf %20, %21 : vector<8x128xf32>
    %23 = arith.truncf %22 : vector<8x128xf32> to vector<8x128xbf16>
    %c0_9 = arith.constant 0 : index
    %c0_10 = arith.constant 0 : index
    %24 = vector.load %arg4[%c0_9, %c0_10] : memref<128x64xbf16, #tpu.memory_space<vmem>>, vector<128x64xbf16>
    %cst_11 = arith.constant dense<0.000000e+00> : vector<8x64xf32>
    %25 = tpu.matmul %23, %24, %cst_11 {dimension_numbers = #tpu.dot_dimension_numbers<[1], [0], [0], [1], [0, 0, 1, 1], [], []>} : vector<8x128xbf16>, vector<128x64xbf16>, vector<8x64xf32> -> vector<8x64xf32>
    %c0_12 = arith.constant 0 : index
    %c0_13 = arith.constant 0 : index
    %26 = vector.load %arg5[%c0_12, %c0_13] : memref<8x64xf32, #tpu.memory_space<vmem>>, vector<8x64xf32>
    tpu.vector_store %arg5[%c0_12, %c0_13], %25 {strides = array<i32>} : memref<8x64xf32, #tpu.memory_space<vmem>>, vector<8x64xf32>,
    return
  }
  func.func @transform_0(%arg0: i32) -> (i32, i32) {
    %c0_i32 = arith.constant 0 : i32
    %c0_i32_0 = arith.constant 0 : i32
    return %arg0, %c0_i32 : i32, i32
  }
  func.func @transform_1(%arg0: i32) -> (i32, i32) {
    %c0_i32 = arith.constant 0 : i32
    %c0_i32_0 = arith.constant 0 : i32
    %c0_i32_1 = arith.constant 0 : i32
    return %c0_i32, %c0_i32_0 : i32, i32
  }
  func.func @transform_2(%arg0: i32) -> (i32, i32) {
    %c0_i32 = arith.constant 0 : i32
    %c0_i32_0 = arith.constant 0 : i32
    %c0_i32_1 = arith.constant 0 : i32
    return %c0_i32, %c0_i32_0 : i32, i32
  }
  func.func @transform_3(%arg0: i32) -> (i32, i32) {
    %c0_i32 = arith.constant 0 : i32
    %c0_i32_0 = arith.constant 0 : i32
    %c0_i32_1 = arith.constant 0 : i32
    return %c0_i32, %c0_i32_0 : i32, i32
  }
  func.func @transform_4(%arg0: i32) -> (i32, i32) {
    %c0_i32 = arith.constant 0 : i32
    %c0_i32_0 = arith.constant 0 : i32
    return %arg0, %c0_i32 : i32, i32
  }
}

module attributes {stable_mosaic.version = 11 : i64} {
  func.func @_pool_head_kernel(%arg0: i32, %arg1: memref<1x8x64xf32, #tpu.memory_space<vmem>>, %arg2: memref<1x64xf32, #tpu.memory_space<vmem>>, %arg3: memref<1x64xf32, #tpu.memory_space<vmem>>, %arg4: memref<64x4xbf16, #tpu.memory_space<vmem>>, %arg5: memref<1x4xf32, #tpu.memory_space<vmem>>, %arg6: memref<1x1x4xf32, #tpu.memory_space<vmem>>) attributes {dimension_semantics = [#tpu.dimension_semantics<parallel>], iteration_bounds = array<i64: 2>, scalar_prefetch = 0 : i64, scratch_operands = 0 : i64, tpu.core_type = #tpu.core_type<tc>, window_params = [{transform_indices = @transform_0, window_bounds = array<i64: 1, 8, 64>}, {pipeline_mode = #tpu.pipeline_mode<synchronous>, transform_indices = @transform_1, window_bounds = array<i64: 1, 64>}, {pipeline_mode = #tpu.pipeline_mode<synchronous>, transform_indices = @transform_2, window_bounds = array<i64: 1, 64>}, {pipeline_mode = #tpu.pipeline_mode<synchronous>, transform_indices = @transform_3, window_bounds = array<i64: 64, 4>}, {pipeline_mode = #tpu.pipeline_mode<synchronous>, transform_indices = @transform_4, window_bounds = array<i64: 1, 4>}, {transform_indices = @transform_5, window_bounds = array<i64: 1, 1, 4>}]} {
    %c0 = arith.constant 0 : index
    %c0_0 = arith.constant 0 : index
    %c0_1 = arith.constant 0 : index
    %0 = vector.load %arg1[%c0, %c0_0, %c0_1] : memref<1x8x64xf32, #tpu.memory_space<vmem>>, vector<1x8x64xf32>
    %1 = vector.shape_cast %0 : vector<1x8x64xf32> to vector<8x64xf32>
    %c0_2 = arith.constant 0 : index
    %c0_3 = arith.constant 0 : index
    %2 = vector.load %arg2[%c0_2, %c0_3] : memref<1x64xf32, #tpu.memory_space<vmem>>, vector<1x64xf32>
    %c0_4 = arith.constant 0 : index
    %c0_5 = arith.constant 0 : index
    %3 = vector.load %arg3[%c0_4, %c0_5] : memref<1x64xf32, #tpu.memory_space<vmem>>, vector<1x64xf32>
    %cst = arith.constant dense<0.000000e+00> : vector<8xf32>
    %4 = vector.multi_reduction <add>, %1, %cst [1] : vector<8x64xf32> to vector<8xf32>
    %5 = vector.shape_cast %4 : vector<8xf32> to vector<8x1xf32>
    %cst_6 = arith.constant 6.400000e+01 : f32
    %6 = vector.broadcast %cst_6 : f32 to vector<8x1xf32>
    %7 = arith.divf %5, %6 : vector<8x1xf32>
    %8 = vector.broadcast %7 : vector<8x1xf32> to vector<8x64xf32>
    %9 = arith.subf %1, %8 : vector<8x64xf32>
    %10 = arith.mulf %9, %9 : vector<8x64xf32>
    %cst_7 = arith.constant dense<0.000000e+00> : vector<8xf32>
    %11 = vector.multi_reduction <add>, %10, %cst_7 [1] : vector<8x64xf32> to vector<8xf32>
    %12 = vector.shape_cast %11 : vector<8xf32> to vector<8x1xf32>
    %cst_8 = arith.constant 6.400000e+01 : f32
    %13 = vector.broadcast %cst_8 : f32 to vector<8x1xf32>
    %14 = arith.divf %12, %13 : vector<8x1xf32>
    %cst_9 = arith.constant 9.99999974E-6 : f32
    %15 = vector.broadcast %cst_9 : f32 to vector<8x1xf32>
    %16 = arith.addf %14, %15 : vector<8x1xf32>
    %17 = math.rsqrt %16 : vector<8x1xf32>
    %18 = vector.broadcast %17 : vector<8x1xf32> to vector<8x64xf32>
    %19 = arith.mulf %9, %18 : vector<8x64xf32>
    %20 = vector.broadcast %2 : vector<1x64xf32> to vector<8x64xf32>
    %21 = arith.mulf %19, %20 : vector<8x64xf32>
    %22 = vector.broadcast %3 : vector<1x64xf32> to vector<8x64xf32>
    %23 = arith.addf %21, %22 : vector<8x64xf32>
    %cst_10 = arith.constant dense<0.000000e+00> : vector<64xf32>
    %24 = vector.multi_reduction <add>, %23, %cst_10 [0] : vector<8x64xf32> to vector<64xf32>
    %25 = vector.shape_cast %24 : vector<64xf32> to vector<1x64xf32>
    %cst_11 = arith.constant 8.000000e+00 : f32
    %26 = vector.broadcast %cst_11 : f32 to vector<1x64xf32>
    %27 = arith.divf %25, %26 : vector<1x64xf32>
    %28 = arith.truncf %27 : vector<1x64xf32> to vector<1x64xbf16>
    %c0_12 = arith.constant 0 : index
    %c0_13 = arith.constant 0 : index
    %29 = vector.load %arg4[%c0_12, %c0_13] : memref<64x4xbf16, #tpu.memory_space<vmem>>, vector<64x4xbf16>
    %cst_14 = arith.constant dense<0.000000e+00> : vector<1x4xf32>
    %30 = tpu.matmul %28, %29, %cst_14 {dimension_numbers = #tpu.dot_dimension_numbers<[1], [0], [0], [1], [0, 0, 1, 1], [], []>} : vector<1x64xbf16>, vector<64x4xbf16>, vector<1x4xf32> -> vector<1x4xf32>
    %c0_15 = arith.constant 0 : index
    %c0_16 = arith.constant 0 : index
    %31 = vector.load %arg5[%c0_15, %c0_16] : memref<1x4xf32, #tpu.memory_space<vmem>>, vector<1x4xf32>
    %32 = arith.addf %30, %31 : vector<1x4xf32>
    %c0_17 = arith.constant 0 : index
    %c0_18 = arith.constant 0 : index
    %c0_19 = arith.constant 0 : index
    %33 = vector.load %arg6[%c0_17, %c0_18, %c0_19] : memref<1x1x4xf32, #tpu.memory_space<vmem>>, vector<1x1x4xf32>
    %34 = vector.shape_cast %33 : vector<1x1x4xf32> to vector<1x4xf32>
    %35 = vector.shape_cast %32 : vector<1x4xf32> to vector<1x1x4xf32>
    tpu.vector_store %arg6[%c0_17, %c0_18, %c0_19], %35 {strides = array<i32>} : memref<1x1x4xf32, #tpu.memory_space<vmem>>, vector<1x1x4xf32>,
    return
  }
  func.func @transform_0(%arg0: i32) -> (i32, i32, i32) {
    %c0_i32 = arith.constant 0 : i32
    %c0_i32_0 = arith.constant 0 : i32
    %c0_i32_1 = arith.constant 0 : i32
    return %arg0, %c0_i32, %c0_i32_0 : i32, i32, i32
  }
  func.func @transform_1(%arg0: i32) -> (i32, i32) {
    %c0_i32 = arith.constant 0 : i32
    %c0_i32_0 = arith.constant 0 : i32
    %c0_i32_1 = arith.constant 0 : i32
    return %c0_i32, %c0_i32_0 : i32, i32
  }
  func.func @transform_2(%arg0: i32) -> (i32, i32) {
    %c0_i32 = arith.constant 0 : i32
    %c0_i32_0 = arith.constant 0 : i32
    %c0_i32_1 = arith.constant 0 : i32
    return %c0_i32, %c0_i32_0 : i32, i32
  }
  func.func @transform_3(%arg0: i32) -> (i32, i32) {
    %c0_i32 = arith.constant 0 : i32
    %c0_i32_0 = arith.constant 0 : i32
    %c0_i32_1 = arith.constant 0 : i32
    return %c0_i32, %c0_i32_0 : i32, i32
  }
  func.func @transform_4(%arg0: i32) -> (i32, i32) {
    %c0_i32 = arith.constant 0 : i32
    %c0_i32_0 = arith.constant 0 : i32
    %c0_i32_1 = arith.constant 0 : i32
    return %c0_i32, %c0_i32_0 : i32, i32
  }
  func.func @transform_5(%arg0: i32) -> (i32, i32, i32) {
    %c0_i32 = arith.constant 0 : i32
    %c0_i32_0 = arith.constant 0 : i32
    %c0_i32_1 = arith.constant 0 : i32
    return %arg0, %c0_i32, %c0_i32_0 : i32, i32, i32
  }
}

module attributes {stable_mosaic.version = 11 : i64} {
  func.func @kernel(%arg0: i32, %arg1: memref<1x8x64xf32, #tpu.memory_space<vmem>>, %arg2: memref<1x64xf32, #tpu.memory_space<vmem>>, %arg3: memref<1x64xf32, #tpu.memory_space<vmem>>, %arg4: memref<64x192xbf16, #tpu.memory_space<vmem>>, %arg5: memref<1x192xf32, #tpu.memory_space<vmem>>, %arg6: memref<4x1x8x8xf32, #tpu.memory_space<vmem>>, %arg7: memref<64x64xbf16, #tpu.memory_space<vmem>>, %arg8: memref<1x64xf32, #tpu.memory_space<vmem>>, %arg9: memref<1x64xf32, #tpu.memory_space<vmem>>, %arg10: memref<1x64xf32, #tpu.memory_space<vmem>>, %arg11: memref<64x256xbf16, #tpu.memory_space<vmem>>, %arg12: memref<1x256xf32, #tpu.memory_space<vmem>>, %arg13: memref<256x64xbf16, #tpu.memory_space<vmem>>, %arg14: memref<1x64xf32, #tpu.memory_space<vmem>>, %arg15: memref<1x8x64xf32, #tpu.memory_space<vmem>>) attributes {dimension_semantics = [#tpu.dimension_semantics<parallel>], iteration_bounds = array<i64: 2>, scalar_prefetch = 0 : i64, scratch_operands = 0 : i64, tpu.core_type = #tpu.core_type<tc>, window_params = [{transform_indices = @transform_0, window_bounds = array<i64: 1, 8, 64>}, {pipeline_mode = #tpu.pipeline_mode<synchronous>, transform_indices = @transform_1, window_bounds = array<i64: 1, 64>}, {pipeline_mode = #tpu.pipeline_mode<synchronous>, transform_indices = @transform_2, window_bounds = array<i64: 1, 64>}, {pipeline_mode = #tpu.pipeline_mode<synchronous>, transform_indices = @transform_3, window_bounds = array<i64: 64, 192>}, {pipeline_mode = #tpu.pipeline_mode<synchronous>, transform_indices = @transform_4, window_bounds = array<i64: 1, 192>}, {pipeline_mode = #tpu.pipeline_mode<synchronous>, transform_indices = @transform_5, window_bounds = array<i64: 4, 1, 8, 8>}, {pipeline_mode = #tpu.pipeline_mode<synchronous>, transform_indices = @transform_6, window_bounds = array<i64: 64, 64>}, {pipeline_mode = #tpu.pipeline_mode<synchronous>, transform_indices = @transform_7, window_bounds = array<i64: 1, 64>}, {pipeline_mode = #tpu.pipeline_mode<synchronous>, transform_indices = @transform_8, window_bounds = array<i64: 1, 64>}, {pipeline_mode = #tpu.pipeline_mode<synchronous>, transform_indices = @transform_9, window_bounds = array<i64: 1, 64>}, {pipeline_mode = #tpu.pipeline_mode<synchronous>, transform_indices = @transform_10, window_bounds = array<i64: 64, 256>}, {pipeline_mode = #tpu.pipeline_mode<synchronous>, transform_indices = @transform_11, window_bounds = array<i64: 1, 256>}, {pipeline_mode = #tpu.pipeline_mode<synchronous>, transform_indices = @transform_12, window_bounds = array<i64: 256, 64>}, {pipeline_mode = #tpu.pipeline_mode<synchronous>, transform_indices = @transform_13, window_bounds = array<i64: 1, 64>}, {transform_indices = @transform_14, window_bounds = array<i64: 1, 8, 64>}]} {
    %c0 = arith.constant 0 : index
    %c0_0 = arith.constant 0 : index
    %c0_1 = arith.constant 0 : index
    %0 = vector.load %arg1[%c0, %c0_0, %c0_1] : memref<1x8x64xf32, #tpu.memory_space<vmem>>, vector<1x8x64xf32>
    %1 = vector.shape_cast %0 : vector<1x8x64xf32> to vector<8x64xf32>
    %c0_2 = arith.constant 0 : index
    %c0_3 = arith.constant 0 : index
    %2 = vector.load %arg2[%c0_2, %c0_3] : memref<1x64xf32, #tpu.memory_space<vmem>>, vector<1x64xf32>
    %c0_4 = arith.constant 0 : index
    %c0_5 = arith.constant 0 : index
    %3 = vector.load %arg3[%c0_4, %c0_5] : memref<1x64xf32, #tpu.memory_space<vmem>>, vector<1x64xf32>
    %cst = arith.constant dense<0.000000e+00> : vector<8xf32>
    %4 = vector.multi_reduction <add>, %1, %cst [1] : vector<8x64xf32> to vector<8xf32>
    %5 = vector.shape_cast %4 : vector<8xf32> to vector<8x1xf32>
    %cst_6 = arith.constant 6.400000e+01 : f32
    %6 = vector.broadcast %cst_6 : f32 to vector<8x1xf32>
    %7 = arith.divf %5, %6 : vector<8x1xf32>
    %8 = vector.broadcast %7 : vector<8x1xf32> to vector<8x64xf32>
    %9 = arith.subf %1, %8 : vector<8x64xf32>
    %10 = arith.mulf %9, %9 : vector<8x64xf32>
    %cst_7 = arith.constant dense<0.000000e+00> : vector<8xf32>
    %11 = vector.multi_reduction <add>, %10, %cst_7 [1] : vector<8x64xf32> to vector<8xf32>
    %12 = vector.shape_cast %11 : vector<8xf32> to vector<8x1xf32>
    %cst_8 = arith.constant 6.400000e+01 : f32
    %13 = vector.broadcast %cst_8 : f32 to vector<8x1xf32>
    %14 = arith.divf %12, %13 : vector<8x1xf32>
    %cst_9 = arith.constant 9.99999974E-6 : f32
    %15 = vector.broadcast %cst_9 : f32 to vector<8x1xf32>
    %16 = arith.addf %14, %15 : vector<8x1xf32>
    %17 = math.rsqrt %16 : vector<8x1xf32>
    %18 = vector.broadcast %17 : vector<8x1xf32> to vector<8x64xf32>
    %19 = arith.mulf %9, %18 : vector<8x64xf32>
    %20 = vector.broadcast %2 : vector<1x64xf32> to vector<8x64xf32>
    %21 = arith.mulf %19, %20 : vector<8x64xf32>
    %22 = vector.broadcast %3 : vector<1x64xf32> to vector<8x64xf32>
    %23 = arith.addf %21, %22 : vector<8x64xf32>
    %24 = arith.truncf %23 : vector<8x64xf32> to vector<8x64xbf16>
    %c0_10 = arith.constant 0 : index
    %c0_11 = arith.constant 0 : index
    %25 = vector.load %arg4[%c0_10, %c0_11] : memref<64x192xbf16, #tpu.memory_space<vmem>>, vector<64x192xbf16>
    %cst_12 = arith.constant dense<0.000000e+00> : vector<8x192xf32>
    %26 = tpu.matmul %24, %25, %cst_12 {dimension_numbers = #tpu.dot_dimension_numbers<[1], [0], [0], [1], [0, 0, 1, 1], [], []>} : vector<8x64xbf16>, vector<64x192xbf16>, vector<8x192xf32> -> vector<8x192xf32>
    %c0_13 = arith.constant 0 : index
    %c0_14 = arith.constant 0 : index
    %27 = vector.load %arg5[%c0_13, %c0_14] : memref<1x192xf32, #tpu.memory_space<vmem>>, vector<1x192xf32>
    %28 = vector.broadcast %27 : vector<1x192xf32> to vector<8x192xf32>
    %29 = arith.addf %26, %28 : vector<8x192xf32>
    %cst_15 = arith.constant 0.000000e+00 : f32
    %30 = vector.broadcast %cst_15 : f32 to vector<8x64xf32>
    %31 = vector.extract_strided_slice %29 {offsets = [0, 0], sizes = [8, 16], strides = [1, 1]} : vector<8x192xf32> to vector<8x16xf32>
    %32 = vector.shape_cast %31 : vector<8x16xf32> to vector<1x8x16xf32>
    %33 = vector.extract_strided_slice %29 {offsets = [0, 64], sizes = [8, 16], strides = [1, 1]} : vector<8x192xf32> to vector<8x16xf32>
    %34 = vector.shape_cast %33 : vector<8x16xf32> to vector<1x8x16xf32>
    %35 = vector.extract_strided_slice %29 {offsets = [0, 128], sizes = [8, 16], strides = [1, 1]} : vector<8x192xf32> to vector<8x16xf32>
    %36 = vector.shape_cast %35 : vector<8x16xf32> to vector<1x8x16xf32>
    "tpu.trace_start"() <{level = 10 : i32, message = "wqd,wkd->wqk"}> : () -> ()
    %cst_16 = arith.constant dense<0.000000e+00> : vector<1x8x8xf32>
    %37 = tpu.matmul %32, %34, %cst_16 {dimension_numbers = #tpu.dot_dimension_numbers<[2], [2], [1], [1], [0, 0, 0, 1, 1, 1], [0], [0]>} : vector<1x8x16xf32>, vector<1x8x16xf32>, vector<1x8x8xf32> -> vector<1x8x8xf32>
    "tpu.trace_stop"() : () -> ()
    %c0_17 = arith.constant 0 : index
    %c0_18 = arith.constant 0 : index
    %c0_19 = arith.constant 0 : index
    %c0_20 = arith.constant 0 : index
    %38 = vector.load %arg6[%c0_17, %c0_18, %c0_19, %c0_20] : memref<4x1x8x8xf32, #tpu.memory_space<vmem>>, vector<1x1x8x8xf32>
    %39 = vector.shape_cast %38 : vector<1x1x8x8xf32> to vector<1x8x8xf32>
    %40 = arith.addf %37, %39 : vector<1x8x8xf32>
    %cst_21 = arith.constant dense<0xFF800000> : vector<1x8xf32>
    %41 = vector.multi_reduction <maximumf>, %40, %cst_21 [2] : vector<1x8x8xf32> to vector<1x8xf32>
    %42 = vector.shape_cast %41 : vector<1x8xf32> to vector<1x8x1xf32>
    %43 = vector.broadcast %42 : vector<1x8x1xf32> to vector<1x8x8xf32>
    %44 = arith.subf %40, %43 : vector<1x8x8xf32>
    %45 = math.exp %44 : vector<1x8x8xf32>
    %cst_22 = arith.constant dense<0.000000e+00> : vector<1x8xf32>
    %46 = vector.multi_reduction <add>, %45, %cst_22 [2] : vector<1x8x8xf32> to vector<1x8xf32>
    %47 = vector.shape_cast %46 : vector<1x8xf32> to vector<1x8x1xf32>
    %48 = tpu.reciprocal %47 {approx = true} : vector<1x8x1xf32> -> vector<1x8x1xf32>
    %49 = vector.broadcast %48 : vector<1x8x1xf32> to vector<1x8x8xf32>
    %50 = arith.mulf %45, %49 : vector<1x8x8xf32>
    "tpu.trace_start"() <{level = 10 : i32, message = "wqk,wkd->wqd"}> : () -> ()
    %cst_23 = arith.constant dense<0.000000e+00> : vector<1x8x16xf32>
    %51 = tpu.matmul %50, %36, %cst_23 {dimension_numbers = #tpu.dot_dimension_numbers<[2], [1], [1], [2], [0, 0, 0, 1, 1, 2], [0], [0]>} : vector<1x8x8xf32>, vector<1x8x16xf32>, vector<1x8x16xf32> -> vector<1x8x16xf32>
    "tpu.trace_stop"() : () -> ()
    %52 = vector.shape_cast %51 : vector<1x8x16xf32> to vector<8x16xf32>
    %53 = arith.truncf %52 : vector<8x16xf32> to vector<8x16xbf16>
    %c0_24 = arith.constant 0 : index
    %c0_25 = arith.constant 0 : index
    %54 = vector.load %arg7[%c0_24, %c0_25] : memref<64x64xbf16, #tpu.memory_space<vmem>>, vector<16x64xbf16>
    %cst_26 = arith.constant dense<0.000000e+00> : vector<8x64xf32>
    %55 = tpu.matmul %53, %54, %cst_26 {dimension_numbers = #tpu.dot_dimension_numbers<[1], [0], [0], [1], [0, 0, 1, 1], [], []>} : vector<8x16xbf16>, vector<16x64xbf16>, vector<8x64xf32> -> vector<8x64xf32>
    %56 = arith.addf %30, %55 : vector<8x64xf32>
    %57 = vector.extract_strided_slice %29 {offsets = [0, 16], sizes = [8, 16], strides = [1, 1]} : vector<8x192xf32> to vector<8x16xf32>
    %58 = vector.shape_cast %57 : vector<8x16xf32> to vector<1x8x16xf32>
    %59 = vector.extract_strided_slice %29 {offsets = [0, 80], sizes = [8, 16], strides = [1, 1]} : vector<8x192xf32> to vector<8x16xf32>
    %60 = vector.shape_cast %59 : vector<8x16xf32> to vector<1x8x16xf32>
    %61 = vector.extract_strided_slice %29 {offsets = [0, 144], sizes = [8, 16], strides = [1, 1]} : vector<8x192xf32> to vector<8x16xf32>
    %62 = vector.shape_cast %61 : vector<8x16xf32> to vector<1x8x16xf32>
    "tpu.trace_start"() <{level = 10 : i32, message = "wqd,wkd->wqk"}> : () -> ()
    %cst_27 = arith.constant dense<0.000000e+00> : vector<1x8x8xf32>
    %63 = tpu.matmul %58, %60, %cst_27 {dimension_numbers = #tpu.dot_dimension_numbers<[2], [2], [1], [1], [0, 0, 0, 1, 1, 1], [0], [0]>} : vector<1x8x16xf32>, vector<1x8x16xf32>, vector<1x8x8xf32> -> vector<1x8x8xf32>
    "tpu.trace_stop"() : () -> ()
    %c1 = arith.constant 1 : index
    %c0_28 = arith.constant 0 : index
    %c0_29 = arith.constant 0 : index
    %c0_30 = arith.constant 0 : index
    %64 = vector.load %arg6[%c1, %c0_28, %c0_29, %c0_30] : memref<4x1x8x8xf32, #tpu.memory_space<vmem>>, vector<1x1x8x8xf32>
    %65 = vector.shape_cast %64 : vector<1x1x8x8xf32> to vector<1x8x8xf32>
    %66 = arith.addf %63, %65 : vector<1x8x8xf32>
    %cst_31 = arith.constant dense<0xFF800000> : vector<1x8xf32>
    %67 = vector.multi_reduction <maximumf>, %66, %cst_31 [2] : vector<1x8x8xf32> to vector<1x8xf32>
    %68 = vector.shape_cast %67 : vector<1x8xf32> to vector<1x8x1xf32>
    %69 = vector.broadcast %68 : vector<1x8x1xf32> to vector<1x8x8xf32>
    %70 = arith.subf %66, %69 : vector<1x8x8xf32>
    %71 = math.exp %70 : vector<1x8x8xf32>
    %cst_32 = arith.constant dense<0.000000e+00> : vector<1x8xf32>
    %72 = vector.multi_reduction <add>, %71, %cst_32 [2] : vector<1x8x8xf32> to vector<1x8xf32>
    %73 = vector.shape_cast %72 : vector<1x8xf32> to vector<1x8x1xf32>
    %74 = tpu.reciprocal %73 {approx = true} : vector<1x8x1xf32> -> vector<1x8x1xf32>
    %75 = vector.broadcast %74 : vector<1x8x1xf32> to vector<1x8x8xf32>
    %76 = arith.mulf %71, %75 : vector<1x8x8xf32>
    "tpu.trace_start"() <{level = 10 : i32, message = "wqk,wkd->wqd"}> : () -> ()
    %cst_33 = arith.constant dense<0.000000e+00> : vector<1x8x16xf32>
    %77 = tpu.matmul %76, %62, %cst_33 {dimension_numbers = #tpu.dot_dimension_numbers<[2], [1], [1], [2], [0, 0, 0, 1, 1, 2], [0], [0]>} : vector<1x8x8xf32>, vector<1x8x16xf32>, vector<1x8x16xf32> -> vector<1x8x16xf32>
    "tpu.trace_stop"() : () -> ()
    %78 = vector.shape_cast %77 : vector<1x8x16xf32> to vector<8x16xf32>
    %79 = arith.truncf %78 : vector<8x16xf32> to vector<8x16xbf16>
    %c16 = arith.constant 16 : index
    %c0_34 = arith.constant 0 : index
    %80 = vector.load %arg7[%c16, %c0_34] : memref<64x64xbf16, #tpu.memory_space<vmem>>, vector<16x64xbf16>
    %cst_35 = arith.constant dense<0.000000e+00> : vector<8x64xf32>
    %81 = tpu.matmul %79, %80, %cst_35 {dimension_numbers = #tpu.dot_dimension_numbers<[1], [0], [0], [1], [0, 0, 1, 1], [], []>} : vector<8x16xbf16>, vector<16x64xbf16>, vector<8x64xf32> -> vector<8x64xf32>
    %82 = arith.addf %56, %81 : vector<8x64xf32>
    %83 = vector.extract_strided_slice %29 {offsets = [0, 32], sizes = [8, 16], strides = [1, 1]} : vector<8x192xf32> to vector<8x16xf32>
    %84 = vector.shape_cast %83 : vector<8x16xf32> to vector<1x8x16xf32>
    %85 = vector.extract_strided_slice %29 {offsets = [0, 96], sizes = [8, 16], strides = [1, 1]} : vector<8x192xf32> to vector<8x16xf32>
    %86 = vector.shape_cast %85 : vector<8x16xf32> to vector<1x8x16xf32>
    %87 = vector.extract_strided_slice %29 {offsets = [0, 160], sizes = [8, 16], strides = [1, 1]} : vector<8x192xf32> to vector<8x16xf32>
    %88 = vector.shape_cast %87 : vector<8x16xf32> to vector<1x8x16xf32>
    "tpu.trace_start"() <{level = 10 : i32, message = "wqd,wkd->wqk"}> : () -> ()
    %cst_36 = arith.constant dense<0.000000e+00> : vector<1x8x8xf32>
    %89 = tpu.matmul %84, %86, %cst_36 {dimension_numbers = #tpu.dot_dimension_numbers<[2], [2], [1], [1], [0, 0, 0, 1, 1, 1], [0], [0]>} : vector<1x8x16xf32>, vector<1x8x16xf32>, vector<1x8x8xf32> -> vector<1x8x8xf32>
    "tpu.trace_stop"() : () -> ()
    %c2 = arith.constant 2 : index
    %c0_37 = arith.constant 0 : index
    %c0_38 = arith.constant 0 : index
    %c0_39 = arith.constant 0 : index
    %90 = vector.load %arg6[%c2, %c0_37, %c0_38, %c0_39] : memref<4x1x8x8xf32, #tpu.memory_space<vmem>>, vector<1x1x8x8xf32>
    %91 = vector.shape_cast %90 : vector<1x1x8x8xf32> to vector<1x8x8xf32>
    %92 = arith.addf %89, %91 : vector<1x8x8xf32>
    %cst_40 = arith.constant dense<0xFF800000> : vector<1x8xf32>
    %93 = vector.multi_reduction <maximumf>, %92, %cst_40 [2] : vector<1x8x8xf32> to vector<1x8xf32>
    %94 = vector.shape_cast %93 : vector<1x8xf32> to vector<1x8x1xf32>
    %95 = vector.broadcast %94 : vector<1x8x1xf32> to vector<1x8x8xf32>
    %96 = arith.subf %92, %95 : vector<1x8x8xf32>
    %97 = math.exp %96 : vector<1x8x8xf32>
    %cst_41 = arith.constant dense<0.000000e+00> : vector<1x8xf32>
    %98 = vector.multi_reduction <add>, %97, %cst_41 [2] : vector<1x8x8xf32> to vector<1x8xf32>
    %99 = vector.shape_cast %98 : vector<1x8xf32> to vector<1x8x1xf32>
    %100 = tpu.reciprocal %99 {approx = true} : vector<1x8x1xf32> -> vector<1x8x1xf32>
    %101 = vector.broadcast %100 : vector<1x8x1xf32> to vector<1x8x8xf32>
    %102 = arith.mulf %97, %101 : vector<1x8x8xf32>
    "tpu.trace_start"() <{level = 10 : i32, message = "wqk,wkd->wqd"}> : () -> ()
    %cst_42 = arith.constant dense<0.000000e+00> : vector<1x8x16xf32>
    %103 = tpu.matmul %102, %88, %cst_42 {dimension_numbers = #tpu.dot_dimension_numbers<[2], [1], [1], [2], [0, 0, 0, 1, 1, 2], [0], [0]>} : vector<1x8x8xf32>, vector<1x8x16xf32>, vector<1x8x16xf32> -> vector<1x8x16xf32>
    "tpu.trace_stop"() : () -> ()
    %104 = vector.shape_cast %103 : vector<1x8x16xf32> to vector<8x16xf32>
    %105 = arith.truncf %104 : vector<8x16xf32> to vector<8x16xbf16>
    %c32 = arith.constant 32 : index
    %c0_43 = arith.constant 0 : index
    %106 = vector.load %arg7[%c32, %c0_43] : memref<64x64xbf16, #tpu.memory_space<vmem>>, vector<16x64xbf16>
    %cst_44 = arith.constant dense<0.000000e+00> : vector<8x64xf32>
    %107 = tpu.matmul %105, %106, %cst_44 {dimension_numbers = #tpu.dot_dimension_numbers<[1], [0], [0], [1], [0, 0, 1, 1], [], []>} : vector<8x16xbf16>, vector<16x64xbf16>, vector<8x64xf32> -> vector<8x64xf32>
    %108 = arith.addf %82, %107 : vector<8x64xf32>
    %109 = vector.extract_strided_slice %29 {offsets = [0, 48], sizes = [8, 16], strides = [1, 1]} : vector<8x192xf32> to vector<8x16xf32>
    %110 = vector.shape_cast %109 : vector<8x16xf32> to vector<1x8x16xf32>
    %111 = vector.extract_strided_slice %29 {offsets = [0, 112], sizes = [8, 16], strides = [1, 1]} : vector<8x192xf32> to vector<8x16xf32>
    %112 = vector.shape_cast %111 : vector<8x16xf32> to vector<1x8x16xf32>
    %113 = vector.extract_strided_slice %29 {offsets = [0, 176], sizes = [8, 16], strides = [1, 1]} : vector<8x192xf32> to vector<8x16xf32>
    %114 = vector.shape_cast %113 : vector<8x16xf32> to vector<1x8x16xf32>
    "tpu.trace_start"() <{level = 10 : i32, message = "wqd,wkd->wqk"}> : () -> ()
    %cst_45 = arith.constant dense<0.000000e+00> : vector<1x8x8xf32>
    %115 = tpu.matmul %110, %112, %cst_45 {dimension_numbers = #tpu.dot_dimension_numbers<[2], [2], [1], [1], [0, 0, 0, 1, 1, 1], [0], [0]>} : vector<1x8x16xf32>, vector<1x8x16xf32>, vector<1x8x8xf32> -> vector<1x8x8xf32>
    "tpu.trace_stop"() : () -> ()
    %c3 = arith.constant 3 : index
    %c0_46 = arith.constant 0 : index
    %c0_47 = arith.constant 0 : index
    %c0_48 = arith.constant 0 : index
    %116 = vector.load %arg6[%c3, %c0_46, %c0_47, %c0_48] : memref<4x1x8x8xf32, #tpu.memory_space<vmem>>, vector<1x1x8x8xf32>
    %117 = vector.shape_cast %116 : vector<1x1x8x8xf32> to vector<1x8x8xf32>
    %118 = arith.addf %115, %117 : vector<1x8x8xf32>
    %cst_49 = arith.constant dense<0xFF800000> : vector<1x8xf32>
    %119 = vector.multi_reduction <maximumf>, %118, %cst_49 [2] : vector<1x8x8xf32> to vector<1x8xf32>
    %120 = vector.shape_cast %119 : vector<1x8xf32> to vector<1x8x1xf32>
    %121 = vector.broadcast %120 : vector<1x8x1xf32> to vector<1x8x8xf32>
    %122 = arith.subf %118, %121 : vector<1x8x8xf32>
    %123 = math.exp %122 : vector<1x8x8xf32>
    %cst_50 = arith.constant dense<0.000000e+00> : vector<1x8xf32>
    %124 = vector.multi_reduction <add>, %123, %cst_50 [2] : vector<1x8x8xf32> to vector<1x8xf32>
    %125 = vector.shape_cast %124 : vector<1x8xf32> to vector<1x8x1xf32>
    %126 = tpu.reciprocal %125 {approx = true} : vector<1x8x1xf32> -> vector<1x8x1xf32>
    %127 = vector.broadcast %126 : vector<1x8x1xf32> to vector<1x8x8xf32>
    %128 = arith.mulf %123, %127 : vector<1x8x8xf32>
    "tpu.trace_start"() <{level = 10 : i32, message = "wqk,wkd->wqd"}> : () -> ()
    %cst_51 = arith.constant dense<0.000000e+00> : vector<1x8x16xf32>
    %129 = tpu.matmul %128, %114, %cst_51 {dimension_numbers = #tpu.dot_dimension_numbers<[2], [1], [1], [2], [0, 0, 0, 1, 1, 2], [0], [0]>} : vector<1x8x8xf32>, vector<1x8x16xf32>, vector<1x8x16xf32> -> vector<1x8x16xf32>
    "tpu.trace_stop"() : () -> ()
    %130 = vector.shape_cast %129 : vector<1x8x16xf32> to vector<8x16xf32>
    %131 = arith.truncf %130 : vector<8x16xf32> to vector<8x16xbf16>
    %c48 = arith.constant 48 : index
    %c0_52 = arith.constant 0 : index
    %132 = vector.load %arg7[%c48, %c0_52] : memref<64x64xbf16, #tpu.memory_space<vmem>>, vector<16x64xbf16>
    %cst_53 = arith.constant dense<0.000000e+00> : vector<8x64xf32>
    %133 = tpu.matmul %131, %132, %cst_53 {dimension_numbers = #tpu.dot_dimension_numbers<[1], [0], [0], [1], [0, 0, 1, 1], [], []>} : vector<8x16xbf16>, vector<16x64xbf16>, vector<8x64xf32> -> vector<8x64xf32>
    %134 = arith.addf %108, %133 : vector<8x64xf32>
    %135 = arith.addf %1, %134 : vector<8x64xf32>
    %c0_54 = arith.constant 0 : index
    %c0_55 = arith.constant 0 : index
    %136 = vector.load %arg8[%c0_54, %c0_55] : memref<1x64xf32, #tpu.memory_space<vmem>>, vector<1x64xf32>
    %137 = vector.broadcast %136 : vector<1x64xf32> to vector<8x64xf32>
    %138 = arith.addf %135, %137 : vector<8x64xf32>
    %c0_56 = arith.constant 0 : index
    %c0_57 = arith.constant 0 : index
    %139 = vector.load %arg9[%c0_56, %c0_57] : memref<1x64xf32, #tpu.memory_space<vmem>>, vector<1x64xf32>
    %c0_58 = arith.constant 0 : index
    %c0_59 = arith.constant 0 : index
    %140 = vector.load %arg10[%c0_58, %c0_59] : memref<1x64xf32, #tpu.memory_space<vmem>>, vector<1x64xf32>
    %cst_60 = arith.constant dense<0.000000e+00> : vector<8xf32>
    %141 = vector.multi_reduction <add>, %138, %cst_60 [1] : vector<8x64xf32> to vector<8xf32>
    %142 = vector.shape_cast %141 : vector<8xf32> to vector<8x1xf32>
    %cst_61 = arith.constant 6.400000e+01 : f32
    %143 = vector.broadcast %cst_61 : f32 to vector<8x1xf32>
    %144 = arith.divf %142, %143 : vector<8x1xf32>
    %145 = vector.broadcast %144 : vector<8x1xf32> to vector<8x64xf32>
    %146 = arith.subf %138, %145 : vector<8x64xf32>
    %147 = arith.mulf %146, %146 : vector<8x64xf32>
    %cst_62 = arith.constant dense<0.000000e+00> : vector<8xf32>
    %148 = vector.multi_reduction <add>, %147, %cst_62 [1] : vector<8x64xf32> to vector<8xf32>
    %149 = vector.shape_cast %148 : vector<8xf32> to vector<8x1xf32>
    %cst_63 = arith.constant 6.400000e+01 : f32
    %150 = vector.broadcast %cst_63 : f32 to vector<8x1xf32>
    %151 = arith.divf %149, %150 : vector<8x1xf32>
    %cst_64 = arith.constant 9.99999974E-6 : f32
    %152 = vector.broadcast %cst_64 : f32 to vector<8x1xf32>
    %153 = arith.addf %151, %152 : vector<8x1xf32>
    %154 = math.rsqrt %153 : vector<8x1xf32>
    %155 = vector.broadcast %154 : vector<8x1xf32> to vector<8x64xf32>
    %156 = arith.mulf %146, %155 : vector<8x64xf32>
    %157 = vector.broadcast %139 : vector<1x64xf32> to vector<8x64xf32>
    %158 = arith.mulf %156, %157 : vector<8x64xf32>
    %159 = vector.broadcast %140 : vector<1x64xf32> to vector<8x64xf32>
    %160 = arith.addf %158, %159 : vector<8x64xf32>
    %161 = arith.truncf %160 : vector<8x64xf32> to vector<8x64xbf16>
    %c0_65 = arith.constant 0 : index
    %c0_66 = arith.constant 0 : index
    %162 = vector.load %arg11[%c0_65, %c0_66] : memref<64x256xbf16, #tpu.memory_space<vmem>>, vector<64x256xbf16>
    %cst_67 = arith.constant dense<0.000000e+00> : vector<8x256xf32>
    %163 = tpu.matmul %161, %162, %cst_67 {dimension_numbers = #tpu.dot_dimension_numbers<[1], [0], [0], [1], [0, 0, 1, 1], [], []>} : vector<8x64xbf16>, vector<64x256xbf16>, vector<8x256xf32> -> vector<8x256xf32>
    %c0_68 = arith.constant 0 : index
    %c0_69 = arith.constant 0 : index
    %164 = vector.load %arg12[%c0_68, %c0_69] : memref<1x256xf32, #tpu.memory_space<vmem>>, vector<1x256xf32>
    %165 = vector.broadcast %164 : vector<1x256xf32> to vector<8x256xf32>
    %166 = arith.addf %163, %165 : vector<8x256xf32>
    %cst_70 = arith.constant 5.000000e-01 : f32
    %167 = vector.broadcast %cst_70 : f32 to vector<8x256xf32>
    %168 = arith.mulf %167, %166 : vector<8x256xf32>
    %cst_71 = arith.constant 0.707106769 : f32
    %169 = vector.broadcast %cst_71 : f32 to vector<8x256xf32>
    %170 = arith.mulf %166, %169 : vector<8x256xf32>
    %171 = math.absf %170 : vector<8x256xf32>
    %cst_72 = arith.constant 0.327591091 : f32
    %172 = vector.broadcast %cst_72 : f32 to vector<8x256xf32>
    %173 = arith.mulf %172, %171 : vector<8x256xf32>
    %cst_73 = arith.constant 1.000000e+00 : f32
    %174 = vector.broadcast %cst_73 : f32 to vector<8x256xf32>
    %175 = arith.addf %174, %173 : vector<8x256xf32>
    %cst_74 = arith.constant 1.000000e+00 : f32
    %176 = vector.broadcast %cst_74 : f32 to vector<8x256xf32>
    %177 = arith.divf %176, %175 : vector<8x256xf32>
    %cst_75 = arith.constant 1.06140542 : f32
    %178 = vector.broadcast %cst_75 : f32 to vector<8x256xf32>
    %179 = arith.mulf %178, %177 : vector<8x256xf32>
    %cst_76 = arith.constant -1.45315206 : f32
    %180 = vector.broadcast %cst_76 : f32 to vector<8x256xf32>
    %181 = arith.addf %179, %180 : vector<8x256xf32>
    %182 = arith.mulf %181, %177 : vector<8x256xf32>
    %cst_77 = arith.constant 1.42141378 : f32
    %183 = vector.broadcast %cst_77 : f32 to vector<8x256xf32>
    %184 = arith.addf %182, %183 : vector<8x256xf32>
    %185 = arith.mulf %184, %177 : vector<8x256xf32>
    %cst_78 = arith.constant -0.284496725 : f32
    %186 = vector.broadcast %cst_78 : f32 to vector<8x256xf32>
    %187 = arith.addf %185, %186 : vector<8x256xf32>
    %188 = arith.mulf %187, %177 : vector<8x256xf32>
    %cst_79 = arith.constant 0.254829586 : f32
    %189 = vector.broadcast %cst_79 : f32 to vector<8x256xf32>
    %190 = arith.addf %188, %189 : vector<8x256xf32>
    %191 = arith.mulf %190, %177 : vector<8x256xf32>
    %cst_80 = arith.constant 0.000000e+00 : f32
    %192 = vector.broadcast %cst_80 : f32 to vector<8x256xf32>
    %193 = arith.subf %192, %171 : vector<8x256xf32>
    %194 = arith.mulf %193, %171 : vector<8x256xf32>
    %195 = math.exp %194 : vector<8x256xf32>
    %196 = arith.mulf %191, %195 : vector<8x256xf32>
    %cst_81 = arith.constant 1.000000e+00 : f32
    %197 = vector.broadcast %cst_81 : f32 to vector<8x256xf32>
    %198 = arith.subf %197, %196 : vector<8x256xf32>
    %cst_82 = arith.constant 0.000000e+00 : f32
    %199 = vector.broadcast %cst_82 : f32 to vector<8x256xf32>
    %200 = arith.cmpf oge, %170, %199 : vector<8x256xf32>
    %cst_83 = arith.constant 0.000000e+00 : f32
    %201 = vector.broadcast %cst_83 : f32 to vector<8x256xf32>
    %202 = arith.subf %201, %198 : vector<8x256xf32>
    %203 = arith.select %200, %198, %202 : vector<8x256xi1>, vector<8x256xf32>
    %cst_84 = arith.constant 1.000000e+00 : f32
    %204 = vector.broadcast %cst_84 : f32 to vector<8x256xf32>
    %205 = arith.addf %204, %203 : vector<8x256xf32>
    %206 = arith.mulf %168, %205 : vector<8x256xf32>
    %207 = arith.truncf %206 : vector<8x256xf32> to vector<8x256xbf16>
    %c0_85 = arith.constant 0 : index
    %c0_86 = arith.constant 0 : index
    %208 = vector.load %arg13[%c0_85, %c0_86] : memref<256x64xbf16, #tpu.memory_space<vmem>>, vector<256x64xbf16>
    %cst_87 = arith.constant dense<0.000000e+00> : vector<8x64xf32>
    %209 = tpu.matmul %207, %208, %cst_87 {dimension_numbers = #tpu.dot_dimension_numbers<[1], [0], [0], [1], [0, 0, 1, 1], [], []>} : vector<8x256xbf16>, vector<256x64xbf16>, vector<8x64xf32> -> vector<8x64xf32>
    %210 = arith.addf %138, %209 : vector<8x64xf32>
    %c0_88 = arith.constant 0 : index
    %c0_89 = arith.constant 0 : index
    %211 = vector.load %arg14[%c0_88, %c0_89] : memref<1x64xf32, #tpu.memory_space<vmem>>, vector<1x64xf32>
    %212 = vector.broadcast %211 : vector<1x64xf32> to vector<8x64xf32>
    %213 = arith.addf %210, %212 : vector<8x64xf32>
    %214 = vector.shape_cast %213 : vector<8x64xf32> to vector<1x8x64xf32>
    %c0_90 = arith.constant 0 : index
    %c0_91 = arith.constant 0 : index
    %c0_92 = arith.constant 0 : index
    %215 = vector.load %arg15[%c0_90, %c0_91, %c0_92] : memref<1x8x64xf32, #tpu.memory_space<vmem>>, vector<1x8x64xf32>
    tpu.vector_store %arg15[%c0_90, %c0_91, %c0_92], %214 {strides = array<i32>} : memref<1x8x64xf32, #tpu.memory_space<vmem>>, vector<1x8x64xf32>,
    return
  }
  func.func @transform_0(%arg0: i32) -> (i32, i32, i32) {
    %c0_i32 = arith.constant 0 : i32
    %c0_i32_0 = arith.constant 0 : i32
    %c0_i32_1 = arith.constant 0 : i32
    return %arg0, %c0_i32, %c0_i32_0 : i32, i32, i32
  }
  func.func @transform_1(%arg0: i32) -> (i32, i32) {
    %c0_i32 = arith.constant 0 : i32
    %c0_i32_0 = arith.constant 0 : i32
    %c0_i32_1 = arith.constant 0 : i32
    return %c0_i32, %c0_i32_0 : i32, i32
  }
  func.func @transform_2(%arg0: i32) -> (i32, i32) {
    %c0_i32 = arith.constant 0 : i32
    %c0_i32_0 = arith.constant 0 : i32
    %c0_i32_1 = arith.constant 0 : i32
    return %c0_i32, %c0_i32_0 : i32, i32
  }
  func.func @transform_3(%arg0: i32) -> (i32, i32) {
    %c0_i32 = arith.constant 0 : i32
    %c0_i32_0 = arith.constant 0 : i32
    %c0_i32_1 = arith.constant 0 : i32
    return %c0_i32, %c0_i32_0 : i32, i32
  }
  func.func @transform_4(%arg0: i32) -> (i32, i32) {
    %c0_i32 = arith.constant 0 : i32
    %c0_i32_0 = arith.constant 0 : i32
    %c0_i32_1 = arith.constant 0 : i32
    return %c0_i32, %c0_i32_0 : i32, i32
  }
  func.func @transform_5(%arg0: i32) -> (i32, i32, i32, i32) {
    %c0_i32 = arith.constant 0 : i32
    %c0_i32_0 = arith.constant 0 : i32
    %c0_i32_1 = arith.constant 0 : i32
    %c0_i32_2 = arith.constant 0 : i32
    %c0_i32_3 = arith.constant 0 : i32
    return %c0_i32, %c0_i32_0, %c0_i32_1, %c0_i32_2 : i32, i32, i32, i32
  }
  func.func @transform_6(%arg0: i32) -> (i32, i32) {
    %c0_i32 = arith.constant 0 : i32
    %c0_i32_0 = arith.constant 0 : i32
    %c0_i32_1 = arith.constant 0 : i32
    return %c0_i32, %c0_i32_0 : i32, i32
  }
  func.func @transform_7(%arg0: i32) -> (i32, i32) {
    %c0_i32 = arith.constant 0 : i32
    %c0_i32_0 = arith.constant 0 : i32
    %c0_i32_1 = arith.constant 0 : i32
    return %c0_i32, %c0_i32_0 : i32, i32
  }
  func.func @transform_8(%arg0: i32) -> (i32, i32) {
    %c0_i32 = arith.constant 0 : i32
    %c0_i32_0 = arith.constant 0 : i32
    %c0_i32_1 = arith.constant 0 : i32
    return %c0_i32, %c0_i32_0 : i32, i32
  }
  func.func @transform_9(%arg0: i32) -> (i32, i32) {
    %c0_i32 = arith.constant 0 : i32
    %c0_i32_0 = arith.constant 0 : i32
    %c0_i32_1 = arith.constant 0 : i32
    return %c0_i32, %c0_i32_0 : i32, i32
  }
  func.func @transform_10(%arg0: i32) -> (i32, i32) {
    %c0_i32 = arith.constant 0 : i32
    %c0_i32_0 = arith.constant 0 : i32
    %c0_i32_1 = arith.constant 0 : i32
    return %c0_i32, %c0_i32_0 : i32, i32
  }
  func.func @transform_11(%arg0: i32) -> (i32, i32) {
    %c0_i32 = arith.constant 0 : i32
    %c0_i32_0 = arith.constant 0 : i32
    %c0_i32_1 = arith.constant 0 : i32
    return %c0_i32, %c0_i32_0 : i32, i32
  }
  func.func @transform_12(%arg0: i32) -> (i32, i32) {
    %c0_i32 = arith.constant 0 : i32
    %c0_i32_0 = arith.constant 0 : i32
    %c0_i32_1 = arith.constant 0 : i32
    return %c0_i32, %c0_i32_0 : i32, i32
  }
  func.func @transform_13(%arg0: i32) -> (i32, i32) {
    %c0_i32 = arith.constant 0 : i32
    %c0_i32_0 = arith.constant 0 : i32
    %c0_i32_1 = arith.constant 0 : i32
    return %c0_i32, %c0_i32_0 : i32, i32
  }
  func.func @transform_14(%arg0: i32) -> (i32, i32, i32) {
    %c0_i32 = arith.constant 0 : i32
    %c0_i32_0 = arith.constant 0 : i32
    %c0_i32_1 = arith.constant 0 : i32
    return %arg0, %c0_i32, %c0_i32_0 : i32, i32, i32
  }
}

</mosaic_0001>

<bundles_post_ra>
// kernel: _lambda_.7
= control target key start
LH: loop header
LB: loop body
LE: loop exit
PB: predicated region body
PF: predicated region fallthrough
CT: control target
= control target key end

     0   :  { %s588_s18 = smov 0   ;;  %s653_s0 = inlined_call_operand.vmem [shape: f32[64,96], index: 0, kind: input, shape index: {}]   ;;  %s654_s1 = inlined_call_operand.vmem [shape: bf16[96,32], index: 1, kind: input, shape index: {}]   ;;  %s655_s2 = inlined_call_operand.vmem [shape: f32[1,32], index: 2, kind: input, shape index: {}]   ;;  %s656_s3 = inlined_call_operand.vmem [shape: f32[1,32], index: 3, kind: input, shape index: {}]   ;;  %s657_s4 = inlined_call_operand.vmem [shape: f32[1,32], index: 4, kind: input, shape index: {}]   ;;  %s658_s5 = inlined_call_operand.vmem [shape: f32[64,32], index: 5, kind: output, shape index: {}]  }
   0x1 LB: > { %s482_s19 = sadd.s32 4294967295, %s556_s18   ;;  %p486_p0 = scmp.ge.s32.totalorder %s556_s18, 1  ;;  %s556_s18 = sphi %s588_s18, %s15_s18  }
   0x2   : > { %p188_p1 = scmp.lt.s32.totalorder %s556_s18, 3 }
   0x4   : > { %p189_p2 = pnand %p486_p0, %p188_p1 }
   0x5   : > { %s487_s22 = sshll.u32 (!%p189_p2), %s482_s19, 2 }
   0x6   : > { %192 = sbr.rel (%p189_p2) target bundleno = 550 (0x226), region = 40  ;;  %p217_p3 = scmp.lt.s32.totalorder (!%p189_p2), %s487_s22, 7 }
   0xb   : > { %v536_v0 = vld [vmem:[%s654_s1 + $0x28] sm:$0xff]   ;;  %v537_v1 = vld [vmem:[%s654_s1 + $0x20] sm:$0xff]   ;;  %s660_s22 = smov (!%p217_p3, %s487_s22), 7  ;;  %v538_v2 = vld [vmem:[%s654_s1 + $0x18] sm:$0xff]   ;;  %vm290_vm0 = vcmask 785408   ;;  %vm348_vm1 = vcmask 261120  }
   0xc   : > { %512 = vmatprep.subr.bf16.mxu0 %v536_v0  ;;  %s488_s27 = sshll.u32 %s660_s22, 3  ;;  %v539_v5 = vld [vmem:[%s654_s1 + $0x10] sm:$0xff]   ;;  %v540_v7 = vld [vmem:[%s654_s1 + $0x8] sm:$0xff]   ;;  %v541_v8 = vld [vmem:[%s654_s1] sm:$0xff]  }
   0xd   : > { %513 = vmatpush3.bf16.msra.mxu0 %v536_v0  ;;  %s220_s30 = scalar_lea.vmem %s653_s0, %s488_s27  ;;  %v491_v12 = vld [vmem:[%s655_s2] ss:$0 sm:$0xff]  ;;  %s226_s21 = scalar_lea.vmem %s658_s5, %s488_s27 }
   0xe   : > { %514 = vmatprep.subr.bf16.mxu0 %v537_v1  ;;  %v229_v3 = vld [vmem:[%s220_s30] sm:$0xff]  ;;  %v230_v4 = vld [vmem:[%s220_s30 + $0x8] sm:$0xff]  ;;  %v231_v9 = vld [vmem:[%s220_s30 + $0x10] sm:$0xff] }
   0xf   : > { %v233_v6 = vpack.c.bf16 %v230_v4, %v229_v3  ;;  %v232_v10 = vld [vmem:[%s220_s30 + $0x18] sm:$0xff]  ;;  %v500_v58 = vld [vmem:[%s656_s3] ss:$0 sm:$0xff] }
  0x10   : > { %v234_v11 = vpack.c.bf16 %v232_v10, %v231_v9  ;;  %v501_v60 = vld [vmem:[%s657_s4] ss:$0 sm:$0xff] }
  0x11   : > { %515 = vmatpush3.bf16.msra.mxu0 %v537_v1  ;;  %524 = vmatprep.mubr.msk.bf16.mxu0 %vm290_vm0, %v233_v6 }
  0x12   : > { %516 = vmatprep.subr.bf16.mxu0 %v538_v2 }
  0x15   : > { %517 = vmatpush3.bf16.msra.mxu0 %v538_v2 }
  0x16   : > { %518 = vmatprep.subr.bf16.mxu0 %v539_v5 }
  0x19   : > { %519 = vmatpush3.bf16.msra.mxu0 %v539_v5 }
  0x1a   : > { %520 = vmatprep.subr.bf16.mxu0 %v540_v7 }
  0x1d   : > { %521 = vmatpush3.bf16.msra.mxu0 %v540_v7 }
  0x1e   : > { %522 = vmatprep.subr.bf16.mxu0 %v541_v8 }
  0x21   : > { %523 = vmatpush3.bf16.msra.mxu0 %v541_v8 }
  0x24   : > { %525 = vmatmul.mubr.msk.bf16.vlgmr.msra.gmra.mxu0 %vm290_vm0, %v234_v11 }
  0xe4   : > { %v526_v13 = vpop.f32.mrf.mxu0 }
  0xe5   : > { %v340_v14 = vadd.f32 %v526_v13, %v491_v12 }
  0xe6   : > { %v331_v15 = vpop.f32.mrf.mxu0 }
  0xe7   : > { %v332_v16 = vadd.f32 %v491_v12, %v331_v15  ;;  %v355_v17 = vsel %vm348_vm1, %v340_v14, 0.0 }
  0xe8   : > { %356 = vadd.xlane.f32.xlu1 %v355_v17  ;;  %v527_v18 = vpop.f32.mrf.mxu0 }
  0xe9   : > { %v343_v19 = vadd.f32 %v527_v18, %v491_v12  ;;  %v349_v20 = vsel %vm348_vm1, %v332_v16, 0.0 }
  0xea   : > { %v334_v21 = vpop.f32.mrf.mxu0  ;;  %350 = vadd.xlane.f32.xlu0 %v349_v20 }
  0xeb   : > { %v335_v22 = vadd.f32 %v491_v12, %v334_v21  ;;  %v358_v23 = vsel %vm348_vm1, %v343_v19, 0.0 }
  0xec   : > { %359 = vadd.xlane.f32.xlu1 %v358_v23 }
  0xed   : > { %v352_v24 = vsel %vm348_vm1, %v335_v22, 0.0 }
  0xee   : > { %353 = vadd.xlane.f32.xlu0 %v352_v24 }
 0x171   : > { %v357_v25 = vpop.xlane.xlu1 %356 }
 0x172   : > { %v364_v26 = vmul.f32 0.03125, %v357_v25 }
 0x173   : > { %v351_v27 = vpop.xlane.xlu0 %350 }
 0x174   : > { %v362_v28 = vmul.f32 0.03125, %v351_v27  ;;  %v368_v30 = vsub.f32 %v340_v14, %v364_v26 }
 0x175   : > { %v360_v29 = vpop.xlane.xlu1 %359 }
 0x176   : > { %v366_v31 = vsub.f32 %v332_v16, %v362_v28  ;;  %v365_v32 = vmul.f32 0.03125, %v360_v29  ;;  %v372_v39 = vmul.f32 %v368_v30, %v368_v30 }
 0x177   : > { %v354_v33 = vpop.xlane.xlu0 %353 }
 0x178   : > { %v363_v34 = vmul.f32 0.03125, %v354_v33  ;;  %v370_v35 = vmul.f32 %v366_v31, %v366_v31  ;;  %v369_v36 = vsub.f32 %v343_v19, %v365_v32  ;;  %v380_v41 = vsel %vm348_vm1, %v372_v39, 0.0 }
 0x17a   : > { %v367_v37 = vsub.f32 %v335_v22, %v363_v34  ;;  %v374_v38 = vsel %vm348_vm1, %v370_v35, 0.0  ;;  %v373_v43 = vmul.f32 %v369_v36, %v369_v36 }
 0x17b   : > { %375 = vadd.xlane.f32.xlu0 %v374_v38 }
 0x17c   : > { %v371_v40 = vmul.f32 %v367_v37, %v367_v37  ;;  %v383_v44 = vsel %vm348_vm1, %v373_v43, 0.0 }
 0x17e   : > { %v377_v42 = vsel %vm348_vm1, %v371_v40, 0.0 }
 0x17f   : > { %381 = vadd.xlane.f32.xlu0 %v380_v41  ;;  %378 = vadd.xlane.f32.xlu1 %v377_v42 }
 0x183   : > { %384 = vadd.xlane.f32.xlu1 %v383_v44 }
 0x204   : > { %v376_v45 = vpop.xlane.xlu0 %375 }
 0x205   : > { %v386_v46 = vmul.f32 0.03125, %v376_v45 }
 0x207   : > { %v390_v47 = vadd.f32 1e-05, %v386_v46 }
 0x208   : > { %v379_v48 = vpop.xlane.xlu1 %378  ;;  %v382_v49 = vpop.xlane.xlu0 %381 }
 0x209   : > { %542 = vrsqrt.f32 %v390_v47  ;;  %v387_v50 = vmul.f32 0.03125, %v379_v48  ;;  %v388_v51 = vmul.f32 0.03125, %v382_v49 }
 0x20b   : > { %v391_v52 = vadd.f32 1e-05, %v387_v50  ;;  %v392_v53 = vadd.f32 1e-05, %v388_v51 }
 0x20c   : > { %v385_v54 = vpop.xlane.xlu1 %384 }
 0x20d   : > { %544 = vrsqrt.f32 %v391_v52  ;;  %v389_v55 = vmul.f32 0.03125, %v385_v54 }
 0x20e   : > { %546 = vrsqrt.f32 %v392_v53 }
 0x20f   : > { %v393_v56 = vadd.f32 1e-05, %v389_v55 }
 0x211   : > { %548 = vrsqrt.f32 %v393_v56 }
 0x216   : > { %v543_v57 = vpop.eup %542 }
 0x217   : > { %v398_v59 = vmul.f32 %v543_v57, %v366_v31 }
 0x219   : > { %v408_v61 = vmul.f32 %v500_v58, %v398_v59 }
 0x21a   : > { %v545_v62 = vpop.eup %544 }
 0x21b   : > { %v547_v63 = vpop.eup %546  ;;  %v418_v0 = vadd.f32 %v501_v60, %v408_v61  ;;  %v399_v1 = vmul.f32 %v545_v62, %v367_v37 }
 0x21c   : > { %v400_v2 = vmul.f32 %v547_v63, %v368_v30 }
 0x21d   : > { %422 = vst.msk [vmem:[%s226_s21] sm:$0xff] %vm348_vm1, %v418_v0  ;;  %v409_v3 = vmul.f32 %v500_v58, %v399_v1 }
 0x21e   : > { %v549_v4 = vpop.eup %548  ;;  %v410_v5 = vmul.f32 %v500_v58, %v400_v2 }
 0x21f   : > { %v419_v6 = vadd.f32 %v501_v60, %v409_v3  ;;  %v401_v7 = vmul.f32 %v549_v4, %v369_v36 }
 0x220   : > { %v420_v8 = vadd.f32 %v501_v60, %v410_v5 }
 0x221   : > { %423 = vst.msk [vmem:[%s226_s21 + $0x8] sm:$0xff] %vm348_vm1, %v419_v6  ;;  %v411_v9 = vmul.f32 %v500_v58, %v401_v7 }
 0x222   : > { %424 = vst.msk [vmem:[%s226_s21 + $0x10] sm:$0xff] %vm348_vm1, %v420_v8 }
 0x223   : > { %v421_v10 = vadd.f32 %v501_v60, %v411_v9 }
 0x225   : > { %425 = vst.msk [vmem:[%s226_s21 + $0x18] sm:$0xff] %vm348_vm1, %v421_v10 }
 0x226 PF: > { %s15_s18 = sadd.s32 1, %s556_s18  }
 0x227   : > { %p12_p4 = scmp.ge.s32.totalorder %s15_s18, 4  }
 0x229   :  { %14 = sbr.rel (!%p12_p4) target bundleno = 1 (0x1), region = 70 }

// kernel: _lambda_.8
= control target key start
LH: loop header
LB: loop body
LE: loop exit
PB: predicated region body
PF: predicated region fallthrough
CT: control target
= control target key end

     0   :  { %s2983_s29 = smov 0   ;;  %s3321_s0 = inlined_call_operand.vmem [shape: f32[8,8,32], index: 0, kind: input, shape index: {}]   ;;  %s3322_s1 = inlined_call_operand.vmem [shape: f32[1,32], index: 1, kind: input, shape index: {}]   ;;  %s3323_s2 = inlined_call_operand.vmem [shape: f32[1,32], index: 2, kind: input, shape index: {}]   ;;  %s3324_s3 = inlined_call_operand.vmem [shape: bf16[32,96], index: 3, kind: input, shape index: {}]   ;;  %s3325_s4 = inlined_call_operand.vmem [shape: f32[1,96], index: 4, kind: input, shape index: {}]   ;;  %s3326_s5 = inlined_call_operand.vmem [shape: f32[2,1,8,8], index: 5, kind: input, shape index: {}]   ;;  %s3327_s6 = inlined_call_operand.vmem [shape: bf16[32,32], index: 6, kind: input, shape index: {}]   ;;  %s3328_s7 = inlined_call_operand.vmem [shape: f32[1,32], index: 7, kind: input, shape index: {}]   ;;  %s3329_s8 = inlined_call_operand.vmem [shape: f32[1,32], index: 8, kind: input, shape index: {}]   ;;  %s3330_s9 = inlined_call_operand.vmem [shape: f32[1,32], index: 9, kind: input, shape index: {}]   ;;  %s3331_s10 = inlined_call_operand.vmem [shape: bf16[32,128], index: 10, kind: input, shape index: {}]   ;;  %s3332_s11 = inlined_call_operand.vmem [shape: f32[1,128], index: 11, kind: input, shape index: {}]   ;;  %s3333_s12 = inlined_call_operand.vmem [shape: bf16[128,32], index: 12, kind: input, shape index: {}]   ;;  %s3334_s13 = inlined_call_operand.vmem [shape: f32[1,32], index: 13, kind: input, shape index: {}]   ;;  %s3335_s14 = inlined_call_operand.vmem [shape: f32[8,8,32], index: 14, kind: output, shape index: {}]  }
   0x1 LB: > { %s2550_s30 = sadd.s32 4294967295, %s2899_s29   ;;  %p2554_p0 = scmp.ge.s32.totalorder %s2899_s29, 1  ;;  %s2899_s29 = sphi %s2983_s29, %s24_s29  }
   0x2   : > { %p413_p1 = scmp.lt.s32.totalorder %s2899_s29, 3 }
   0x4   : > { %p414_p2 = pnand %p2554_p0, %p413_p1 }
   0x5   : > { %s2555_s15 = sshll.u32 (!%p414_p2), %s2550_s30, 2  ;;  %s2903_s17 = smov (!%p414_p2), 96  }
   0x6   : > { %417 = sbr.rel (%p414_p2) target bundleno = 2917 (0xb65), region = 76  ;;  %p460_p3 = scmp.lt.s32.totalorder (!%p414_p2), %s2555_s15, 7 }
   0x7   : > { %s2904_s20 = smov (!%p414_p2), 64   ;;  %s2905_s21 = smov (!%p414_p2), 80  }
   0x8   : > { %s2906_s22 = smov (!%p414_p2), 112   ;;  %s2907_s25 = smov (!%p414_p2), 48  }
   0xb   : > { %s3337_s15 = smov (!%p460_p3, %s2555_s15), 7  ;;  %vm478_vm0 = vcmask 261120   ;;  %v2815_v28 = vld [vmem:[%s3324_s3 + $0x8] sm:$0xff]   ;;  %v2816_v29 = vld [vmem:[%s3324_s3] sm:$0xff]   ;;  %v2901_v62 = vmov 0.0   ;;  %vm2902_vm1 = vmmov 0  }
   0xc   : > { %s2556_s16 = sshll.u32 %s3337_s15, 3  ;;  %2672 = vmatprep.subr.bf16.mxu1 %v2815_v28  ;;  %v2559_v44 = vld [vmem:[%s3322_s1] ss:$0 sm:$0xff]  ;;  %2695 = vmatprep.subr.mxu0 %v2901_v62  ;;  %vm636_vm2 = vcmask 130048   ;;  %vm942_vm3 = vcmask 64512  }
   0xd   : > { %s463_s19 = scalar_lea.vmem %s3321_s0, %s2556_s16  ;;  %2673 = vmatpush3.bf16.msra.mxu1 %v2815_v28  ;;  %v2560_v49 = vld [vmem:[%s3323_s2] ss:$0 sm:$0xff]  ;;  %2697 = vmatprep.mubr.msk.f32.mxu0 %vm2902_vm1, %v2901_v62 }
   0xe   : > { %v2999_v0 = vld [vmem:[%s463_s19] sm:$0xff]  ;;  %v3001_v1 = vld [vmem:[%s463_s19 + $0x10] sm:$0xff]  ;;  %v3003_v2 = vld [vmem:[%s463_s19 + $0x8] sm:$0xff]  ;;  %2674 = vmatprep.subr.bf16.mxu1 %v2816_v29 }
   0xf   : > { %v479_v3 = vsel %vm478_vm0, %v2999_v0, 0.0  ;;  %v485_v4 = vsel %vm478_vm0, %v3001_v1, 0.0  ;;  %v3009_v5 = vld [vmem:[%s463_s19 + $0x18] sm:$0xff]  ;;  %v482_v6 = vsel %vm478_vm0, %v3003_v2, 0.0  ;;  %v2561_v63 = vld [vmem:[%s3325_s4] ss:$0 sm:$0xff] }
  0x10   : > { %480 = vadd.xlane.f32.xlu0 %v479_v3  ;;  %486 = vadd.xlane.f32.xlu1 %v485_v4  ;;  %v488_v7 = vsel %vm478_vm0, %v3009_v5, 0.0 }
  0x11   : > { %2675 = vmatpush3.bf16.msra.mxu1 %v2816_v29 }
  0x12   : > { %2680 = vmatprep.subr.mxu1 %v2901_v62 }
  0x14   : > { %483 = vadd.xlane.f32.xlu0 %v482_v6  ;;  %489 = vadd.xlane.f32.xlu1 %v488_v7 }
  0x99   : > { %v481_v8 = vpop.xlane.xlu0 %480  ;;  %v487_v9 = vpop.xlane.xlu1 %486 }
  0x9a   : > { %v492_v10 = vmul.f32 0.03125, %v481_v8  ;;  %v494_v11 = vmul.f32 0.03125, %v487_v9 }
  0x9c   : > { %v496_v12 = vsub.f32 %v2999_v0, %v492_v10  ;;  %v498_v13 = vsub.f32 %v3001_v1, %v494_v11 }
  0x9d   : > { %v484_v14 = vpop.xlane.xlu0 %483  ;;  %v490_v15 = vpop.xlane.xlu1 %489 }
  0x9e   : > { %v493_v16 = vmul.f32 0.03125, %v484_v14  ;;  %v495_v17 = vmul.f32 0.03125, %v490_v15  ;;  %v500_v18 = vmul.f32 %v496_v12, %v496_v12  ;;  %v502_v19 = vmul.f32 %v498_v13, %v498_v13 }
  0xa0   : > { %v497_v20 = vsub.f32 %v3003_v2, %v493_v16  ;;  %v499_v21 = vsub.f32 %v3009_v5, %v495_v17  ;;  %v504_v22 = vsel %vm478_vm0, %v500_v18, 0.0  ;;  %v510_v23 = vsel %vm478_vm0, %v502_v19, 0.0  ;;  %v632_v16 = vld [vmem:[%s3326_s5] sm:$0xff] }
  0xa1   : > { %505 = vadd.xlane.f32.xlu0 %v504_v22 }
  0xa2   : > { %v501_v24 = vmul.f32 %v497_v20, %v497_v20  ;;  %v503_v25 = vmul.f32 %v499_v21, %v499_v21 }
  0xa4   : > { %v507_v26 = vsel %vm478_vm0, %v501_v24, 0.0  ;;  %v513_v27 = vsel %vm478_vm0, %v503_v25, 0.0 }
  0xa5   : > { %511 = vadd.xlane.f32.xlu0 %v510_v23  ;;  %508 = vadd.xlane.f32.xlu1 %v507_v26 }
  0xa9   : > { %514 = vadd.xlane.f32.xlu1 %v513_v27 }
 0x12a   : > { %v506_v30 = vpop.xlane.xlu0 %505 }
 0x12b   : > { %v516_v31 = vmul.f32 0.03125, %v506_v30 }
 0x12d   : > { %v520_v32 = vadd.f32 1e-05, %v516_v31 }
 0x12e   : > { %v509_v33 = vpop.xlane.xlu1 %508  ;;  %v512_v34 = vpop.xlane.xlu0 %511 }
 0x12f   : > { %2829 = vrsqrt.f32 %v520_v32  ;;  %v517_v35 = vmul.f32 0.03125, %v509_v33  ;;  %v518_v36 = vmul.f32 0.03125, %v512_v34 }
 0x131   : > { %v521_v37 = vadd.f32 1e-05, %v517_v35  ;;  %v522_v38 = vadd.f32 1e-05, %v518_v36 }
 0x132   : > { %v515_v39 = vpop.xlane.xlu1 %514 }
 0x133   : > { %2831 = vrsqrt.f32 %v521_v37  ;;  %v519_v40 = vmul.f32 0.03125, %v515_v39 }
 0x134   : > { %2833 = vrsqrt.f32 %v522_v38 }
 0x135   : > { %v523_v41 = vadd.f32 1e-05, %v519_v40 }
 0x137   : > { %2835 = vrsqrt.f32 %v523_v41 }
 0x13c   : > { %v2830_v42 = vpop.eup %2829 }
 0x13d   : > { %v528_v43 = vmul.f32 %v2830_v42, %v496_v12 }
 0x13f   : > { %v538_v48 = vmul.f32 %v2559_v44, %v528_v43 }
 0x140   : > { %v2832_v45 = vpop.eup %2831 }
 0x141   : > { %v2834_v46 = vpop.eup %2833  ;;  %v529_v47 = vmul.f32 %v2832_v45, %v497_v20  ;;  %v548_v53 = vadd.f32 %v2560_v49, %v538_v48 }
 0x142   : > { %v530_v50 = vmul.f32 %v2834_v46, %v498_v13 }
 0x143   : > { %v539_v51 = vmul.f32 %v2559_v44, %v529_v47 }
 0x144   : > { %v2836_v52 = vpop.eup %2835  ;;  %v540_v56 = vmul.f32 %v2559_v44, %v530_v50 }
 0x145   : > { %v549_v54 = vadd.f32 %v2560_v49, %v539_v51  ;;  %v531_v55 = vmul.f32 %v2836_v52, %v499_v21 }
 0x146   : > { %v550_v59 = vadd.f32 %v2560_v49, %v540_v56 }
 0x147   : > { %v552_v57 = vpack.c.bf16 %v549_v54, %v548_v53  ;;  %v541_v58 = vmul.f32 %v2559_v44, %v531_v55 }
 0x149   : > { %2676 = vmatprep.mubr.msk.bf16.mxu1 %vm478_vm0, %v552_v57  ;;  %v551_v60 = vadd.f32 %v2560_v49, %v541_v58 }
 0x14b   : > { %v553_v61 = vpack.c.bf16 %v551_v60, %v550_v59 }
 0x14d   : > { %2677 = vmatmul.mubr.msk.bf16.vlgmr.msra.gmra.mxu1 %vm478_vm0, %v553_v61 }
 0x14e   : > { %2682 = vmatprep.mubr.msk.f32.mxu1 %vm2902_vm1, %v2901_v62 }
 0x20d   : > { %v2678_v3 = vpop.f32.mrf.mxu1 }
 0x20e   : > { %v3046_v4 = vadd.f32 %v2678_v3, %v2561_v63 }
 0x20f   : > { %v617_v6 = vpop.f32.mrf.mxu1 }
 0x210   : > { %v3048_v7 = vadd.f32 %v2561_v63, %v617_v6  ;;  %789 = vrot.lane.b32.xlu1 %v3046_v4, %s2903_s17 }
 0x211   : > { %v2679_v8 = vpop.f32.mrf.mxu1 }
 0x212   : > { %634 = vrot.lane.b32.xlu0 %v3048_v7, %s2903_s17  ;;  %v3055_v11 = vadd.f32 %v2679_v8, %v2561_v63 }
 0x213   : > { %v620_v9 = vpop.f32.mrf.mxu1 }
 0x214   : > { %v3052_v10 = vadd.f32 %v2561_v63, %v620_v9 }
 0x216   : > { %712 = vrot.lane.b32.xlu1 %v3052_v10, %s2903_s17 }
 0x21a   : > { %866 = vrot.lane.b32.xlu1 %v3055_v11, %s2903_s17 }
 0x282   : > { %v790_v12 = vpop.permute.xlu1 %789 }
 0x284   : > { %v635_v13 = vpop.permute.xlu0 %634 }
 0x285   : > { %2681 = vmatpush3.xpose.msk.msra.mxu1 %vm636_vm2, %v635_v13 }
 0x286   : > { %2685 = vmatprep.subr.mxu1 %v2901_v62 }
 0x288   : > { %v713_v14 = vpop.permute.xlu1 %712  ;;  %2683 = vmatmul.mubr.msk.f32.vlgmr.msra.gmra.mxu1 %vm636_vm2, %v3048_v7 }
 0x289   : > { %2686 = vmatpush3.xpose.msk.msra.mxu1 %vm636_vm2, %v713_v14  ;;  %2687 = vmatprep.mubr.msk.f32.mxu1 %vm2902_vm1, %v2901_v62 }
 0x28a   : > { %2690 = vmatprep.subr.mxu1 %v2901_v62 }
 0x28c   : > { %v867_v15 = vpop.permute.xlu1 %866  ;;  %2688 = vmatmul.mubr.msk.f32.vlgmr.msra.gmra.mxu1 %vm636_vm2, %v3052_v10 }
 0x28d   : > { %2691 = vmatpush3.xpose.msk.msra.mxu1 %vm636_vm2, %v790_v12  ;;  %2696 = vmatpush3.xpose.msk.msra.mxu0 %vm636_vm2, %v867_v15 }
 0x28e   : > { %2692 = vmatprep.mubr.msk.f32.mxu1 %vm2902_vm1, %v2901_v62  ;;  %2705 = vmatprep.subr.mxu0 %v2901_v62 }
 0x28f   : > { %2700 = vmatprep.subr.mxu1 %v2901_v62 }
 0x290   : > { %2693 = vmatmul.mubr.msk.f32.vlgmr.msra.gmra.mxu1 %vm636_vm2, %v3046_v4  ;;  %2698 = vmatmul.mubr.msk.f32.vlgmr.msra.gmra.mxu0 %vm636_vm2, %v3055_v11 }
 0x291   : > { %2702 = vmatprep.mubr.msk.f32.mxu1 %vm2902_vm1, %v2901_v62  ;;  %2707 = vmatprep.mubr.msk.f32.mxu0 %vm2902_vm1, %v2901_v62 }
 0x348   : > { %v707_v17 = vpop.f32.mrf.mxu1 }
 0x349   : > { %v708_v18 = vadd.f32 %v707_v17, %v632_v16 }
 0x34a   : > { %v2684_v19 = vpop.f32.mrf.mxu1 }
 0x34b   : > { %v943_v20 = vsel %vm942_vm3, %v708_v18, -inf }
 0x34c   : > { %944 = vmax.xlane.f32.xlu0 %v943_v20  ;;  %v784_v21 = vpop.f32.mrf.mxu1 }
 0x34d   : > { %v785_v22 = vadd.f32 %v784_v21, %v632_v16 }
 0x34e   : > { %v2689_v23 = vpop.f32.mrf.mxu1 }
 0x34f   : > { %v946_v24 = vsel %vm942_vm3, %v785_v22, -inf }
 0x350   : > { %v938_v25 = vpop.f32.mrf.mxu0  ;;  %947 = vmax.xlane.f32.xlu1 %v946_v24  ;;  %v861_v26 = vpop.f32.mrf.mxu1 }
 0x351   : > { %v862_v27 = vadd.f32 %v861_v26, %v632_v16  ;;  %v939_v30 = vadd.f32 %v938_v25, %v632_v16  ;;  %v2578_v26 = vld [vmem:[%s3326_s5 + $0x8] sm:$0xff] }
 0x352   : > { %v2694_v28 = vpop.f32.mrf.mxu1  ;;  %v2699_v29 = vpop.f32.mrf.mxu0 }
 0x353   : > { %v949_v31 = vsel %vm942_vm3, %v862_v27, -inf  ;;  %v952_v32 = vsel %vm942_vm3, %v939_v30, -inf }
 0x354   : > { %950 = vmax.xlane.f32.xlu0 %v949_v31 }
 0x358   : > { %953 = vmax.xlane.f32.xlu0 %v952_v32 }
 0x361   : > { %1063 = vrot.lane.b32.xlu1 %v3052_v10, %s2904_s20 }
 0x365   : > { %1139 = vrot.lane.b32.xlu1 %v3046_v4, %s2904_s20 }
 0x369   : > { %1215 = vrot.lane.b32.xlu1 %v3055_v11, %s2904_s20 }
 0x36d   : > { %1377 = vrot.lane.b32.xlu1 %v3052_v10, %s2905_s21 }
 0x36e   : > { %987 = vrot.lane.b32.xlu0 %v3048_v7, %s2904_s20 }
 0x372   : > { %1299 = vrot.lane.b32.xlu0 %v3048_v7, %s2905_s21 }
 0x3d5   : > { %v945_v33 = vpop.xlane.xlu0 %944 }
 0x3d6   : > { %v955_v34 = vsub.f32 %v708_v18, %v945_v33 }
 0x3d8   : > { %v959_v35 = vmul.f32 1.442695, %v955_v34 }
 0x3d9   : > { %v948_v36 = vpop.xlane.xlu1 %947 }
 0x3da   : > { %2837 = vpow2.f32 %v959_v35  ;;  %v956_v40 = vsub.f32 %v785_v22, %v948_v36 }
 0x3dc   : > { %v961_v44 = vmul.f32 1.442695, %v956_v40 }
 0x3dd   : > { %v1064_v37 = vpop.permute.xlu1 %1063  ;;  %v951_v38 = vpop.xlane.xlu0 %950 }
 0x3de   : > { %v957_v39 = vsub.f32 %v862_v27, %v951_v38  ;;  %2706 = vmatpush3.msra.mxu0 %v1064_v37 }
 0x3df   : > { %2715 = vmatprep.subr.mxu0 %v2901_v62 }
 0x3e0   : > { %v963_v41 = vmul.f32 1.442695, %v957_v39 }
 0x3e1   : > { %v954_v42 = vpop.xlane.xlu0 %953  ;;  %v1140_v55 = vpop.permute.xlu1 %1139 }
 0x3e2   : > { %2839 = vpow2.f32 %v963_v41  ;;  %v958_v43 = vsub.f32 %v939_v30, %v954_v42 }
 0x3e4   : > { %v965_v45 = vmul.f32 1.442695, %v958_v43 }
 0x3e5   : > { %v988_v46 = vpop.permute.xlu0 %987  ;;  %v1216_v58 = vpop.permute.xlu1 %1215 }
 0x3e6   : > { %2841 = vpow2.f32 %v965_v45  ;;  %2701 = vmatpush3.msra.mxu1 %v988_v46 }
 0x3e7   : > { %v2838_v47 = vpop.eup %2837  ;;  %2710 = vmatprep.subr.mxu1 %v2901_v62  ;;  %2843 = vpow2.f32 %v961_v44 }
 0x3e8   : > { %v967_v48 = vsel %vm942_vm3, %v2838_v47, 0.0 }
 0x3e9   : > { %968 = vadd.xlane.f32.xlu0 %v967_v48  ;;  %v1300_v56 = vpop.permute.xlu0 %1299  ;;  %v1378_v59 = vpop.permute.xlu1 %1377 }
 0x3ef   : > { %v2840_v49 = vpop.eup %2839 }
 0x3f0   : > { %v973_v50 = vsel %vm942_vm3, %v2840_v49, 0.0 }
 0x3f1   : > { %974 = vadd.xlane.f32.xlu0 %v973_v50 }
 0x3f3   : > { %v2842_v51 = vpop.eup %2841 }
 0x3f4   : > { %v976_v52 = vsel %vm942_vm3, %v2842_v51, 0.0  ;;  %v2844_v53 = vpop.eup %2843 }
 0x3f5   : > { %977 = vadd.xlane.f32.xlu1 %v976_v52  ;;  %v970_v54 = vsel %vm942_vm3, %v2844_v53, 0.0 }
 0x3f9   : > { %971 = vadd.xlane.f32.xlu1 %v970_v54 }
 0x407   : > { %1297 = vrot.lane.b32.xlu0 %v3048_v7, %s2906_s22 }
 0x40a   : > { %1375 = vrot.lane.b32.xlu1 %v3052_v10, %s2906_s22 }
 0x40b   : > { %1455 = vrot.lane.b32.xlu0 %v3046_v4, %s2905_s21 }
 0x40e   : > { %1533 = vrot.lane.b32.xlu1 %v3055_v11, %s2905_s21  ;;  %s469_s21 = scalar_lea.vmem %s3335_s14, %s2556_s16 }
 0x40f   : > { %1453 = vrot.lane.b32.xlu0 %v3046_v4, %s2906_s22 }
 0x412   : > { %1531 = vrot.lane.b32.xlu1 %v3055_v11, %s2906_s22 }
 0x472   : > { %v969_v57 = vpop.xlane.xlu0 %968 }
 0x473   : > { %2845 = vrcp.f32 %v969_v57 }
 0x47a   : > { %v975_v60 = vpop.xlane.xlu0 %974 }
 0x47b   : > { %2847 = vrcp.f32 %v975_v60 }
 0x47e   : > { %v978_v61 = vpop.xlane.xlu1 %977  ;;  %v1298_v8 = vpop.permute.xlu0 %1297 }
 0x480   : > { %v2846_v63 = vpop.eup %2845 }
 0x481   : > { %v983_v3 = vmul.f32 %v2846_v63, %v2838_v47 }
 0x482   : > { %v972_v6 = vpop.xlane.xlu1 %971  ;;  %v1456_v13 = vpop.permute.xlu0 %1455 }
 0x483   : > { %2849 = vrcp.f32 %v972_v6  ;;  %2703 = vmatmul.mubr.msk.f32.vlgmr.msra.gmra.mxu1 %vm942_vm3, %v983_v3 }
 0x484   : > { %2711 = vmatpush3.msra.mxu1 %v1140_v55  ;;  %2712 = vmatprep.mubr.msk.f32.mxu1 %vm2902_vm1, %v2901_v62  ;;  %2851 = vrcp.f32 %v978_v61 }
 0x485   : > { %2720 = vmatprep.subr.mxu1 %v2901_v62 }
 0x486   : > { %v1376_v17 = vpop.permute.xlu1 %1375  ;;  %v1454_v18 = vpop.permute.xlu0 %1453 }
 0x488   : > { %v2848_v9 = vpop.eup %2847 }
 0x489   : > { %v985_v12 = vmul.f32 %v2848_v9, %v2840_v49 }
 0x48a   : > { %v1534_v20 = vpop.permute.xlu1 %1533 }
 0x48b   : > { %2713 = vmatmul.mubr.msk.f32.vlgmr.msra.gmra.mxu1 %vm942_vm3, %v985_v12 }
 0x48c   : > { %2721 = vmatpush3.xpose.msk.msra.mxu1 %vm636_vm2, %v1300_v56  ;;  %2722 = vmatprep.mubr.msk.f32.mxu1 %vm2902_vm1, %v2901_v62 }
 0x48d   : > { %2730 = vmatprep.subr.mxu1 %v2901_v62 }
 0x48e   : > { %v1532_v21 = vpop.permute.xlu1 %1531 }
 0x48f   : > { %2723 = vmatmul.mubr.msk.f32.vlgmr.msra.gmra.mxu1 %vm636_vm2, %v1298_v8 }
 0x490   : > { %v2850_v14 = vpop.eup %2849  ;;  %2731 = vmatpush3.xpose.msk.msra.mxu1 %vm636_vm2, %v1456_v13  ;;  %2732 = vmatprep.mubr.msk.f32.mxu1 %vm2902_vm1, %v2901_v62 }
 0x491   : > { %v984_v15 = vmul.f32 %v2850_v14, %v2844_v53  ;;  %2740 = vmatprep.subr.mxu1 %v2901_v62  ;;  %v2852_v16 = vpop.eup %2851 }
 0x492   : > { %v986_v19 = vmul.f32 %v2852_v16, %v2842_v51 }
 0x493   : > { %2708 = vmatmul.mubr.msk.f32.vlgmr.msra.gmra.mxu0 %vm942_vm3, %v984_v15  ;;  %2733 = vmatmul.mubr.msk.f32.vlgmr.msra.gmra.mxu1 %vm636_vm2, %v1454_v18 }
 0x494   : > { %2716 = vmatpush3.msra.mxu0 %v1216_v58  ;;  %2717 = vmatprep.mubr.msk.f32.mxu0 %vm2902_vm1, %v2901_v62 }
 0x495   : > { %2725 = vmatprep.subr.mxu0 %v2901_v62  ;;  %2742 = vmatprep.mubr.msk.f32.mxu1 %vm2902_vm1, %v2901_v62 }
 0x497   : > { %2718 = vmatmul.mubr.msk.f32.vlgmr.msra.gmra.mxu0 %vm942_vm3, %v986_v19 }
 0x498   : > { %2726 = vmatpush3.xpose.msk.msra.mxu0 %vm636_vm2, %v1378_v59  ;;  %2727 = vmatprep.mubr.msk.f32.mxu0 %vm2902_vm1, %v2901_v62 }
 0x499   : > { %2735 = vmatprep.subr.mxu0 %v2901_v62 }
 0x49b   : > { %2728 = vmatmul.mubr.msk.f32.vlgmr.msra.gmra.mxu0 %vm636_vm2, %v1376_v17 }
 0x49c   : > { %2736 = vmatpush3.xpose.msk.msra.mxu0 %vm636_vm2, %v1534_v20  ;;  %2737 = vmatprep.mubr.msk.f32.mxu0 %vm2902_vm1, %v2901_v62 }
 0x49d   : > { %2745 = vmatprep.subr.mxu0 %v2901_v62 }
 0x49f   : > { %2738 = vmatmul.mubr.msk.f32.vlgmr.msra.gmra.mxu0 %vm636_vm2, %v1532_v21 }
 0x4a0   : > { %2747 = vmatprep.mubr.msk.f32.mxu0 %vm2902_vm1, %v2901_v62 }
 0x543   : > { %v3145_v22 = vpop.f32.mrf.mxu1 }
 0x545   : > { %v2704_v23 = vpop.f32.mrf.mxu1 }
 0x54b   : > { %v3147_v24 = vpop.f32.mrf.mxu1 }
 0x54d   : > { %v2714_v25 = vpop.f32.mrf.mxu1 }
 0x54e   : > { %v2817_v25 = vld [vmem:[%s3327_s6] sm:$0xff]  }
 0x54f   : > { %v1371_v27 = vpop.f32.mrf.mxu1 }
 0x550   : > { %v1372_v28 = vadd.f32 %v2578_v26, %v1371_v27 }
 0x551   : > { %v2724_v29 = vpop.f32.mrf.mxu1 }
 0x552   : > { %v1609_v30 = vsel %vm942_vm3, %v1372_v28, -inf }
 0x553   : > { %v3153_v31 = vpop.f32.mrf.mxu0  ;;  %1610 = vmax.xlane.f32.xlu0 %v1609_v30  ;;  %v1527_v32 = vpop.f32.mrf.mxu1 }
 0x554   : > { %v1291_v33 = vpack.c.bf16 %v3153_v31, %v3145_v22  ;;  %v1528_v34 = vadd.f32 %v2578_v26, %v1527_v32 }
 0x555   : > { %v2709_v35 = vpop.f32.mrf.mxu0  ;;  %v2734_v36 = vpop.f32.mrf.mxu1 }
 0x556   : > { %v1615_v37 = vsel %vm942_vm3, %v1528_v34, -inf }
 0x557   : > { %v3158_v38 = vpop.f32.mrf.mxu0  ;;  %1616 = vmax.xlane.f32.xlu0 %v1615_v37 }
 0x558   : > { %v1292_v39 = vpack.c.bf16 %v3158_v38, %v3147_v24 }
 0x559   : > { %v2719_v40 = vpop.f32.mrf.mxu0 }
 0x55b   : > { %v1449_v41 = vpop.f32.mrf.mxu0 }
 0x55c   : > { %v1450_v42 = vadd.f32 %v2578_v26, %v1449_v41 }
 0x55d   : > { %v2729_v43 = vpop.f32.mrf.mxu0 }
 0x55e   : > { %v1612_v44 = vsel %vm942_vm3, %v1450_v42, -inf }
 0x55f   : > { %1613 = vmax.xlane.f32.xlu1 %v1612_v44  ;;  %v1605_v45 = vpop.f32.mrf.mxu0 }
 0x560   : > { %v1606_v46 = vadd.f32 %v2578_v26, %v1605_v45 }
 0x561   : > { %v2739_v47 = vpop.f32.mrf.mxu0 }
 0x562   : > { %v1618_v48 = vsel %vm942_vm3, %v1606_v46, -inf }
 0x563   : > { %1619 = vmax.xlane.f32.xlu0 %v1618_v48 }
 0x5dc   : > { %v1611_v49 = vpop.xlane.xlu0 %1610 }
 0x5dd   : > { %v1621_v50 = vsub.f32 %v1372_v28, %v1611_v49  ;;  %v2597_v49 = vld [vmem:[%s3328_s7] ss:$0 sm:$0xff] }
 0x5df   : > { %v1625_v51 = vmul.f32 1.442695, %v1621_v50 }
 0x5e0   : > { %v1617_v52 = vpop.xlane.xlu0 %1616 }
 0x5e1   : > { %2853 = vpow2.f32 %v1625_v51  ;;  %v1623_v53 = vsub.f32 %v1528_v34, %v1617_v52 }
 0x5e3   : > { %v1629_v54 = vmul.f32 1.442695, %v1623_v53 }
 0x5e5   : > { %2855 = vpow2.f32 %v1629_v54 }
 0x5e8   : > { %v1614_v55 = vpop.xlane.xlu1 %1613 }
 0x5e9   : > { %v1622_v56 = vsub.f32 %v1450_v42, %v1614_v55 }
 0x5eb   : > { %v1627_v57 = vmul.f32 1.442695, %v1622_v56 }
 0x5ec   : > { %v1620_v6 = vpop.xlane.xlu0 %1619 }
 0x5ed   : > { %2857 = vpow2.f32 %v1627_v57  ;;  %v1624_v8 = vsub.f32 %v1606_v46, %v1620_v6 }
 0x5ee   : > { %v2854_v58 = vpop.eup %2853 }
 0x5ef   : > { %v1633_v59 = vsel %vm942_vm3, %v2854_v58, 0.0  ;;  %v1631_v9 = vmul.f32 1.442695, %v1624_v8 }
 0x5f0   : > { %1634 = vadd.xlane.f32.xlu0 %v1633_v59 }
 0x5f1   : > { %2859 = vpow2.f32 %v1631_v9 }
 0x5f2   : > { %v2856_v60 = vpop.eup %2855 }
 0x5f3   : > { %v1639_v61 = vsel %vm942_vm3, %v2856_v60, 0.0 }
 0x5f4   : > { %1640 = vadd.xlane.f32.xlu0 %v1639_v61 }
 0x5fa   : > { %v2858_v63 = vpop.eup %2857 }
 0x5fb   : > { %v1636_v3 = vsel %vm942_vm3, %v2858_v63, 0.0 }
 0x5fc   : > { %1637 = vadd.xlane.f32.xlu1 %v1636_v3 }
 0x5fe   : > { %v2860_v12 = vpop.eup %2859 }
 0x5ff   : > { %v1642_v13 = vsel %vm942_vm3, %v2860_v12, 0.0 }
 0x60a   : > { %1653 = vrot.lane.b32.xlu0 %v3048_v7, %s2907_s25 }
 0x60d   : > { %1729 = vrot.lane.b32.xlu1 %v3052_v10, %s2907_s25 }
 0x611   : > { %1805 = vrot.lane.b32.xlu1 %v3046_v4, %s2907_s25 }
 0x635   : > { %1643 = vadd.xlane.f32.xlu1 %v1642_v13 }
 0x646   : > { %1881 = vrot.lane.b32.xlu1 %v3055_v11, %s2907_s25 }
 0x679   : > { %v1635_v14 = vpop.xlane.xlu0 %1634 }
 0x67a   : > { %2861 = vrcp.f32 %v1635_v14 }
 0x67d   : > { %v1641_v15 = vpop.xlane.xlu0 %1640 }
 0x67e   : > { %2863 = vrcp.f32 %v1641_v15 }
 0x681   : > { %v1654_v16 = vpop.permute.xlu0 %1653 }
 0x682   : > { %2741 = vmatpush3.msra.mxu1 %v1654_v16 }
 0x683   : > { %2750 = vmatprep.subr.mxu1 %v2901_v62 }
 0x685   : > { %v1638_v7 = vpop.xlane.xlu1 %1637 }
 0x686   : > { %2865 = vrcp.f32 %v1638_v7 }
 0x687   : > { %v2862_v4 = vpop.eup %2861 }
 0x688   : > { %v1649_v10 = vmul.f32 %v2862_v4, %v2854_v58 }
 0x689   : > { %v1730_v17 = vpop.permute.xlu1 %1729 }
 0x68a   : > { %2743 = vmatmul.mubr.msk.f32.vlgmr.msra.gmra.mxu1 %vm942_vm3, %v1649_v10  ;;  %2746 = vmatpush3.msra.mxu0 %v1730_v17 }
 0x68b   : > { %v2864_v18 = vpop.eup %2863  ;;  %2752 = vmatprep.mubr.msk.f32.mxu1 %vm2902_vm1, %v2901_v62  ;;  %2755 = vmatprep.subr.mxu0 %v2901_v62 }
 0x68c   : > { %v1651_v11 = vmul.f32 %v2864_v18, %v2856_v60 }
 0x68d   : > { %v1806_v19 = vpop.permute.xlu1 %1805 }
 0x68e   : > { %2751 = vmatpush3.msra.mxu1 %v1806_v19  ;;  %v2819_v19 = vld [vmem:[%s3331_s10 + $0x8] sm:$0xff]  }
 0x68f   : > { %2753 = vmatmul.mubr.msk.f32.vlgmr.msra.gmra.mxu1 %vm942_vm3, %v1651_v11 }
 0x693   : > { %v2866_v20 = vpop.eup %2865 }
 0x694   : > { %v1650_v21 = vmul.f32 %v2866_v20, %v2858_v63  ;;  %v2820_v20 = vld [vmem:[%s3331_s10] sm:$0xff]  }
 0x696   : > { %2748 = vmatmul.mubr.msk.f32.vlgmr.msra.gmra.mxu0 %vm942_vm3, %v1650_v21 }
 0x697   : > { %2757 = vmatprep.mubr.msk.f32.mxu0 %vm2902_vm1, %v2901_v62  ;;  %v2818_v62 = vld [vmem:[%s3327_s6 + $0x8] sm:$0xff]  }
 0x698   : > { %2760 = vmatprep.subr.bf16.mxu1 %v2818_v62 }
 0x699   : > { %2761 = vmatpush3.bf16.msra.mxu1 %v2818_v62 }
 0x69a   : > { %2772 = vmatprep.subr.bf16.mxu1 %v2819_v19 }
 0x6be   : > { %v1644_v23 = vpop.xlane.xlu1 %1643 }
 0x6bf   : > { %2867 = vrcp.f32 %v1644_v23 }
 0x6c2   : > { %v1882_v26 = vpop.permute.xlu1 %1881 }
 0x6c3   : > { %2756 = vmatpush3.msra.mxu0 %v1882_v26 }
 0x6c4   : > { %2766 = vmatprep.subr.bf16.mxu0 %v2817_v25 }
 0x6cc   : > { %v2868_v27 = vpop.eup %2867 }
 0x6cd   : > { %v1652_v28 = vmul.f32 %v2868_v27, %v2860_v12 }
 0x6cf   : > { %2758 = vmatmul.mubr.msk.f32.vlgmr.msra.gmra.mxu0 %vm942_vm3, %v1652_v28 }
 0x6d0   : > { %2767 = vmatpush3.bf16.msra.mxu0 %v2817_v25  ;;  %2768 = vmatprep.mubr.msk.bf16.mxu0 %vm636_vm2, %v1291_v33 }
 0x6d3   : > { %2769 = vmatmul.mubr.msk.bf16.vlgmr.msra.gmra.mxu0 %vm636_vm2, %v1292_v39 }
 0x74a   : > { %v1725_v29 = vpop.f32.mrf.mxu1 }
 0x74c   : > { %v2744_v30 = vpop.f32.mrf.mxu1 }
 0x74f   : > { %v1877_v32 = vpop.f32.mrf.mxu1 }
 0x751   : > { %v2754_v34 = vpop.f32.mrf.mxu1 }
 0x756   : > { %v1801_v35 = vpop.f32.mrf.mxu0 }
 0x757   : > { %v1957_v36 = vpack.c.bf16 %v1801_v35, %v1725_v29 }
 0x758   : > { %v2749_v22 = vpop.f32.mrf.mxu0 }
 0x759   : > { %2762 = vmatprep.mubr.msk.bf16.mxu1 %vm636_vm2, %v1957_v36 }
 0x78f   : > { %v1953_v31 = vpop.f32.mrf.mxu0 }
 0x790   : > { %v1958_v33 = vpack.c.bf16 %v1953_v31, %v1877_v32  ;;  %v2598_v31 = vld [vmem:[%s3329_s8] ss:$0 sm:$0xff] }
 0x791   : > { %v2759_v24 = vpop.f32.mrf.mxu0 }
 0x792   : > { %2763 = vmatmul.mubr.msk.bf16.vlgmr.msra.gmra.mxu1 %vm636_vm2, %v1958_v33 }
 0x793   : > { %v2770_v37 = vpop.f32.mrf.mxu0  ;;  %2773 = vmatpush3.bf16.msra.mxu1 %v2819_v19 }
 0x794   : > { %2774 = vmatprep.subr.bf16.mxu1 %v2820_v20 }
 0x795   : > { %v2068_v38 = vpop.f32.mrf.mxu0 }
 0x797   : > { %v2771_v41 = vpop.f32.mrf.mxu0  ;;  %2775 = vmatpush3.bf16.msra.mxu1 %v2820_v20 }
 0x799   : > { %v2071_v48 = vpop.f32.mrf.mxu0 }
 0x852   : > { %v2764_v39 = vpop.f32.mrf.mxu1 }
 0x853   : > { %v2077_v40 = vadd.f32 %v2770_v37, %v2764_v39 }
 0x854   : > { %v2007_v42 = vpop.f32.mrf.mxu1 }
 0x855   : > { %v2069_v43 = vadd.f32 %v2068_v38, %v2007_v42  ;;  %v2085_v45 = vadd.f32 %v2077_v40, %v3001_v1  ;;  %v2599_v40 = vld [vmem:[%s3330_s9] ss:$0 sm:$0xff] }
 0x856   : > { %v2765_v44 = vpop.f32.mrf.mxu1 }
 0x857   : > { %v2083_v46 = vadd.f32 %v2069_v43, %v2999_v0  ;;  %v2080_v47 = vadd.f32 %v2771_v41, %v2765_v44  ;;  %v3205_v53 = vadd.f32 %v2597_v49, %v2085_v45 }
 0x858   : > { %v2010_v50 = vpop.f32.mrf.mxu1 }
 0x859   : > { %v3203_v51 = vadd.f32 %v2597_v49, %v2083_v46  ;;  %v2072_v52 = vadd.f32 %v2071_v48, %v2010_v50  ;;  %v2086_v54 = vadd.f32 %v2080_v47, %v3009_v5  ;;  %v2106_v57 = vsel %vm478_vm0, %v3205_v53, 0.0 }
 0x85b   : > { %v2084_v55 = vadd.f32 %v2072_v52, %v3003_v2  ;;  %v2100_v1 = vsel %vm478_vm0, %v3203_v51, 0.0  ;;  %v3213_v56 = vadd.f32 %v2597_v49, %v2086_v54  ;;  %v2821_v54 = vld [vmem:[%s3333_s12 + $0x38] sm:$0xff]  }
 0x85c   : > { %2101 = vadd.xlane.f32.xlu0 %v2100_v1  ;;  %2780 = vmatprep.subr.bf16.mxu0 %v2821_v54  ;;  %v2823_v1 = vld [vmem:[%s3333_s12 + $0x28] sm:$0xff]  }
 0x85d   : > { %v3211_v0 = vadd.f32 %v2597_v49, %v2084_v55  ;;  %v2109_v5 = vsel %vm478_vm0, %v3213_v56, 0.0  ;;  %2781 = vmatpush3.bf16.msra.mxu0 %v2821_v54  ;;  %v2822_v55 = vld [vmem:[%s3333_s12 + $0x30] sm:$0xff]  }
 0x85e   : > { %2782 = vmatprep.subr.bf16.mxu0 %v2822_v55 }
 0x85f   : > { %v2103_v58 = vsel %vm478_vm0, %v3211_v0, 0.0 }
 0x860   : > { %2107 = vadd.xlane.f32.xlu0 %v2106_v57  ;;  %2104 = vadd.xlane.f32.xlu1 %v2103_v58  ;;  %v2824_v57 = vld [vmem:[%s3333_s12 + $0x20] sm:$0xff]   ;;  %v2825_v58 = vld [vmem:[%s3333_s12 + $0x18] sm:$0xff]  }
 0x861   : > { %2783 = vmatpush3.bf16.msra.mxu0 %v2822_v55 }
 0x862   : > { %2784 = vmatprep.subr.bf16.mxu0 %v2823_v1 }
 0x864   : > { %2110 = vadd.xlane.f32.xlu0 %v2109_v5  ;;  %v2826_v5 = vld [vmem:[%s3333_s12 + $0x10] sm:$0xff]  }
 0x865   : > { %2785 = vmatpush3.bf16.msra.mxu0 %v2823_v1 }
 0x866   : > { %2786 = vmatprep.subr.bf16.mxu0 %v2824_v57 }
 0x869   : > { %2787 = vmatpush3.bf16.msra.mxu0 %v2824_v57 }
 0x86a   : > { %2788 = vmatprep.subr.bf16.mxu0 %v2825_v58 }
 0x86d   : > { %2789 = vmatpush3.bf16.msra.mxu0 %v2825_v58 }
 0x86e   : > { %2790 = vmatprep.subr.bf16.mxu0 %v2826_v5 }
 0x871   : > { %2791 = vmatpush3.bf16.msra.mxu0 %v2826_v5 }
 0x8e5   : > { %v2102_v2 = vpop.xlane.xlu0 %2101 }
 0x8e6   : > { %v2112_v59 = vmul.f32 0.03125, %v2102_v2  ;;  %v2827_v2 = vld [vmem:[%s3333_s12 + $0x8] sm:$0xff]  }
 0x8e7   : > { %2792 = vmatprep.subr.bf16.mxu0 %v2827_v2 }
 0x8e8   : > { %v2116_v60 = vsub.f32 %v3203_v51, %v2112_v59  ;;  %2793 = vmatpush3.bf16.msra.mxu0 %v2827_v2  ;;  %v2828_v59 = vld [vmem:[%s3333_s12] sm:$0xff]  }
 0x8e9   : > { %v2108_v61 = vpop.xlane.xlu0 %2107  ;;  %v2105_v63 = vpop.xlane.xlu1 %2104  ;;  %2794 = vmatprep.subr.bf16.mxu0 %v2828_v59 }
 0x8ea   : > { %v2114_v3 = vmul.f32 0.03125, %v2108_v61  ;;  %v2113_v6 = vmul.f32 0.03125, %v2105_v63  ;;  %v2120_v8 = vmul.f32 %v2116_v60, %v2116_v60 }
 0x8ec   : > { %v2118_v9 = vsub.f32 %v3205_v53, %v2114_v3  ;;  %v2117_v12 = vsub.f32 %v3211_v0, %v2113_v6  ;;  %v2124_v13 = vsel %vm478_vm0, %v2120_v8, 0.0  ;;  %2795 = vmatpush3.bf16.msra.mxu0 %v2828_v59 }
 0x8ed   : > { %2125 = vadd.xlane.f32.xlu0 %v2124_v13  ;;  %v2111_v14 = vpop.xlane.xlu0 %2110 }
 0x8ee   : > { %v2115_v15 = vmul.f32 0.03125, %v2111_v14  ;;  %v2122_v16 = vmul.f32 %v2118_v9, %v2118_v9  ;;  %v2121_v7 = vmul.f32 %v2117_v12, %v2117_v12 }
 0x8f0   : > { %v2119_v4 = vsub.f32 %v3213_v56, %v2115_v15  ;;  %v2130_v10 = vsel %vm478_vm0, %v2122_v16, 0.0  ;;  %v2127_v17 = vsel %vm478_vm0, %v2121_v7, 0.0 }
 0x8f1   : > { %2131 = vadd.xlane.f32.xlu0 %v2130_v10  ;;  %2128 = vadd.xlane.f32.xlu1 %v2127_v17 }
 0x8f2   : > { %v2123_v18 = vmul.f32 %v2119_v4, %v2119_v4 }
 0x8f4   : > { %v2133_v11 = vsel %vm478_vm0, %v2123_v18, 0.0 }
 0x8f5   : > { %2134 = vadd.xlane.f32.xlu1 %v2133_v11 }
 0x976   : > { %v2126_v21 = vpop.xlane.xlu0 %2125 }
 0x977   : > { %v2136_v23 = vmul.f32 0.03125, %v2126_v21 }
 0x979   : > { %v2140_v25 = vadd.f32 1e-05, %v2136_v23 }
 0x97a   : > { %v2132_v26 = vpop.xlane.xlu0 %2131  ;;  %v2129_v27 = vpop.xlane.xlu1 %2128 }
 0x97b   : > { %2869 = vrsqrt.f32 %v2140_v25  ;;  %v2138_v28 = vmul.f32 0.03125, %v2132_v26  ;;  %v2137_v62 = vmul.f32 0.03125, %v2129_v27 }
 0x97d   : > { %v2142_v29 = vadd.f32 1e-05, %v2138_v28  ;;  %v2141_v30 = vadd.f32 1e-05, %v2137_v62 }
 0x97e   : > { %v2135_v32 = vpop.xlane.xlu1 %2134 }
 0x97f   : > { %2871 = vrsqrt.f32 %v2142_v29  ;;  %v2139_v34 = vmul.f32 0.03125, %v2135_v32 }
 0x980   : > { %2873 = vrsqrt.f32 %v2141_v30 }
 0x981   : > { %v2143_v35 = vadd.f32 1e-05, %v2139_v34 }
 0x983   : > { %2875 = vrsqrt.f32 %v2143_v35 }
 0x988   : > { %v2870_v36 = vpop.eup %2869 }
 0x989   : > { %v2148_v22 = vmul.f32 %v2870_v36, %v2116_v60  ;;  %v2600_v60 = vld [vmem:[%s3332_s11] ss:$0 sm:$0xff] }
 0x98b   : > { %v2158_v39 = vmul.f32 %v2598_v31, %v2148_v22 }
 0x98c   : > { %v2872_v33 = vpop.eup %2871 }
 0x98d   : > { %v2874_v24 = vpop.eup %2873  ;;  %v2150_v37 = vmul.f32 %v2872_v33, %v2118_v9  ;;  %v2168_v45 = vadd.f32 %v2599_v40, %v2158_v39 }
 0x98e   : > { %v2149_v38 = vmul.f32 %v2874_v24, %v2117_v12 }
 0x98f   : > { %v2160_v44 = vmul.f32 %v2598_v31, %v2150_v37 }
 0x990   : > { %v2876_v41 = vpop.eup %2875  ;;  %v2159_v42 = vmul.f32 %v2598_v31, %v2149_v38 }
 0x991   : > { %v2151_v43 = vmul.f32 %v2876_v41, %v2119_v4  ;;  %v2170_v49 = vadd.f32 %v2599_v40, %v2160_v44 }
 0x992   : > { %v2169_v46 = vadd.f32 %v2599_v40, %v2159_v42 }
 0x993   : > { %v2161_v47 = vmul.f32 %v2598_v31, %v2151_v43 }
 0x994   : > { %v2172_v48 = vpack.c.bf16 %v2169_v46, %v2168_v45 }
 0x995   : > { %v2171_v50 = vadd.f32 %v2599_v40, %v2161_v47 }
 0x996   : > { %2776 = vmatprep.mubr.msk.bf16.mxu1 %vm478_vm0, %v2172_v48 }
 0x997   : > { %v2173_v52 = vpack.c.bf16 %v2171_v50, %v2170_v49 }
 0x999   : > { %2777 = vmatmul.mubr.msk.bf16.vlgmr.msra.gmra.mxu1 %vm478_vm0, %v2173_v52 }
 0xa59   : > { %v2778_v61 = vpop.f32.mrf.mxu1 }
 0xa5a   : > { %v3270_v63 = vadd.f32 %v2778_v61, %v2600_v60 }
 0xa5b   : > { %v2237_v3 = vpop.f32.mrf.mxu1 }
 0xa5c   : > { %v3273_v6 = vmul.f32 0.70710677, %v3270_v63  ;;  %v3275_v8 = vadd.f32 %v2600_v60, %v2237_v3 }
 0xa5d   : > { %v2779_v9 = vpop.f32.mrf.mxu1 }
 0xa5e   : > { %v2262_v12 = vand.u32 2147483647, %v3273_v6  ;;  %v3279_v13 = vmul.f32 0.70710677, %v3275_v8  ;;  %v3281_v14 = vadd.f32 %v2779_v9, %v2600_v60  ;;  %vm2342_vm5 = vcmp.ge.f32.partialorder %v3273_v6, 0.0 }
 0xa5f   : > { %v2240_v15 = vpop.f32.mrf.mxu1 }
 0xa60   : > { %v2266_v16 = vmul.f32 0.3275911, %v2262_v12  ;;  %v2260_v7 = vand.u32 2147483647, %v3279_v13  ;;  %v3285_v4 = vmul.f32 0.70710677, %v3281_v14  ;;  %v3287_v10 = vadd.f32 %v2600_v60, %v2240_v15 }
 0xa61   : > { %v2318_v28 = vsub.f32 0.0, %v2262_v12  ;;  %vm2340_vm4 = vcmp.ge.f32.partialorder %v3279_v13, 0.0  ;;  %v2252_v13 = vmul.f32 0.5, %v3275_v8 }
 0xa62   : > { %v2270_v17 = vadd.f32 1.0, %v2266_v16  ;;  %v2264_v18 = vmul.f32 0.3275911, %v2260_v7  ;;  %v2263_v11 = vand.u32 2147483647, %v3285_v4  ;;  %v2316_v62 = vsub.f32 0.0, %v2260_v7 }
 0xa63   : > { %v3291_v19 = vmul.f32 0.70710677, %v3287_v10  ;;  %v2322_v29 = vmul.f32 %v2318_v28, %v2262_v12  ;;  %vm2343_vm6 = vcmp.ge.f32.partialorder %v3285_v4, 0.0  ;;  %v2253_v6 = vmul.f32 0.5, %v3287_v10 }
 0xa64   : > { %2877 = vrcp.f32 %v2270_v17  ;;  %v2268_v20 = vadd.f32 1.0, %v2264_v18  ;;  %v2267_v21 = vmul.f32 0.3275911, %v2263_v11  ;;  %v2319_v30 = vsub.f32 0.0, %v2263_v11 }
 0xa65   : > { %v2261_v23 = vand.u32 2147483647, %v3291_v19  ;;  %v2320_v34 = vmul.f32 %v2316_v62, %v2260_v7  ;;  %v2328_v36 = vmul.f32 1.442695, %v2322_v29  ;;  %vm2341_vm7 = vcmp.ge.f32.partialorder %v3291_v19, 0.0 }
 0xa66   : > { %2879 = vrcp.f32 %v2268_v20  ;;  %v2271_v25 = vadd.f32 1.0, %v2267_v21  ;;  %v2323_v31 = vmul.f32 %v2319_v30, %v2263_v11  ;;  %v2254_v4 = vmul.f32 0.5, %v3270_v63  ;;  %v2613_v63 = vld [vmem:[%s3334_s13] ss:$0 sm:$0xff] }
 0xa67   : > { %v2265_v26 = vmul.f32 0.3275911, %v2261_v23  ;;  %v2317_v22 = vsub.f32 0.0, %v2261_v23  ;;  %v2324_v38 = vmul.f32 1.442695, %v2320_v34 }
 0xa68   : > { %2881 = vrcp.f32 %v2271_v25  ;;  %v2330_v44 = vmul.f32 1.442695, %v2323_v31 }
 0xa69   : > { %v2269_v27 = vadd.f32 1.0, %v2265_v26  ;;  %v2321_v41 = vmul.f32 %v2317_v22, %v2261_v23 }
 0xa6b   : > { %2883 = vrcp.f32 %v2269_v27  ;;  %v2326_v52 = vmul.f32 1.442695, %v2321_v41 }
 0xa6c   : > { %2885 = vpow2.f32 %v2328_v36 }
 0xa6d   : > { %2887 = vpow2.f32 %v2324_v38 }
 0xa6e   : > { %2889 = vpow2.f32 %v2330_v44 }
 0xa6f   : > { %2891 = vpow2.f32 %v2326_v52 }
 0xa71   : > { %v2878_v32 = vpop.eup %2877 }
 0xa72   : > { %v2282_v35 = vmul.f32 1.0614054, %v2878_v32 }
 0xa73   : > { %v2880_v33 = vpop.eup %2879 }
 0xa74   : > { %v2286_v24 = vadd.f32 -1.4531521, %v2282_v35  ;;  %v2280_v37 = vmul.f32 1.0614054, %v2880_v33 }
 0xa75   : > { %v2882_v39 = vpop.eup %2881 }
 0xa76   : > { %v2290_v40 = vmul.f32 %v2878_v32, %v2286_v24  ;;  %v2284_v42 = vadd.f32 -1.4531521, %v2280_v37  ;;  %v2283_v43 = vmul.f32 1.0614054, %v2882_v39 }
 0xa78   : > { %v2294_v45 = vadd.f32 1.4214138, %v2290_v40  ;;  %v2884_v46 = vpop.eup %2883  ;;  %v2288_v47 = vmul.f32 %v2880_v33, %v2284_v42  ;;  %v2287_v48 = vadd.f32 -1.4531521, %v2283_v43 }
 0xa79   : > { %v2281_v50 = vmul.f32 1.0614054, %v2884_v46  ;;  %v2886_v17 = vpop.eup %2885 }
 0xa7a   : > { %v2298_v49 = vmul.f32 %v2878_v32, %v2294_v45  ;;  %v2292_v54 = vadd.f32 1.4214138, %v2288_v47  ;;  %v2291_v55 = vmul.f32 %v2882_v39, %v2287_v48  ;;  %v2888_v26 = vpop.eup %2887  ;;  %v2255_v47 = vmul.f32 0.5, %v3281_v14 }
 0xa7b   : > { %v2285_v57 = vadd.f32 -1.4531521, %v2281_v50  ;;  %v2890_v30 = vpop.eup %2889 }
 0xa7c   : > { %v2302_v1 = vadd.f32 -0.28449672, %v2298_v49  ;;  %v2296_v58 = vmul.f32 %v2880_v33, %v2292_v54  ;;  %v2295_v5 = vadd.f32 1.4214138, %v2291_v55  ;;  %v2892_v31 = vpop.eup %2891 }
 0xa7d   : > { %v2289_v59 = vmul.f32 %v2884_v46, %v2285_v57 }
 0xa7e   : > { %v2306_v2 = vmul.f32 %v2878_v32, %v2302_v1  ;;  %v2300_v60 = vadd.f32 -0.28449672, %v2296_v58  ;;  %v2299_v61 = vmul.f32 %v2882_v39, %v2295_v5 }
 0xa7f   : > { %v2293_v9 = vadd.f32 1.4214138, %v2289_v59 }
 0xa80   : > { %v2310_v3 = vadd.f32 0.2548296, %v2306_v2  ;;  %v2304_v12 = vmul.f32 %v2880_v33, %v2300_v60  ;;  %v2303_v15 = vadd.f32 -0.28449672, %v2299_v61 }
 0xa81   : > { %v2297_v7 = vmul.f32 %v2884_v46, %v2293_v9 }
 0xa82   : > { %v2314_v16 = vmul.f32 %v2878_v32, %v2310_v3  ;;  %v2308_v18 = vadd.f32 0.2548296, %v2304_v12  ;;  %v2307_v11 = vmul.f32 %v2882_v39, %v2303_v15 }
 0xa83   : > { %v2301_v21 = vadd.f32 -0.28449672, %v2297_v7 }
 0xa84   : > { %v2334_v20 = vmul.f32 %v2886_v17, %v2314_v16  ;;  %v2312_v23 = vmul.f32 %v2880_v33, %v2308_v18  ;;  %v2311_v25 = vadd.f32 0.2548296, %v2307_v11 }
 0xa85   : > { %v2305_v27 = vmul.f32 %v2884_v46, %v2301_v21 }
 0xa86   : > { %v2338_v28 = vsub.f32 1.0, %v2334_v20  ;;  %v2332_v62 = vmul.f32 %v2888_v26, %v2312_v23  ;;  %v2315_v29 = vmul.f32 %v2882_v39, %v2311_v25 }
 0xa87   : > { %v2309_v34 = vadd.f32 0.2548296, %v2305_v27 }
 0xa88   : > { %v2336_v35 = vsub.f32 1.0, %v2332_v62  ;;  %v2335_v36 = vmul.f32 %v2890_v30, %v2315_v29  ;;  %v2346_v32 = vsub.f32 0.0, %v2338_v28 }
 0xa89   : > { %v2313_v22 = vmul.f32 %v2884_v46, %v2309_v34 }
 0xa8a   : > { %v2344_v24 = vsub.f32 0.0, %v2336_v35  ;;  %v2339_v37 = vsub.f32 1.0, %v2335_v36  ;;  %v2350_v39 = vsel %vm2342_vm5, %v2338_v28, %v2346_v32 }
 0xa8b   : > { %v2333_v38 = vmul.f32 %v2892_v31, %v2313_v22  ;;  %v2354_v46 = vadd.f32 1.0, %v2350_v39 }
 0xa8c   : > { %v2347_v40 = vsub.f32 0.0, %v2339_v37  ;;  %v2348_v33 = vsel %vm2340_vm4, %v2336_v35, %v2344_v24 }
 0xa8d   : > { %v2337_v41 = vsub.f32 1.0, %v2333_v38  ;;  %v2352_v45 = vadd.f32 1.0, %v2348_v33  ;;  %v2358_v55 = vmul.f32 %v2354_v46, %v2254_v4 }
 0xa8e   : > { %v2351_v42 = vsel %vm2343_vm6, %v2339_v37, %v2347_v40 }
 0xa8f   : > { %v2355_v43 = vadd.f32 1.0, %v2351_v42  ;;  %v2345_v44 = vsub.f32 0.0, %v2337_v41  ;;  %v2356_v52 = vmul.f32 %v2352_v45, %v2252_v13 }
 0xa91   : > { %v2349_v48 = vsel %vm2341_vm7, %v2337_v41, %v2345_v44  ;;  %v2359_v50 = vmul.f32 %v2355_v43, %v2255_v47 }
 0xa92   : > { %v2353_v49 = vadd.f32 1.0, %v2349_v48 }
 0xa93   : > { %v2361_v57 = vpack.c.bf16 %v2359_v50, %v2358_v55 }
 0xa94   : > { %v2357_v54 = vmul.f32 %v2353_v49, %v2253_v6 }
 0xa96   : > { %v2360_v1 = vpack.c.bf16 %v2357_v54, %v2356_v52 }
 0xa98   : > { %2796 = vmatprep.mubr.bf16.mxu0 %v2360_v1 }
 0xa99   : > { %2797 = vmatmul.mubr.bf16.vlgmr.msra.gmra.mxu0 %v2361_v57 }
 0xb59   : > { %v2798_v19 = vpop.f32.mrf.mxu0 }
 0xb5a   : > { %v2477_v5 = vadd.f32 %v2798_v19, %v3205_v53 }
 0xb5b   : > { %v2460_v58 = vpop.f32.mrf.mxu0 }
 0xb5c   : > { %v2475_v14 = vadd.f32 %v2460_v58, %v3203_v51  ;;  %v2488_v61 = vadd.f32 %v2613_v63, %v2477_v5 }
 0xb5d   : > { %v2799_v8 = vpop.f32.mrf.mxu0 }
 0xb5e   : > { %v2486_v10 = vadd.f32 %v2613_v63, %v2475_v14  ;;  %v2478_v59 = vadd.f32 %v2799_v8, %v3213_v56  ;;  %2492 = vst.msk [vmem:[%s469_s21 + $0x10] sm:$0xff] %vm478_vm0, %v2488_v61 }
 0xb5f   : > { %v2463_v2 = vpop.f32.mrf.mxu0 }
 0xb60   : > { %2490 = vst.msk [vmem:[%s469_s21] sm:$0xff] %vm478_vm0, %v2486_v10  ;;  %v2476_v51 = vadd.f32 %v2463_v2, %v3211_v0  ;;  %v2489_v3 = vadd.f32 %v2613_v63, %v2478_v59 }
 0xb62   : > { %v2487_v60 = vadd.f32 %v2613_v63, %v2476_v51  ;;  %2493 = vst.msk [vmem:[%s469_s21 + $0x18] sm:$0xff] %vm478_vm0, %v2489_v3 }
 0xb64   : > { %2491 = vst.msk [vmem:[%s469_s21 + $0x8] sm:$0xff] %vm478_vm0, %v2487_v60 }
 0xb65 PF: > { %s24_s29 = sadd.s32 1, %s2899_s29  }
 0xb66   : > { %p21_p4 = scmp.ge.s32.totalorder %s24_s29, 4  }
 0xb68   :  { %23 = sbr.rel (!%p21_p4) target bundleno = 1 (0x1), region = 107 }

// kernel: _lambda_.9
= control target key start
LH: loop header
LB: loop body
LE: loop exit
PB: predicated region body
PF: predicated region fallthrough
CT: control target
= control target key end

     0   :  { %s2992_s29 = smov 0   ;;  %s3348_s0 = inlined_call_operand.vmem [shape: f32[8,8,32], index: 0, kind: input, shape index: {}]   ;;  %s3349_s1 = inlined_call_operand.vmem [shape: f32[1,32], index: 1, kind: input, shape index: {}]   ;;  %s3350_s2 = inlined_call_operand.vmem [shape: f32[1,32], index: 2, kind: input, shape index: {}]   ;;  %s3351_s3 = inlined_call_operand.vmem [shape: bf16[32,96], index: 3, kind: input, shape index: {}]   ;;  %s3352_s4 = inlined_call_operand.vmem [shape: f32[1,96], index: 4, kind: input, shape index: {}]   ;;  %s3353_s5 = inlined_call_operand.vmem [shape: f32[2,4,8,8], index: 5, kind: input, shape index: {}]   ;;  %s3354_s6 = inlined_call_operand.vmem [shape: bf16[32,32], index: 6, kind: input, shape index: {}]   ;;  %s3355_s7 = inlined_call_operand.vmem [shape: f32[1,32], index: 7, kind: input, shape index: {}]   ;;  %s3356_s8 = inlined_call_operand.vmem [shape: f32[1,32], index: 8, kind: input, shape index: {}]   ;;  %s3357_s9 = inlined_call_operand.vmem [shape: f32[1,32], index: 9, kind: input, shape index: {}]   ;;  %s3358_s10 = inlined_call_operand.vmem [shape: bf16[32,128], index: 10, kind: input, shape index: {}]   ;;  %s3359_s11 = inlined_call_operand.vmem [shape: f32[1,128], index: 11, kind: input, shape index: {}]   ;;  %s3360_s12 = inlined_call_operand.vmem [shape: bf16[128,32], index: 12, kind: input, shape index: {}]   ;;  %s3361_s13 = inlined_call_operand.vmem [shape: f32[1,32], index: 13, kind: input, shape index: {}]   ;;  %s3362_s14 = inlined_call_operand.vmem [shape: f32[8,8,32], index: 14, kind: output, shape index: {}]  }
   0x1 LB: > { %s2556_s30 = sadd.s32 4294967295, %s2908_s29   ;;  %p2560_p0 = scmp.ge.s32.totalorder %s2908_s29, 1  ;;  %s2908_s29 = sphi %s2992_s29, %s24_s29  }
   0x2   : > { %p413_p1 = scmp.lt.s32.totalorder %s2908_s29, 3 }
   0x4   : > { %p414_p2 = pnand %p2560_p0, %p413_p1 }
   0x5   : > { %s2561_s15 = sshll.u32 (!%p414_p2), %s2556_s30, 2  ;;  %s2912_s17 = smov (!%p414_p2), 96  }
   0x6   : > { %417 = sbr.rel (%p414_p2) target bundleno = 2917 (0xb65), region = 76  ;;  %p460_p3 = scmp.lt.s32.totalorder (!%p414_p2), %s2561_s15, 7 }
   0x7   : > { %s2913_s26 = smov (!%p414_p2), 64   ;;  %s2914_s27 = smov (!%p414_p2), 80  }
   0x8   : > { %s2915_s28 = smov (!%p414_p2), 112   ;;  %s2916_s24 = smov (!%p414_p2), 48  }
   0xb   : > { %s3364_s15 = smov (!%p460_p3, %s2561_s15), 7  ;;  %vm478_vm0 = vcmask 261120   ;;  %v2824_v28 = vld [vmem:[%s3351_s3 + $0x8] sm:$0xff]   ;;  %v2825_v29 = vld [vmem:[%s3351_s3] sm:$0xff]   ;;  %v2910_v62 = vmov 0.0   ;;  %vm2911_vm1 = vmmov 0  }
   0xc   : > { %s2562_s16 = sshll.u32 %s3364_s15, 3  ;;  %2681 = vmatprep.subr.bf16.mxu1 %v2824_v28  ;;  %v2565_v44 = vld [vmem:[%s3349_s1] ss:$0 sm:$0xff]  ;;  %2704 = vmatprep.subr.mxu0 %v2910_v62  ;;  %vm639_vm2 = vcmask 130048   ;;  %vm945_vm3 = vcmask 64512  }
   0xd   : > { %s463_s19 = scalar_lea.vmem %s3348_s0, %s2562_s16  ;;  %2682 = vmatpush3.bf16.msra.mxu1 %v2824_v28  ;;  %v2566_v49 = vld [vmem:[%s3350_s2] ss:$0 sm:$0xff]  ;;  %2706 = vmatprep.mubr.msk.f32.mxu0 %vm2911_vm1, %v2910_v62  ;;  %s469_s20 = scalar_lea.vmem %s3362_s14, %s2562_s16 }
   0xe   : > { %v3008_v0 = vld [vmem:[%s463_s19] sm:$0xff]  ;;  %v3010_v1 = vld [vmem:[%s463_s19 + $0x10] sm:$0xff]  ;;  %v3012_v2 = vld [vmem:[%s463_s19 + $0x8] sm:$0xff]  ;;  %2683 = vmatprep.subr.bf16.mxu1 %v2825_v29 }
   0xf   : > { %v479_v3 = vsel %vm478_vm0, %v3008_v0, 0.0  ;;  %v485_v4 = vsel %vm478_vm0, %v3010_v1, 0.0  ;;  %v3018_v5 = vld [vmem:[%s463_s19 + $0x18] sm:$0xff]  ;;  %v482_v6 = vsel %vm478_vm0, %v3012_v2, 0.0  ;;  %v2567_v63 = vld [vmem:[%s3352_s4] ss:$0 sm:$0xff] }
  0x10   : > { %480 = vadd.xlane.f32.xlu0 %v479_v3  ;;  %486 = vadd.xlane.f32.xlu1 %v485_v4  ;;  %v488_v7 = vsel %vm478_vm0, %v3018_v5, 0.0 }
  0x11   : > { %2684 = vmatpush3.bf16.msra.mxu1 %v2825_v29 }
  0x12   : > { %2689 = vmatprep.subr.mxu1 %v2910_v62 }
  0x14   : > { %483 = vadd.xlane.f32.xlu0 %v482_v6  ;;  %489 = vadd.xlane.f32.xlu1 %v488_v7 }
  0x99   : > { %v481_v8 = vpop.xlane.xlu0 %480  ;;  %v487_v9 = vpop.xlane.xlu1 %486 }
  0x9a   : > { %v492_v10 = vmul.f32 0.03125, %v481_v8  ;;  %v494_v11 = vmul.f32 0.03125, %v487_v9 }
  0x9c   : > { %v496_v12 = vsub.f32 %v3008_v0, %v492_v10  ;;  %v498_v13 = vsub.f32 %v3010_v1, %v494_v11 }
  0x9d   : > { %v484_v14 = vpop.xlane.xlu0 %483  ;;  %v490_v15 = vpop.xlane.xlu1 %489 }
  0x9e   : > { %v493_v16 = vmul.f32 0.03125, %v484_v14  ;;  %v495_v17 = vmul.f32 0.03125, %v490_v15  ;;  %v500_v18 = vmul.f32 %v496_v12, %v496_v12  ;;  %v502_v19 = vmul.f32 %v498_v13, %v498_v13 }
  0xa0   : > { %v497_v20 = vsub.f32 %v3012_v2, %v493_v16  ;;  %v499_v21 = vsub.f32 %v3018_v5, %v495_v17  ;;  %v504_v22 = vsel %vm478_vm0, %v500_v18, 0.0  ;;  %v510_v23 = vsel %vm478_vm0, %v502_v19, 0.0  ;;  %v632_v16 = vld [vmem:[%s3353_s5] sm:$0xff] }
  0xa1   : > { %505 = vadd.xlane.f32.xlu0 %v504_v22 }
  0xa2   : > { %v501_v24 = vmul.f32 %v497_v20, %v497_v20  ;;  %v503_v25 = vmul.f32 %v499_v21, %v499_v21 }
  0xa4   : > { %v507_v26 = vsel %vm478_vm0, %v501_v24, 0.0  ;;  %v513_v27 = vsel %vm478_vm0, %v503_v25, 0.0  ;;  %v634_v25 = vld [vmem:[%s3353_s5 + $0x10] sm:$0xff] }
  0xa5   : > { %511 = vadd.xlane.f32.xlu0 %v510_v23  ;;  %508 = vadd.xlane.f32.xlu1 %v507_v26 }
  0xa9   : > { %514 = vadd.xlane.f32.xlu1 %v513_v27  ;;  %v635_v27 = vld [vmem:[%s3353_s5 + $0x18] sm:$0xff] }
 0x12a   : > { %v506_v30 = vpop.xlane.xlu0 %505 }
 0x12b   : > { %v516_v31 = vmul.f32 0.03125, %v506_v30 }
 0x12d   : > { %v520_v32 = vadd.f32 1e-05, %v516_v31 }
 0x12e   : > { %v509_v33 = vpop.xlane.xlu1 %508  ;;  %v512_v34 = vpop.xlane.xlu0 %511 }
 0x12f   : > { %2838 = vrsqrt.f32 %v520_v32  ;;  %v517_v35 = vmul.f32 0.03125, %v509_v33  ;;  %v518_v36 = vmul.f32 0.03125, %v512_v34 }
 0x131   : > { %v521_v37 = vadd.f32 1e-05, %v517_v35  ;;  %v522_v38 = vadd.f32 1e-05, %v518_v36 }
 0x132   : > { %v515_v39 = vpop.xlane.xlu1 %514 }
 0x133   : > { %2840 = vrsqrt.f32 %v521_v37  ;;  %v519_v40 = vmul.f32 0.03125, %v515_v39 }
 0x134   : > { %2842 = vrsqrt.f32 %v522_v38 }
 0x135   : > { %v523_v41 = vadd.f32 1e-05, %v519_v40 }
 0x137   : > { %2844 = vrsqrt.f32 %v523_v41 }
 0x13c   : > { %v2839_v42 = vpop.eup %2838 }
 0x13d   : > { %v528_v43 = vmul.f32 %v2839_v42, %v496_v12 }
 0x13f   : > { %v538_v48 = vmul.f32 %v2565_v44, %v528_v43 }
 0x140   : > { %v2841_v45 = vpop.eup %2840 }
 0x141   : > { %v2843_v46 = vpop.eup %2842  ;;  %v529_v47 = vmul.f32 %v2841_v45, %v497_v20  ;;  %v548_v53 = vadd.f32 %v2566_v49, %v538_v48  ;;  %v633_v20 = vld [vmem:[%s3353_s5 + $0x8] sm:$0xff] }
 0x142   : > { %v530_v50 = vmul.f32 %v2843_v46, %v498_v13 }
 0x143   : > { %v539_v51 = vmul.f32 %v2565_v44, %v529_v47 }
 0x144   : > { %v2845_v52 = vpop.eup %2844  ;;  %v540_v56 = vmul.f32 %v2565_v44, %v530_v50 }
 0x145   : > { %v549_v54 = vadd.f32 %v2566_v49, %v539_v51  ;;  %v531_v55 = vmul.f32 %v2845_v52, %v499_v21 }
 0x146   : > { %v550_v59 = vadd.f32 %v2566_v49, %v540_v56 }
 0x147   : > { %v552_v57 = vpack.c.bf16 %v549_v54, %v548_v53  ;;  %v541_v58 = vmul.f32 %v2565_v44, %v531_v55 }
 0x149   : > { %2685 = vmatprep.mubr.msk.bf16.mxu1 %vm478_vm0, %v552_v57  ;;  %v551_v60 = vadd.f32 %v2566_v49, %v541_v58 }
 0x14b   : > { %v553_v61 = vpack.c.bf16 %v551_v60, %v550_v59 }
 0x14d   : > { %2686 = vmatmul.mubr.msk.bf16.vlgmr.msra.gmra.mxu1 %vm478_vm0, %v553_v61 }
 0x14e   : > { %2691 = vmatprep.mubr.msk.f32.mxu1 %vm2911_vm1, %v2910_v62 }
 0x20d   : > { %v2687_v3 = vpop.f32.mrf.mxu1 }
 0x20e   : > { %v3055_v4 = vadd.f32 %v2687_v3, %v2567_v63 }
 0x20f   : > { %v617_v6 = vpop.f32.mrf.mxu1 }
 0x210   : > { %v3057_v7 = vadd.f32 %v2567_v63, %v617_v6  ;;  %792 = vrot.lane.b32.xlu1 %v3055_v4, %s2912_s17 }
 0x211   : > { %v2688_v8 = vpop.f32.mrf.mxu1 }
 0x212   : > { %637 = vrot.lane.b32.xlu0 %v3057_v7, %s2912_s17  ;;  %v3064_v11 = vadd.f32 %v2688_v8, %v2567_v63 }
 0x213   : > { %v620_v9 = vpop.f32.mrf.mxu1 }
 0x214   : > { %v3061_v10 = vadd.f32 %v2567_v63, %v620_v9 }
 0x216   : > { %715 = vrot.lane.b32.xlu1 %v3061_v10, %s2912_s17 }
 0x21a   : > { %869 = vrot.lane.b32.xlu1 %v3064_v11, %s2912_s17 }
 0x282   : > { %v793_v12 = vpop.permute.xlu1 %792 }
 0x284   : > { %v638_v13 = vpop.permute.xlu0 %637 }
 0x285   : > { %2690 = vmatpush3.xpose.msk.msra.mxu1 %vm639_vm2, %v638_v13 }
 0x286   : > { %2694 = vmatprep.subr.mxu1 %v2910_v62 }
 0x288   : > { %v716_v14 = vpop.permute.xlu1 %715  ;;  %2692 = vmatmul.mubr.msk.f32.vlgmr.msra.gmra.mxu1 %vm639_vm2, %v3057_v7 }
 0x289   : > { %2695 = vmatpush3.xpose.msk.msra.mxu1 %vm639_vm2, %v716_v14  ;;  %2696 = vmatprep.mubr.msk.f32.mxu1 %vm2911_vm1, %v2910_v62 }
 0x28a   : > { %2699 = vmatprep.subr.mxu1 %v2910_v62 }
 0x28c   : > { %v870_v15 = vpop.permute.xlu1 %869  ;;  %2697 = vmatmul.mubr.msk.f32.vlgmr.msra.gmra.mxu1 %vm639_vm2, %v3061_v10 }
 0x28d   : > { %2700 = vmatpush3.xpose.msk.msra.mxu1 %vm639_vm2, %v793_v12  ;;  %2705 = vmatpush3.xpose.msk.msra.mxu0 %vm639_vm2, %v870_v15 }
 0x28e   : > { %2701 = vmatprep.mubr.msk.f32.mxu1 %vm2911_vm1, %v2910_v62  ;;  %2714 = vmatprep.subr.mxu0 %v2910_v62 }
 0x28f   : > { %2709 = vmatprep.subr.mxu1 %v2910_v62 }
 0x290   : > { %2702 = vmatmul.mubr.msk.f32.vlgmr.msra.gmra.mxu1 %vm639_vm2, %v3055_v4  ;;  %2707 = vmatmul.mubr.msk.f32.vlgmr.msra.gmra.mxu0 %vm639_vm2, %v3064_v11 }
 0x291   : > { %2711 = vmatprep.mubr.msk.f32.mxu1 %vm2911_vm1, %v2910_v62  ;;  %2716 = vmatprep.mubr.msk.f32.mxu0 %vm2911_vm1, %v2910_v62 }
 0x348   : > { %v710_v17 = vpop.f32.mrf.mxu1 }
 0x349   : > { %v711_v18 = vadd.f32 %v710_v17, %v632_v16 }
 0x34a   : > { %v2693_v19 = vpop.f32.mrf.mxu1 }
 0x34b   : > { %v946_v21 = vsel %vm945_vm3, %v711_v18, -inf }
 0x34c   : > { %947 = vmax.xlane.f32.xlu0 %v946_v21  ;;  %v787_v22 = vpop.f32.mrf.mxu1 }
 0x34d   : > { %v788_v23 = vadd.f32 %v787_v22, %v633_v20 }
 0x34e   : > { %v2698_v24 = vpop.f32.mrf.mxu1 }
 0x34f   : > { %v949_v26 = vsel %vm945_vm3, %v788_v23, -inf }
 0x350   : > { %v941_v28 = vpop.f32.mrf.mxu0  ;;  %950 = vmax.xlane.f32.xlu1 %v949_v26  ;;  %v864_v29 = vpop.f32.mrf.mxu1 }
 0x351   : > { %v865_v30 = vadd.f32 %v864_v29, %v634_v25  ;;  %v942_v33 = vadd.f32 %v941_v28, %v635_v27  ;;  %v2584_v29 = vld [vmem:[%s3353_s5 + $0x20] sm:$0xff] }
 0x352   : > { %v2703_v31 = vpop.f32.mrf.mxu1  ;;  %v2708_v32 = vpop.f32.mrf.mxu0 }
 0x353   : > { %v952_v34 = vsel %vm945_vm3, %v865_v30, -inf  ;;  %v955_v35 = vsel %vm945_vm3, %v942_v33, -inf }
 0x354   : > { %953 = vmax.xlane.f32.xlu0 %v952_v34 }
 0x358   : > { %956 = vmax.xlane.f32.xlu0 %v955_v35 }
 0x361   : > { %1066 = vrot.lane.b32.xlu1 %v3061_v10, %s2913_s26 }
 0x365   : > { %1142 = vrot.lane.b32.xlu1 %v3055_v4, %s2913_s26 }
 0x369   : > { %1218 = vrot.lane.b32.xlu1 %v3064_v11, %s2913_s26 }
 0x36d   : > { %1383 = vrot.lane.b32.xlu1 %v3061_v10, %s2914_s27 }
 0x36e   : > { %990 = vrot.lane.b32.xlu0 %v3057_v7, %s2913_s26 }
 0x372   : > { %1305 = vrot.lane.b32.xlu0 %v3057_v7, %s2914_s27 }
 0x3d5   : > { %v948_v36 = vpop.xlane.xlu0 %947 }
 0x3d6   : > { %v958_v37 = vsub.f32 %v711_v18, %v948_v36 }
 0x3d8   : > { %v962_v38 = vmul.f32 1.442695, %v958_v37 }
 0x3d9   : > { %v951_v39 = vpop.xlane.xlu1 %950 }
 0x3da   : > { %2846 = vpow2.f32 %v962_v38  ;;  %v959_v43 = vsub.f32 %v788_v23, %v951_v39 }
 0x3dc   : > { %v964_v47 = vmul.f32 1.442695, %v959_v43 }
 0x3dd   : > { %v1067_v40 = vpop.permute.xlu1 %1066  ;;  %v954_v41 = vpop.xlane.xlu0 %953 }
 0x3de   : > { %v960_v42 = vsub.f32 %v865_v30, %v954_v41  ;;  %2715 = vmatpush3.msra.mxu0 %v1067_v40 }
 0x3df   : > { %2724 = vmatprep.subr.mxu0 %v2910_v62 }
 0x3e0   : > { %v966_v44 = vmul.f32 1.442695, %v960_v42 }
 0x3e1   : > { %v957_v45 = vpop.xlane.xlu0 %956  ;;  %v1143_v58 = vpop.permute.xlu1 %1142 }
 0x3e2   : > { %2848 = vpow2.f32 %v966_v44  ;;  %v961_v46 = vsub.f32 %v942_v33, %v957_v45  ;;  %v2586_v33 = vld [vmem:[%s3353_s5 + $0x30] sm:$0xff]  ;;  %v2585_v45 = vld [vmem:[%s3353_s5 + $0x28] sm:$0xff] }
 0x3e4   : > { %v968_v48 = vmul.f32 1.442695, %v961_v46 }
 0x3e5   : > { %v991_v49 = vpop.permute.xlu0 %990  ;;  %v1219_v61 = vpop.permute.xlu1 %1218 }
 0x3e6   : > { %2850 = vpow2.f32 %v968_v48  ;;  %2710 = vmatpush3.msra.mxu1 %v991_v49  ;;  %v2587_v49 = vld [vmem:[%s3353_s5 + $0x38] sm:$0xff] }
 0x3e7   : > { %v2847_v50 = vpop.eup %2846  ;;  %2719 = vmatprep.subr.mxu1 %v2910_v62  ;;  %2852 = vpow2.f32 %v964_v47 }
 0x3e8   : > { %v970_v51 = vsel %vm945_vm3, %v2847_v50, 0.0 }
 0x3e9   : > { %971 = vadd.xlane.f32.xlu0 %v970_v51  ;;  %v1306_v59 = vpop.permute.xlu0 %1305  ;;  %v1384_v63 = vpop.permute.xlu1 %1383 }
 0x3ef   : > { %v2849_v52 = vpop.eup %2848 }
 0x3f0   : > { %v976_v53 = vsel %vm945_vm3, %v2849_v52, 0.0 }
 0x3f1   : > { %977 = vadd.xlane.f32.xlu0 %v976_v53 }
 0x3f3   : > { %v2851_v54 = vpop.eup %2850 }
 0x3f4   : > { %v979_v55 = vsel %vm945_vm3, %v2851_v54, 0.0  ;;  %v2853_v56 = vpop.eup %2852 }
 0x3f5   : > { %980 = vadd.xlane.f32.xlu1 %v979_v55  ;;  %v973_v57 = vsel %vm945_vm3, %v2853_v56, 0.0 }
 0x3f9   : > { %974 = vadd.xlane.f32.xlu1 %v973_v57 }
 0x407   : > { %1303 = vrot.lane.b32.xlu0 %v3057_v7, %s2915_s28 }
 0x40a   : > { %1381 = vrot.lane.b32.xlu1 %v3061_v10, %s2915_s28 }
 0x40b   : > { %1461 = vrot.lane.b32.xlu0 %v3055_v4, %s2914_s27 }
 0x40e   : > { %1539 = vrot.lane.b32.xlu1 %v3064_v11, %s2914_s27 }
 0x40f   : > { %1459 = vrot.lane.b32.xlu0 %v3055_v4, %s2915_s28 }
 0x412   : > { %1537 = vrot.lane.b32.xlu1 %v3064_v11, %s2915_s28 }
 0x472   : > { %v972_v60 = vpop.xlane.xlu0 %971 }
 0x473   : > { %2854 = vrcp.f32 %v972_v60 }
 0x47a   : > { %v978_v3 = vpop.xlane.xlu0 %977 }
 0x47b   : > { %2856 = vrcp.f32 %v978_v3 }
 0x47e   : > { %v981_v6 = vpop.xlane.xlu1 %980  ;;  %v1304_v13 = vpop.permute.xlu0 %1303 }
 0x480   : > { %v2855_v8 = vpop.eup %2854 }
 0x481   : > { %v986_v9 = vmul.f32 %v2855_v8, %v2847_v50 }
 0x482   : > { %v975_v12 = vpop.xlane.xlu1 %974  ;;  %v1462_v16 = vpop.permute.xlu0 %1461 }
 0x483   : > { %2858 = vrcp.f32 %v975_v12  ;;  %2712 = vmatmul.mubr.msk.f32.vlgmr.msra.gmra.mxu1 %vm945_vm3, %v986_v9 }
 0x484   : > { %2720 = vmatpush3.msra.mxu1 %v1143_v58  ;;  %2721 = vmatprep.mubr.msk.f32.mxu1 %vm2911_vm1, %v2910_v62  ;;  %2860 = vrcp.f32 %v981_v6 }
 0x485   : > { %2729 = vmatprep.subr.mxu1 %v2910_v62 }
 0x486   : > { %v1382_v20 = vpop.permute.xlu1 %1381  ;;  %v1460_v21 = vpop.permute.xlu0 %1459 }
 0x488   : > { %v2857_v14 = vpop.eup %2856 }
 0x489   : > { %v988_v15 = vmul.f32 %v2857_v14, %v2849_v52 }
 0x48a   : > { %v1540_v23 = vpop.permute.xlu1 %1539 }
 0x48b   : > { %2722 = vmatmul.mubr.msk.f32.vlgmr.msra.gmra.mxu1 %vm945_vm3, %v988_v15 }
 0x48c   : > { %2730 = vmatpush3.xpose.msk.msra.mxu1 %vm639_vm2, %v1306_v59  ;;  %2731 = vmatprep.mubr.msk.f32.mxu1 %vm2911_vm1, %v2910_v62 }
 0x48d   : > { %2739 = vmatprep.subr.mxu1 %v2910_v62 }
 0x48e   : > { %v1538_v24 = vpop.permute.xlu1 %1537 }
 0x48f   : > { %2732 = vmatmul.mubr.msk.f32.vlgmr.msra.gmra.mxu1 %vm639_vm2, %v1304_v13 }
 0x490   : > { %v2859_v17 = vpop.eup %2858  ;;  %2740 = vmatpush3.xpose.msk.msra.mxu1 %vm639_vm2, %v1462_v16  ;;  %2741 = vmatprep.mubr.msk.f32.mxu1 %vm2911_vm1, %v2910_v62 }
 0x491   : > { %v987_v18 = vmul.f32 %v2859_v17, %v2853_v56  ;;  %2749 = vmatprep.subr.mxu1 %v2910_v62  ;;  %v2861_v19 = vpop.eup %2860 }
 0x492   : > { %v989_v22 = vmul.f32 %v2861_v19, %v2851_v54 }
 0x493   : > { %2717 = vmatmul.mubr.msk.f32.vlgmr.msra.gmra.mxu0 %vm945_vm3, %v987_v18  ;;  %2742 = vmatmul.mubr.msk.f32.vlgmr.msra.gmra.mxu1 %vm639_vm2, %v1460_v21 }
 0x494   : > { %2725 = vmatpush3.msra.mxu0 %v1219_v61  ;;  %2726 = vmatprep.mubr.msk.f32.mxu0 %vm2911_vm1, %v2910_v62 }
 0x495   : > { %2734 = vmatprep.subr.mxu0 %v2910_v62  ;;  %2751 = vmatprep.mubr.msk.f32.mxu1 %vm2911_vm1, %v2910_v62 }
 0x497   : > { %2727 = vmatmul.mubr.msk.f32.vlgmr.msra.gmra.mxu0 %vm945_vm3, %v989_v22 }
 0x498   : > { %2735 = vmatpush3.xpose.msk.msra.mxu0 %vm639_vm2, %v1384_v63  ;;  %2736 = vmatprep.mubr.msk.f32.mxu0 %vm2911_vm1, %v2910_v62 }
 0x499   : > { %2744 = vmatprep.subr.mxu0 %v2910_v62 }
 0x49b   : > { %2737 = vmatmul.mubr.msk.f32.vlgmr.msra.gmra.mxu0 %vm639_vm2, %v1382_v20 }
 0x49c   : > { %2745 = vmatpush3.xpose.msk.msra.mxu0 %vm639_vm2, %v1540_v23  ;;  %2746 = vmatprep.mubr.msk.f32.mxu0 %vm2911_vm1, %v2910_v62 }
 0x49d   : > { %2754 = vmatprep.subr.mxu0 %v2910_v62 }
 0x49f   : > { %2747 = vmatmul.mubr.msk.f32.vlgmr.msra.gmra.mxu0 %vm639_vm2, %v1538_v24 }
 0x4a0   : > { %2756 = vmatprep.mubr.msk.f32.mxu0 %vm2911_vm1, %v2910_v62 }
 0x543   : > { %v3163_v25 = vpop.f32.mrf.mxu1 }
 0x545   : > { %v2713_v26 = vpop.f32.mrf.mxu1 }
 0x54b   : > { %v3165_v27 = vpop.f32.mrf.mxu1 }
 0x54d   : > { %v2723_v28 = vpop.f32.mrf.mxu1 }
 0x54f   : > { %v1377_v30 = vpop.f32.mrf.mxu1 }
 0x550   : > { %v1378_v31 = vadd.f32 %v2584_v29, %v1377_v30 }
 0x551   : > { %v2733_v32 = vpop.f32.mrf.mxu1 }
 0x552   : > { %v1615_v34 = vsel %vm945_vm3, %v1378_v31, -inf }
 0x553   : > { %v3174_v35 = vpop.f32.mrf.mxu0  ;;  %1616 = vmax.xlane.f32.xlu0 %v1615_v34  ;;  %v1533_v36 = vpop.f32.mrf.mxu1 }
 0x554   : > { %v1294_v37 = vpack.c.bf16 %v3174_v35, %v3163_v25  ;;  %v1534_v38 = vadd.f32 %v2586_v33, %v1533_v36 }
 0x555   : > { %v2718_v39 = vpop.f32.mrf.mxu0  ;;  %v2743_v40 = vpop.f32.mrf.mxu1 }
 0x556   : > { %v1621_v41 = vsel %vm945_vm3, %v1534_v38, -inf }
 0x557   : > { %v3179_v42 = vpop.f32.mrf.mxu0  ;;  %1622 = vmax.xlane.f32.xlu0 %v1621_v41 }
 0x558   : > { %v1295_v43 = vpack.c.bf16 %v3179_v42, %v3165_v27 }
 0x559   : > { %v2728_v44 = vpop.f32.mrf.mxu0 }
 0x55b   : > { %v1455_v46 = vpop.f32.mrf.mxu0 }
 0x55c   : > { %v1456_v47 = vadd.f32 %v2585_v45, %v1455_v46 }
 0x55d   : > { %v2738_v48 = vpop.f32.mrf.mxu0 }
 0x55e   : > { %v1618_v50 = vsel %vm945_vm3, %v1456_v47, -inf }
 0x55f   : > { %1619 = vmax.xlane.f32.xlu1 %v1618_v50  ;;  %v1611_v51 = vpop.f32.mrf.mxu0 }
 0x560   : > { %v1612_v52 = vadd.f32 %v2587_v49, %v1611_v51 }
 0x561   : > { %v2748_v53 = vpop.f32.mrf.mxu0 }
 0x562   : > { %v1624_v54 = vsel %vm945_vm3, %v1612_v52, -inf }
 0x563   : > { %1625 = vmax.xlane.f32.xlu0 %v1624_v54 }
 0x5dc   : > { %v1617_v55 = vpop.xlane.xlu0 %1616 }
 0x5dd   : > { %v1627_v56 = vsub.f32 %v1378_v31, %v1617_v55  ;;  %v2826_v31 = vld [vmem:[%s3354_s6] sm:$0xff]  }
 0x5de   : > { %v2606_v55 = vld [vmem:[%s3355_s7] ss:$0 sm:$0xff] }
 0x5df   : > { %v1631_v57 = vmul.f32 1.442695, %v1627_v56 }
 0x5e0   : > { %v1623_v58 = vpop.xlane.xlu0 %1622 }
 0x5e1   : > { %2862 = vpow2.f32 %v1631_v57  ;;  %v1629_v59 = vsub.f32 %v1534_v38, %v1623_v58 }
 0x5e3   : > { %v1635_v60 = vmul.f32 1.442695, %v1629_v59 }
 0x5e5   : > { %2864 = vpow2.f32 %v1635_v60 }
 0x5e8   : > { %v1620_v61 = vpop.xlane.xlu1 %1619 }
 0x5e9   : > { %v1628_v63 = vsub.f32 %v1456_v47, %v1620_v61 }
 0x5eb   : > { %v1633_v3 = vmul.f32 1.442695, %v1628_v63 }
 0x5ec   : > { %v1626_v15 = vpop.xlane.xlu0 %1625 }
 0x5ed   : > { %2866 = vpow2.f32 %v1633_v3  ;;  %v1630_v16 = vsub.f32 %v1612_v52, %v1626_v15 }
 0x5ee   : > { %v2863_v6 = vpop.eup %2862 }
 0x5ef   : > { %v1639_v8 = vsel %vm945_vm3, %v2863_v6, 0.0  ;;  %v1637_v17 = vmul.f32 1.442695, %v1630_v16 }
 0x5f0   : > { %1640 = vadd.xlane.f32.xlu0 %v1639_v8 }
 0x5f1   : > { %2868 = vpow2.f32 %v1637_v17 }
 0x5f2   : > { %v2865_v9 = vpop.eup %2864 }
 0x5f3   : > { %v1645_v12 = vsel %vm945_vm3, %v2865_v9, 0.0 }
 0x5f4   : > { %1646 = vadd.xlane.f32.xlu0 %v1645_v12 }
 0x5fa   : > { %v2867_v13 = vpop.eup %2866 }
 0x5fb   : > { %v1642_v14 = vsel %vm945_vm3, %v2867_v13, 0.0 }
 0x5fc   : > { %1643 = vadd.xlane.f32.xlu1 %v1642_v14 }
 0x5fe   : > { %v2869_v18 = vpop.eup %2868 }
 0x5ff   : > { %v1648_v19 = vsel %vm945_vm3, %v2869_v18, 0.0 }
 0x60a   : > { %1659 = vrot.lane.b32.xlu0 %v3057_v7, %s2916_s24 }
 0x60d   : > { %1735 = vrot.lane.b32.xlu1 %v3061_v10, %s2916_s24 }
 0x611   : > { %1811 = vrot.lane.b32.xlu1 %v3055_v4, %s2916_s24 }
 0x635   : > { %1649 = vadd.xlane.f32.xlu1 %v1648_v19 }
 0x646   : > { %1887 = vrot.lane.b32.xlu1 %v3064_v11, %s2916_s24 }
 0x679   : > { %v1641_v20 = vpop.xlane.xlu0 %1640 }
 0x67a   : > { %2870 = vrcp.f32 %v1641_v20 }
 0x67d   : > { %v1647_v21 = vpop.xlane.xlu0 %1646 }
 0x67e   : > { %2872 = vrcp.f32 %v1647_v21 }
 0x681   : > { %v1660_v22 = vpop.permute.xlu0 %1659 }
 0x682   : > { %2750 = vmatpush3.msra.mxu1 %v1660_v22 }
 0x683   : > { %2759 = vmatprep.subr.mxu1 %v2910_v62 }
 0x685   : > { %v1644_v7 = vpop.xlane.xlu1 %1643 }
 0x686   : > { %2874 = vrcp.f32 %v1644_v7 }
 0x687   : > { %v2871_v4 = vpop.eup %2870 }
 0x688   : > { %v1655_v10 = vmul.f32 %v2871_v4, %v2863_v6 }
 0x689   : > { %v1736_v23 = vpop.permute.xlu1 %1735 }
 0x68a   : > { %2752 = vmatmul.mubr.msk.f32.vlgmr.msra.gmra.mxu1 %vm945_vm3, %v1655_v10  ;;  %2755 = vmatpush3.msra.mxu0 %v1736_v23 }
 0x68b   : > { %v2873_v24 = vpop.eup %2872  ;;  %2761 = vmatprep.mubr.msk.f32.mxu1 %vm2911_vm1, %v2910_v62  ;;  %2764 = vmatprep.subr.mxu0 %v2910_v62 }
 0x68c   : > { %v1657_v11 = vmul.f32 %v2873_v24, %v2865_v9 }
 0x68d   : > { %v1812_v26 = vpop.permute.xlu1 %1811 }
 0x68e   : > { %2760 = vmatpush3.msra.mxu1 %v1812_v26  ;;  %v2828_v26 = vld [vmem:[%s3358_s10 + $0x8] sm:$0xff]  }
 0x68f   : > { %2762 = vmatmul.mubr.msk.f32.vlgmr.msra.gmra.mxu1 %vm945_vm3, %v1657_v11 }
 0x693   : > { %v2875_v28 = vpop.eup %2874 }
 0x694   : > { %v1656_v29 = vmul.f32 %v2875_v28, %v2867_v13  ;;  %v2829_v28 = vld [vmem:[%s3358_s10] sm:$0xff]  }
 0x696   : > { %2757 = vmatmul.mubr.msk.f32.vlgmr.msra.gmra.mxu0 %vm945_vm3, %v1656_v29 }
 0x697   : > { %2766 = vmatprep.mubr.msk.f32.mxu0 %vm2911_vm1, %v2910_v62  ;;  %v2827_v62 = vld [vmem:[%s3354_s6 + $0x8] sm:$0xff]  }
 0x698   : > { %2769 = vmatprep.subr.bf16.mxu1 %v2827_v62 }
 0x699   : > { %2770 = vmatpush3.bf16.msra.mxu1 %v2827_v62 }
 0x69a   : > { %2781 = vmatprep.subr.bf16.mxu1 %v2828_v26 }
 0x6be   : > { %v1650_v30 = vpop.xlane.xlu1 %1649 }
 0x6bf   : > { %2876 = vrcp.f32 %v1650_v30 }
 0x6c2   : > { %v1888_v32 = vpop.permute.xlu1 %1887 }
 0x6c3   : > { %2765 = vmatpush3.msra.mxu0 %v1888_v32 }
 0x6c4   : > { %2775 = vmatprep.subr.bf16.mxu0 %v2826_v31 }
 0x6cc   : > { %v2877_v33 = vpop.eup %2876 }
 0x6cd   : > { %v1658_v34 = vmul.f32 %v2877_v33, %v2869_v18 }
 0x6cf   : > { %2767 = vmatmul.mubr.msk.f32.vlgmr.msra.gmra.mxu0 %vm945_vm3, %v1658_v34 }
 0x6d0   : > { %2776 = vmatpush3.bf16.msra.mxu0 %v2826_v31  ;;  %2777 = vmatprep.mubr.msk.bf16.mxu0 %vm639_vm2, %v1294_v37 }
 0x6d3   : > { %2778 = vmatmul.mubr.msk.bf16.vlgmr.msra.gmra.mxu0 %vm639_vm2, %v1295_v43 }
 0x74a   : > { %v1731_v36 = vpop.f32.mrf.mxu1 }
 0x74c   : > { %v2753_v38 = vpop.f32.mrf.mxu1 }
 0x74f   : > { %v1883_v39 = vpop.f32.mrf.mxu1 }
 0x751   : > { %v2763_v40 = vpop.f32.mrf.mxu1 }
 0x756   : > { %v1807_v41 = vpop.f32.mrf.mxu0 }
 0x757   : > { %v1963_v44 = vpack.c.bf16 %v1807_v41, %v1731_v36 }
 0x758   : > { %v2758_v25 = vpop.f32.mrf.mxu0 }
 0x759   : > { %2771 = vmatprep.mubr.msk.bf16.mxu1 %vm639_vm2, %v1963_v44 }
 0x78f   : > { %v1959_v35 = vpop.f32.mrf.mxu0 }
 0x790   : > { %v1964_v37 = vpack.c.bf16 %v1959_v35, %v1883_v39  ;;  %v2607_v35 = vld [vmem:[%s3356_s8] ss:$0 sm:$0xff] }
 0x791   : > { %v2768_v27 = vpop.f32.mrf.mxu0 }
 0x792   : > { %2772 = vmatmul.mubr.msk.bf16.vlgmr.msra.gmra.mxu1 %vm639_vm2, %v1964_v37 }
 0x793   : > { %v2779_v42 = vpop.f32.mrf.mxu0  ;;  %2782 = vmatpush3.bf16.msra.mxu1 %v2828_v26 }
 0x794   : > { %2783 = vmatprep.subr.bf16.mxu1 %v2829_v28 }
 0x795   : > { %v2074_v43 = vpop.f32.mrf.mxu0 }
 0x797   : > { %v2780_v47 = vpop.f32.mrf.mxu0  ;;  %2784 = vmatpush3.bf16.msra.mxu1 %v2829_v28 }
 0x799   : > { %v2077_v54 = vpop.f32.mrf.mxu0 }
 0x852   : > { %v2773_v45 = vpop.f32.mrf.mxu1 }
 0x853   : > { %v2083_v46 = vadd.f32 %v2779_v42, %v2773_v45 }
 0x854   : > { %v2013_v48 = vpop.f32.mrf.mxu1 }
 0x855   : > { %v2075_v49 = vadd.f32 %v2074_v43, %v2013_v48  ;;  %v2091_v51 = vadd.f32 %v2083_v46, %v3010_v1  ;;  %v2608_v46 = vld [vmem:[%s3357_s9] ss:$0 sm:$0xff] }
 0x856   : > { %v2774_v50 = vpop.f32.mrf.mxu1 }
 0x857   : > { %v2089_v52 = vadd.f32 %v2075_v49, %v3008_v0  ;;  %v2086_v53 = vadd.f32 %v2780_v47, %v2774_v50  ;;  %v3232_v59 = vadd.f32 %v2606_v55, %v2091_v51 }
 0x858   : > { %v2016_v56 = vpop.f32.mrf.mxu1 }
 0x859   : > { %v3230_v57 = vadd.f32 %v2606_v55, %v2089_v52  ;;  %v2078_v58 = vadd.f32 %v2077_v54, %v2016_v56  ;;  %v2092_v60 = vadd.f32 %v2086_v53, %v3018_v5  ;;  %v2112_v3 = vsel %vm478_vm0, %v3232_v59, 0.0 }
 0x85b   : > { %v2090_v61 = vadd.f32 %v2078_v58, %v3012_v2  ;;  %v2106_v1 = vsel %vm478_vm0, %v3230_v57, 0.0  ;;  %v3240_v63 = vadd.f32 %v2606_v55, %v2092_v60  ;;  %v2830_v60 = vld [vmem:[%s3360_s12 + $0x38] sm:$0xff]  }
 0x85c   : > { %2107 = vadd.xlane.f32.xlu0 %v2106_v1  ;;  %2789 = vmatprep.subr.bf16.mxu0 %v2830_v60  ;;  %v2832_v1 = vld [vmem:[%s3360_s12 + $0x28] sm:$0xff]  }
 0x85d   : > { %v3238_v0 = vadd.f32 %v2606_v55, %v2090_v61  ;;  %v2115_v5 = vsel %vm478_vm0, %v3240_v63, 0.0  ;;  %2790 = vmatpush3.bf16.msra.mxu0 %v2830_v60  ;;  %v2831_v61 = vld [vmem:[%s3360_s12 + $0x30] sm:$0xff]  }
 0x85e   : > { %2791 = vmatprep.subr.bf16.mxu0 %v2831_v61 }
 0x85f   : > { %v2109_v6 = vsel %vm478_vm0, %v3238_v0, 0.0 }
 0x860   : > { %2113 = vadd.xlane.f32.xlu0 %v2112_v3  ;;  %2110 = vadd.xlane.f32.xlu1 %v2109_v6  ;;  %v2833_v3 = vld [vmem:[%s3360_s12 + $0x20] sm:$0xff]   ;;  %v2834_v6 = vld [vmem:[%s3360_s12 + $0x18] sm:$0xff]  }
 0x861   : > { %2792 = vmatpush3.bf16.msra.mxu0 %v2831_v61 }
 0x862   : > { %2793 = vmatprep.subr.bf16.mxu0 %v2832_v1 }
 0x864   : > { %2116 = vadd.xlane.f32.xlu0 %v2115_v5  ;;  %v2835_v5 = vld [vmem:[%s3360_s12 + $0x10] sm:$0xff]  }
 0x865   : > { %2794 = vmatpush3.bf16.msra.mxu0 %v2832_v1 }
 0x866   : > { %2795 = vmatprep.subr.bf16.mxu0 %v2833_v3 }
 0x869   : > { %2796 = vmatpush3.bf16.msra.mxu0 %v2833_v3 }
 0x86a   : > { %2797 = vmatprep.subr.bf16.mxu0 %v2834_v6 }
 0x86d   : > { %2798 = vmatpush3.bf16.msra.mxu0 %v2834_v6 }
 0x86e   : > { %2799 = vmatprep.subr.bf16.mxu0 %v2835_v5 }
 0x871   : > { %2800 = vmatpush3.bf16.msra.mxu0 %v2835_v5 }
 0x8e5   : > { %v2108_v2 = vpop.xlane.xlu0 %2107 }
 0x8e6   : > { %v2118_v8 = vmul.f32 0.03125, %v2108_v2  ;;  %v2836_v2 = vld [vmem:[%s3360_s12 + $0x8] sm:$0xff]  }
 0x8e7   : > { %2801 = vmatprep.subr.bf16.mxu0 %v2836_v2 }
 0x8e8   : > { %v2122_v9 = vsub.f32 %v3230_v57, %v2118_v8  ;;  %2802 = vmatpush3.bf16.msra.mxu0 %v2836_v2  ;;  %v2837_v8 = vld [vmem:[%s3360_s12] sm:$0xff]  }
 0x8e9   : > { %v2114_v12 = vpop.xlane.xlu0 %2113  ;;  %v2111_v13 = vpop.xlane.xlu1 %2110  ;;  %2803 = vmatprep.subr.bf16.mxu0 %v2837_v8 }
 0x8ea   : > { %v2120_v14 = vmul.f32 0.03125, %v2114_v12  ;;  %v2119_v15 = vmul.f32 0.03125, %v2111_v13  ;;  %v2126_v16 = vmul.f32 %v2122_v9, %v2122_v9 }
 0x8ec   : > { %v2124_v17 = vsub.f32 %v3232_v59, %v2120_v14  ;;  %v2123_v18 = vsub.f32 %v3238_v0, %v2119_v15  ;;  %v2130_v19 = vsel %vm478_vm0, %v2126_v16, 0.0  ;;  %2804 = vmatpush3.bf16.msra.mxu0 %v2837_v8 }
 0x8ed   : > { %2131 = vadd.xlane.f32.xlu0 %v2130_v19  ;;  %v2117_v20 = vpop.xlane.xlu0 %2116 }
 0x8ee   : > { %v2121_v21 = vmul.f32 0.03125, %v2117_v20  ;;  %v2128_v22 = vmul.f32 %v2124_v17, %v2124_v17  ;;  %v2127_v7 = vmul.f32 %v2123_v18, %v2123_v18 }
 0x8f0   : > { %v2125_v4 = vsub.f32 %v3240_v63, %v2121_v21  ;;  %v2136_v10 = vsel %vm478_vm0, %v2128_v22, 0.0  ;;  %v2133_v23 = vsel %vm478_vm0, %v2127_v7, 0.0 }
 0x8f1   : > { %2137 = vadd.xlane.f32.xlu0 %v2136_v10  ;;  %2134 = vadd.xlane.f32.xlu1 %v2133_v23 }
 0x8f2   : > { %v2129_v24 = vmul.f32 %v2125_v4, %v2125_v4 }
 0x8f4   : > { %v2139_v11 = vsel %vm478_vm0, %v2129_v24, 0.0 }
 0x8f5   : > { %2140 = vadd.xlane.f32.xlu1 %v2139_v11 }
 0x976   : > { %v2132_v29 = vpop.xlane.xlu0 %2131 }
 0x977   : > { %v2142_v30 = vmul.f32 0.03125, %v2132_v29 }
 0x979   : > { %v2146_v31 = vadd.f32 1e-05, %v2142_v30 }
 0x97a   : > { %v2138_v32 = vpop.xlane.xlu0 %2137  ;;  %v2135_v33 = vpop.xlane.xlu1 %2134 }
 0x97b   : > { %2878 = vrsqrt.f32 %v2146_v31  ;;  %v2144_v34 = vmul.f32 0.03125, %v2138_v32  ;;  %v2143_v62 = vmul.f32 0.03125, %v2135_v33 }
 0x97d   : > { %v2148_v36 = vadd.f32 1e-05, %v2144_v34  ;;  %v2147_v38 = vadd.f32 1e-05, %v2143_v62 }
 0x97e   : > { %v2141_v39 = vpop.xlane.xlu1 %2140 }
 0x97f   : > { %2880 = vrsqrt.f32 %v2148_v36  ;;  %v2145_v40 = vmul.f32 0.03125, %v2141_v39 }
 0x980   : > { %2882 = vrsqrt.f32 %v2147_v38 }
 0x981   : > { %v2149_v41 = vadd.f32 1e-05, %v2145_v40 }
 0x983   : > { %2884 = vrsqrt.f32 %v2149_v41 }
 0x988   : > { %v2879_v44 = vpop.eup %2878 }
 0x989   : > { %v2154_v25 = vmul.f32 %v2879_v44, %v2122_v9  ;;  %v2609_v9 = vld [vmem:[%s3359_s11] ss:$0 sm:$0xff] }
 0x98b   : > { %v2164_v45 = vmul.f32 %v2607_v35, %v2154_v25 }
 0x98c   : > { %v2881_v37 = vpop.eup %2880 }
 0x98d   : > { %v2883_v27 = vpop.eup %2882  ;;  %v2156_v42 = vmul.f32 %v2881_v37, %v2124_v17  ;;  %v2174_v51 = vadd.f32 %v2608_v46, %v2164_v45 }
 0x98e   : > { %v2155_v43 = vmul.f32 %v2883_v27, %v2123_v18 }
 0x98f   : > { %v2166_v50 = vmul.f32 %v2607_v35, %v2156_v42 }
 0x990   : > { %v2885_v47 = vpop.eup %2884  ;;  %v2165_v48 = vmul.f32 %v2607_v35, %v2155_v43 }
 0x991   : > { %v2157_v49 = vmul.f32 %v2885_v47, %v2125_v4  ;;  %v2176_v55 = vadd.f32 %v2608_v46, %v2166_v50 }
 0x992   : > { %v2175_v52 = vadd.f32 %v2608_v46, %v2165_v48 }
 0x993   : > { %v2167_v53 = vmul.f32 %v2607_v35, %v2157_v49 }
 0x994   : > { %v2178_v54 = vpack.c.bf16 %v2175_v52, %v2174_v51 }
 0x995   : > { %v2177_v56 = vadd.f32 %v2608_v46, %v2167_v53 }
 0x996   : > { %2785 = vmatprep.mubr.msk.bf16.mxu1 %vm478_vm0, %v2178_v54 }
 0x997   : > { %v2179_v58 = vpack.c.bf16 %v2177_v56, %v2176_v55 }
 0x999   : > { %2786 = vmatmul.mubr.msk.bf16.vlgmr.msra.gmra.mxu1 %vm478_vm0, %v2179_v58 }
 0xa59   : > { %v2787_v12 = vpop.f32.mrf.mxu1 }
 0xa5a   : > { %v3297_v13 = vadd.f32 %v2787_v12, %v2609_v9 }
 0xa5b   : > { %v2243_v14 = vpop.f32.mrf.mxu1 }
 0xa5c   : > { %v3300_v15 = vmul.f32 0.70710677, %v3297_v13  ;;  %v3302_v16 = vadd.f32 %v2609_v9, %v2243_v14 }
 0xa5d   : > { %v2788_v17 = vpop.f32.mrf.mxu1 }
 0xa5e   : > { %v2268_v18 = vand.u32 2147483647, %v3300_v15  ;;  %v3306_v19 = vmul.f32 0.70710677, %v3302_v16  ;;  %v3308_v20 = vadd.f32 %v2788_v17, %v2609_v9  ;;  %vm2348_vm5 = vcmp.ge.f32.partialorder %v3300_v15, 0.0 }
 0xa5f   : > { %v2246_v21 = vpop.f32.mrf.mxu1 }
 0xa60   : > { %v2272_v22 = vmul.f32 0.3275911, %v2268_v18  ;;  %v2266_v7 = vand.u32 2147483647, %v3306_v19  ;;  %v3312_v4 = vmul.f32 0.70710677, %v3308_v20  ;;  %v3314_v10 = vadd.f32 %v2609_v9, %v2246_v21 }
 0xa61   : > { %v2324_v34 = vsub.f32 0.0, %v2268_v18  ;;  %vm2346_vm4 = vcmp.ge.f32.partialorder %v3306_v19, 0.0  ;;  %v2258_v19 = vmul.f32 0.5, %v3302_v16 }
 0xa62   : > { %v2276_v23 = vadd.f32 1.0, %v2272_v22  ;;  %v2270_v24 = vmul.f32 0.3275911, %v2266_v7  ;;  %v2269_v11 = vand.u32 2147483647, %v3312_v4  ;;  %v2322_v62 = vsub.f32 0.0, %v2266_v7 }
 0xa63   : > { %v3318_v26 = vmul.f32 0.70710677, %v3314_v10  ;;  %v2328_v36 = vmul.f32 %v2324_v34, %v2268_v18  ;;  %vm2349_vm6 = vcmp.ge.f32.partialorder %v3312_v4, 0.0  ;;  %v2259_v15 = vmul.f32 0.5, %v3314_v10 }
 0xa64   : > { %2886 = vrcp.f32 %v2276_v23  ;;  %v2274_v28 = vadd.f32 1.0, %v2270_v24  ;;  %v2273_v29 = vmul.f32 0.3275911, %v2269_v11  ;;  %v2325_v38 = vsub.f32 0.0, %v2269_v11 }
 0xa65   : > { %v2267_v30 = vand.u32 2147483647, %v3318_v26  ;;  %v2326_v40 = vmul.f32 %v2322_v62, %v2266_v7  ;;  %v2334_v44 = vmul.f32 1.442695, %v2328_v36  ;;  %vm2347_vm7 = vcmp.ge.f32.partialorder %v3318_v26, 0.0 }
 0xa66   : > { %2888 = vrcp.f32 %v2274_v28  ;;  %v2277_v31 = vadd.f32 1.0, %v2273_v29  ;;  %v2329_v35 = vmul.f32 %v2325_v38, %v2269_v11  ;;  %v2260_v4 = vmul.f32 0.5, %v3297_v13  ;;  %v2622_v13 = vld [vmem:[%s3361_s13] ss:$0 sm:$0xff] }
 0xa67   : > { %v2271_v32 = vmul.f32 0.3275911, %v2267_v30  ;;  %v2323_v25 = vsub.f32 0.0, %v2267_v30  ;;  %v2330_v43 = vmul.f32 1.442695, %v2326_v40 }
 0xa68   : > { %2890 = vrcp.f32 %v2277_v31  ;;  %v2336_v50 = vmul.f32 1.442695, %v2329_v35 }
 0xa69   : > { %v2275_v33 = vadd.f32 1.0, %v2271_v32  ;;  %v2327_v47 = vmul.f32 %v2323_v25, %v2267_v30 }
 0xa6b   : > { %2892 = vrcp.f32 %v2275_v33  ;;  %v2332_v58 = vmul.f32 1.442695, %v2327_v47 }
 0xa6c   : > { %2894 = vpow2.f32 %v2334_v44 }
 0xa6d   : > { %2896 = vpow2.f32 %v2330_v43 }
 0xa6e   : > { %2898 = vpow2.f32 %v2336_v50 }
 0xa6f   : > { %2900 = vpow2.f32 %v2332_v58 }
 0xa71   : > { %v2887_v39 = vpop.eup %2886 }
 0xa72   : > { %v2288_v41 = vmul.f32 1.0614054, %v2887_v39 }
 0xa73   : > { %v2889_v37 = vpop.eup %2888 }
 0xa74   : > { %v2292_v27 = vadd.f32 -1.4531521, %v2288_v41  ;;  %v2286_v42 = vmul.f32 1.0614054, %v2889_v37 }
 0xa75   : > { %v2891_v45 = vpop.eup %2890 }
 0xa76   : > { %v2296_v46 = vmul.f32 %v2887_v39, %v2292_v27  ;;  %v2290_v48 = vadd.f32 -1.4531521, %v2286_v42  ;;  %v2289_v49 = vmul.f32 1.0614054, %v2891_v45 }
 0xa78   : > { %v2300_v51 = vadd.f32 1.4214138, %v2296_v46  ;;  %v2893_v52 = vpop.eup %2892  ;;  %v2294_v53 = vmul.f32 %v2889_v37, %v2290_v48  ;;  %v2293_v54 = vadd.f32 -1.4531521, %v2289_v49 }
 0xa79   : > { %v2287_v56 = vmul.f32 1.0614054, %v2893_v52  ;;  %v2895_v23 = vpop.eup %2894 }
 0xa7a   : > { %v2304_v55 = vmul.f32 %v2887_v39, %v2300_v51  ;;  %v2298_v60 = vadd.f32 1.4214138, %v2294_v53  ;;  %v2297_v61 = vmul.f32 %v2891_v45, %v2293_v54  ;;  %v2897_v32 = vpop.eup %2896  ;;  %v2261_v53 = vmul.f32 0.5, %v3308_v20 }
 0xa7b   : > { %v2291_v3 = vadd.f32 -1.4531521, %v2287_v56  ;;  %v2899_v38 = vpop.eup %2898 }
 0xa7c   : > { %v2308_v1 = vadd.f32 -0.28449672, %v2304_v55  ;;  %v2302_v6 = vmul.f32 %v2889_v37, %v2298_v60  ;;  %v2301_v5 = vadd.f32 1.4214138, %v2297_v61  ;;  %v2901_v35 = vpop.eup %2900 }
 0xa7d   : > { %v2295_v8 = vmul.f32 %v2893_v52, %v2291_v3 }
 0xa7e   : > { %v2312_v2 = vmul.f32 %v2887_v39, %v2308_v1  ;;  %v2306_v9 = vadd.f32 -0.28449672, %v2302_v6  ;;  %v2305_v12 = vmul.f32 %v2891_v45, %v2301_v5 }
 0xa7f   : > { %v2299_v17 = vadd.f32 1.4214138, %v2295_v8 }
 0xa80   : > { %v2316_v14 = vadd.f32 0.2548296, %v2312_v2  ;;  %v2310_v18 = vmul.f32 %v2889_v37, %v2306_v9  ;;  %v2309_v21 = vadd.f32 -0.28449672, %v2305_v12 }
 0xa81   : > { %v2303_v7 = vmul.f32 %v2893_v52, %v2299_v17 }
 0xa82   : > { %v2320_v22 = vmul.f32 %v2887_v39, %v2316_v14  ;;  %v2314_v24 = vadd.f32 0.2548296, %v2310_v18  ;;  %v2313_v11 = vmul.f32 %v2891_v45, %v2309_v21 }
 0xa83   : > { %v2307_v29 = vadd.f32 -0.28449672, %v2303_v7 }
 0xa84   : > { %v2340_v28 = vmul.f32 %v2895_v23, %v2320_v22  ;;  %v2318_v30 = vmul.f32 %v2889_v37, %v2314_v24  ;;  %v2317_v31 = vadd.f32 0.2548296, %v2313_v11 }
 0xa85   : > { %v2311_v33 = vmul.f32 %v2893_v52, %v2307_v29 }
 0xa86   : > { %v2344_v34 = vsub.f32 1.0, %v2340_v28  ;;  %v2338_v62 = vmul.f32 %v2897_v32, %v2318_v30  ;;  %v2321_v36 = vmul.f32 %v2891_v45, %v2317_v31 }
 0xa87   : > { %v2315_v40 = vadd.f32 0.2548296, %v2311_v33 }
 0xa88   : > { %v2342_v41 = vsub.f32 1.0, %v2338_v62  ;;  %v2341_v44 = vmul.f32 %v2899_v38, %v2321_v36  ;;  %v2352_v39 = vsub.f32 0.0, %v2344_v34 }
 0xa89   : > { %v2319_v25 = vmul.f32 %v2893_v52, %v2315_v40 }
 0xa8a   : > { %v2350_v27 = vsub.f32 0.0, %v2342_v41  ;;  %v2345_v42 = vsub.f32 1.0, %v2341_v44  ;;  %v2356_v45 = vsel %vm2348_vm5, %v2344_v34, %v2352_v39 }
 0xa8b   : > { %v2339_v43 = vmul.f32 %v2901_v35, %v2319_v25  ;;  %v2360_v52 = vadd.f32 1.0, %v2356_v45 }
 0xa8c   : > { %v2353_v46 = vsub.f32 0.0, %v2345_v42  ;;  %v2354_v37 = vsel %vm2346_vm4, %v2342_v41, %v2350_v27 }
 0xa8d   : > { %v2343_v47 = vsub.f32 1.0, %v2339_v43  ;;  %v2358_v51 = vadd.f32 1.0, %v2354_v37  ;;  %v2364_v61 = vmul.f32 %v2360_v52, %v2260_v4 }
 0xa8e   : > { %v2357_v48 = vsel %vm2349_vm6, %v2345_v42, %v2353_v46 }
 0xa8f   : > { %v2361_v49 = vadd.f32 1.0, %v2357_v48  ;;  %v2351_v50 = vsub.f32 0.0, %v2343_v47  ;;  %v2362_v58 = vmul.f32 %v2358_v51, %v2258_v19 }
 0xa91   : > { %v2355_v54 = vsel %vm2347_vm7, %v2343_v47, %v2351_v50  ;;  %v2365_v56 = vmul.f32 %v2361_v49, %v2261_v53 }
 0xa92   : > { %v2359_v55 = vadd.f32 1.0, %v2355_v54 }
 0xa93   : > { %v2367_v3 = vpack.c.bf16 %v2365_v56, %v2364_v61 }
 0xa94   : > { %v2363_v60 = vmul.f32 %v2359_v55, %v2259_v15 }
 0xa96   : > { %v2366_v1 = vpack.c.bf16 %v2363_v60, %v2362_v58 }
 0xa98   : > { %2805 = vmatprep.mubr.bf16.mxu0 %v2366_v1 }
 0xa99   : > { %2806 = vmatmul.mubr.bf16.vlgmr.msra.gmra.mxu0 %v2367_v3 }
 0xb59   : > { %v2807_v26 = vpop.f32.mrf.mxu0 }
 0xb5a   : > { %v2483_v5 = vadd.f32 %v2807_v26, %v3232_v59 }
 0xb5b   : > { %v2466_v6 = vpop.f32.mrf.mxu0 }
 0xb5c   : > { %v2481_v20 = vadd.f32 %v2466_v6, %v3230_v57  ;;  %v2494_v12 = vadd.f32 %v2622_v13, %v2483_v5 }
 0xb5d   : > { %v2808_v16 = vpop.f32.mrf.mxu0 }
 0xb5e   : > { %v2492_v10 = vadd.f32 %v2622_v13, %v2481_v20  ;;  %v2484_v8 = vadd.f32 %v2808_v16, %v3240_v63  ;;  %2498 = vst.msk [vmem:[%s469_s20 + $0x10] sm:$0xff] %vm478_vm0, %v2494_v12 }
 0xb5f   : > { %v2469_v2 = vpop.f32.mrf.mxu0 }
 0xb60   : > { %2496 = vst.msk [vmem:[%s469_s20] sm:$0xff] %vm478_vm0, %v2492_v10  ;;  %v2482_v57 = vadd.f32 %v2469_v2, %v3238_v0  ;;  %v2495_v14 = vadd.f32 %v2622_v13, %v2484_v8 }
 0xb62   : > { %v2493_v9 = vadd.f32 %v2622_v13, %v2482_v57  ;;  %2499 = vst.msk [vmem:[%s469_s20 + $0x18] sm:$0xff] %vm478_vm0, %v2495_v14 }
 0xb64   : > { %2497 = vst.msk [vmem:[%s469_s20 + $0x8] sm:$0xff] %vm478_vm0, %v2493_v9 }
 0xb65 PF: > { %s24_s29 = sadd.s32 1, %s2908_s29  }
 0xb66   : > { %p21_p4 = scmp.ge.s32.totalorder %s24_s29, 4  }
 0xb68   :  { %23 = sbr.rel (!%p21_p4) target bundleno = 1 (0x1), region = 107 }

// kernel: _lambda_.10
= control target key start
LH: loop header
LB: loop body
LE: loop exit
PB: predicated region body
PF: predicated region fallthrough
CT: control target
= control target key end

     0   :  { %s486_s15 = smov 0   ;;  %s540_s0 = inlined_call_operand.vmem [shape: f32[16,128], index: 0, kind: input, shape index: {}]   ;;  %s541_s1 = inlined_call_operand.vmem [shape: f32[1,128], index: 1, kind: input, shape index: {}]   ;;  %s542_s2 = inlined_call_operand.vmem [shape: f32[1,128], index: 2, kind: input, shape index: {}]   ;;  %s543_s3 = inlined_call_operand.vmem [shape: bf16[128,64], index: 3, kind: input, shape index: {}]   ;;  %s544_s4 = inlined_call_operand.vmem [shape: f32[16,64], index: 4, kind: output, shape index: {}]  }
   0x1 LB: > { %s383_s16 = sadd.s32 4294967295, %s457_s15   ;;  %p387_p0 = scmp.ge.s32.totalorder %s457_s15, 1  ;;  %s457_s15 = sphi %s486_s15, %s14_s15  }
   0x2   : > { %p161_p1 = scmp.lt.s32.totalorder %s457_s15, 3 }
   0x4   : > { %p162_p2 = pnand %p387_p0, %p161_p1 }
   0x5   : > { %p185_p3 = scmp.lt.s32.totalorder (!%p162_p2), %s383_s16, 1 }
   0x6   : > { %165 = sbr.rel (%p162_p2) target bundleno = 522 (0x20a), region = 36 }
   0xb   : > { %s546_s16 = smov (!%p185_p3, %s383_s16), 1  ;;  %v441_v1 = vld [vmem:[%s543_s3 + $0x38] sm:$0xff]   ;;  %v459_v2 = vmov 0.0   ;;  %v442_v3 = vld [vmem:[%s543_s3 + $0x30] sm:$0xff]   ;;  %v443_v8 = vld [vmem:[%s543_s3 + $0x28] sm:$0xff]   ;;  %vm460_vm0 = vmmov 0  }
   0xc   : > { %s388_s17 = sshll.u32 %s546_s16, 3  ;;  %411 = vmatprep.subr.bf16.mxu0 %v459_v2  ;;  %v444_v9 = vld [vmem:[%s543_s3 + $0x20] sm:$0xff]   ;;  %427 = vmatprep.mubr.msk.bf16.mxu0 %vm460_vm0, %v459_v2  ;;  %v445_v10 = vld [vmem:[%s543_s3 + $0x18] sm:$0xff]   ;;  %v446_v11 = vld [vmem:[%s543_s3 + $0x10] sm:$0xff]   ;;  %vm328_vm1 = vcmask 523264  }
   0xd   : > { %s188_s20 = scalar_lea.vmem %s540_s0, %s388_s17  ;;  %412 = vmatpush3.bf16.msra.mxu0 %v441_v1  ;;  %v447_v12 = vld [vmem:[%s543_s3 + $0x8] sm:$0xff]   ;;  %v448_v13 = vld [vmem:[%s543_s3] sm:$0xff]  }
   0xe   : > { %v194_v0 = vld [vmem:[%s188_s20] sm:$0xff]  ;;  %413 = vmatprep.subr.bf16.mxu0 %v459_v2  ;;  %s192_s20 = scalar_lea.vmem %s544_s4, %s388_s17 }
   0xf   : > { %197 = vadd.xlane.f32.xlu0 %v194_v0  ;;  %v390_v18 = vld [vmem:[%s541_s1] ss:$0 sm:$0xff] }
  0x10   : > { %v391_v20 = vld [vmem:[%s542_s2] ss:$0 sm:$0xff] }
  0x11   : > { %414 = vmatpush3.bf16.msra.mxu0 %v442_v3 }
  0x12   : > { %415 = vmatprep.subr.bf16.mxu0 %v459_v2 }
  0x15   : > { %416 = vmatpush3.bf16.msra.mxu0 %v443_v8 }
  0x16   : > { %417 = vmatprep.subr.bf16.mxu0 %v459_v2 }
  0x19   : > { %418 = vmatpush3.bf16.msra.mxu0 %v444_v9 }
  0x1a   : > { %419 = vmatprep.subr.bf16.mxu0 %v459_v2 }
  0x1d   : > { %420 = vmatpush3.bf16.msra.mxu0 %v445_v10 }
  0x1e   : > { %421 = vmatprep.subr.bf16.mxu0 %v459_v2 }
  0x21   : > { %422 = vmatpush3.bf16.msra.mxu0 %v446_v11 }
  0x22   : > { %423 = vmatprep.subr.bf16.mxu0 %v459_v2 }
  0x25   : > { %424 = vmatpush3.bf16.msra.mxu0 %v447_v12 }
  0x26   : > { %425 = vmatprep.subr.bf16.mxu0 %v459_v2 }
  0x29   : > { %426 = vmatpush3.bf16.msra.mxu0 %v448_v13 }
  0x98   : > { %v198_v4 = vpop.xlane.xlu0 %197 }
  0x99   : > { %v200_v5 = vmul.f32 0.0078125, %v198_v4 }
  0x9b   : > { %v201_v6 = vsub.f32 %v194_v0, %v200_v5 }
  0x9d   : > { %v202_v7 = vmul.f32 %v201_v6, %v201_v6 }
  0x9f   : > { %203 = vadd.xlane.f32.xlu0 %v202_v7 }
 0x128   : > { %v204_v14 = vpop.xlane.xlu0 %203 }
 0x129   : > { %v205_v15 = vmul.f32 0.0078125, %v204_v14 }
 0x12b   : > { %v206_v16 = vadd.f32 1e-05, %v205_v15 }
 0x12d   : > { %449 = vrsqrt.f32 %v206_v16 }
 0x13a   : > { %v450_v17 = vpop.eup %449 }
 0x13b   : > { %v208_v19 = vmul.f32 %v450_v17, %v201_v6 }
 0x13d   : > { %v215_v21 = vmul.f32 %v390_v18, %v208_v19 }
 0x13f   : > { %v222_v22 = vadd.f32 %v391_v20, %v215_v21 }
 0x141   : > { %v223_v23 = vpack.c.bf16 %v222_v22, %v222_v22 }
 0x143   : > { %428 = vmatmul.mubr.bf16.vlgmr.msra.gmra.mxu0 %v223_v23 }
 0x203   : > { %v322_v24 = vpop.f32.mrf.mxu0 }
 0x204   : > { %329 = vst.msk [vmem:[%s192_s20] sm:$0xff] %vm328_vm1, %v322_v24 }
 0x205   : > { %v429_v25 = vpop.f32.mrf.mxu0 }
 0x207   : > { %v325_v26 = vpop.f32.mrf.mxu0 }
 0x209   : > { %v430_v27 = vpop.f32.mrf.mxu0 }
 0x20a PF: > { %s14_s15 = sadd.s32 1, %s457_s15  }
 0x20b   : > { %p11_p4 = scmp.ge.s32.totalorder %s14_s15, 4  }
 0x20d   :  { %13 = sbr.rel (!%p11_p4) target bundleno = 1 (0x1), region = 66 }

// kernel: _lambda_.13
= control target key start
LH: loop header
LB: loop body
LE: loop exit
PB: predicated region body
PF: predicated region fallthrough
CT: control target
= control target key end

     0   :  { %10 = vsyncpa [#allocation3], 0  ;;  %s706_s0 = inlined_call_operand.vmem [shape: f32[2,8,64], index: 0, kind: input, shape index: {}]   ;;  %s707_s1 = inlined_call_operand.vmem [shape: f32[1,64], index: 1, kind: input, shape index: {}]   ;;  %s708_s2 = inlined_call_operand.vmem [shape: f32[1,64], index: 2, kind: input, shape index: {}]   ;;  %s709_s3 = inlined_call_operand.vmem [shape: bf16[64,4], index: 3, kind: input, shape index: {}]   ;;  %s710_s4 = inlined_call_operand.vmem [shape: f32[1,4], index: 4, kind: input, shape index: {}]   ;;  %s711_s5 = inlined_call_operand.hbm [shape: f32[2,1,4], index: 5, kind: output, shape index: {}]  }
   0x1   :  { %12 = vsyncpa [#allocation3 + $0x1], 0  ;;  %s582_s18 = smov 0   ;;  %s584_s19 = smov 0  }
   0x2   :  { %s586_s20 = smov 0   ;;  %s588_s21 = smov 0  }
   0x3 LB: > { %s603_s22 = sadd.s32 4294967295, %s547_s21   ;;  %s408_s23 = sadd.s32 4294967294, %s547_s21   ;;  %s547_s21 = sphi %s588_s21, %s717_s21   ;;  %s543_s20 = sphi %s586_s20, %s716_s20   ;;  %s539_s19 = sphi %s584_s19, %s715_s19   ;;  %s535_s18 = sphi %s582_s18, %s714_s18  }
   0x4   : > { %s607_s24 = sadd.s32 1, %s547_s21   ;;  %s135_s25 = sadd.s32 1, %s543_s20 }
   0x5   : > { %s132_s26 = ssub.s32 %s547_s21, %s607_s24  ;;  %p145_p0 = scmp.ne.s32.totalorder %s543_s20, %s539_s19 }
   0x6   : > { %p133_p1 = scmp.eq.s32.totalorder %s132_s26, 0  ;;  %p146_p2 = scmp.eq.s32.totalorder %s603_s22, 1 }
   0x7   : > { %p151_p3 = scmp.ne.s32.totalorder %s539_s19, %s535_s18  ;;  %p152_p4 = scmp.eq.s32.totalorder %s408_s23, 1 }
   0x8   : > { %s618_s27 = scalar_select %p133_p1, %s543_s20, %s135_s25  }
   0x9   : > { %p620_p5 = por %p146_p2, %p145_p0  ;;  %p624_p6 = por %p152_p4, %p151_p3 }
   0xa   : > { %p411_p7 = scmp.ge.s32.totalorder %s547_s21, 1  ;;  %p189_p8 = scmp.lt.s32.totalorder %s547_s21, 3 }
   0xc   : > { %p190_p9 = pnand %p411_p7, %p189_p8 }
   0xd   : > { %p215_p10 = scmp.lt.s32.totalorder (!%p190_p9), %s603_s22, 1  ;;  %s551_s16 = smov (!%p190_p9), [#allocation2]  }
   0xe   : > { %193 = sbr.rel (%p190_p9) target bundleno = 558 (0x22e), region = 40  ;;  %s491_s17 = sshll.u32 (!%p190_p9), %s551_s16, 4  ;;  %s492_s17 = int_to_ptr.vmem [resolvable:$false] %s491_s17 }
   0xf   : > { %s493_s23 = scalar_lea.vmem (!%p190_p9), %s492_s17, 32 }
  0x13   : > { %s216_s30 = scalar_select %p215_p10, %s603_s22, 1  ;;  %vm223_vm0 = vcmask 523264   ;;  %v481_v7 = vld [vmem:[%s709_s3 + $0x18] sm:$0xff]   ;;  %v549_v8 = vmov 0.0   ;;  %vm550_vm1 = vmmov 0   ;;  %v482_v9 = vld [vmem:[%s709_s3 + $0x10] sm:$0xff]  }
  0x14   : > { %428 = vmatprep.subr.bf16.mxu0 %v549_v8  ;;  %436 = vmatprep.mubr.msk.bf16.mxu0 %vm550_vm1, %v549_v8  ;;  %v483_v10 = vld [vmem:[%s709_s3 + $0x8] sm:$0xff]   ;;  %v484_v11 = vld [vmem:[%s709_s3] sm:$0xff]   ;;  %vm338_vm2 = vcmask 24576  }
  0x15   : > { %s412_s6 = sshll.u32 %s216_s30, 3  ;;  %429 = vmatpush3.bf16.msra.mxu0 %v481_v7  ;;  %v413_v16 = vld [vmem:[%s707_s1] ss:$0 sm:$0xff] }
  0x16   : > { %s218_s9 = scalar_lea.vmem %s706_s0, %s412_s6  ;;  %430 = vmatprep.subr.bf16.mxu0 %v549_v8  ;;  %v414_v18 = vld [vmem:[%s708_s2] ss:$0 sm:$0xff]  ;;  %s213_s6 = sand.u32 1, %s539_s19  }
  0x17   : > { %v220_v0 = vld [vmem:[%s218_s9] sm:$0xff]  ;;  %s420_s9 = sshll.u32 %s603_s22, 4  ;;  %s214_s10 = scalar_lea.vmem [#allocation2], %s213_s6 }
  0x18   : > { %v224_v1 = vsel %vm223_vm0, %v220_v0, 0.0  ;;  %v270_v30 = vld [vmem:[%s710_s4] sm:$0x1]  ;;  %s353_s11 = sshll.u32 %s214_s10, 4  ;;  %s665_s14 = scalar_lea.hbm %s711_s5, %s420_s9  ;;  %s667_s11 = int_to_ptr.vmem [resolvable:$true] %s353_s11 }
  0x19   : > { %225 = vadd.xlane.f32.xlu0 %v224_v1  ;;  %431 = vmatpush3.bf16.msra.mxu0 %v482_v9  ;;  %s341_s15 = scalar_lea.sflag [#allocation3], %s213_s6  ;;  %s487_s22 = scalar_lea.vmem %s667_s11, 16 }
  0x1a   : > { %432 = vmatprep.subr.bf16.mxu0 %v549_v8  ;;  %p488_p11 = scmp.ne.s32.totalorder %s667_s11, %s487_s22  ;;  %p494_p0 = scmp.lt.s32.totalorder %s667_s11, %s492_s17 }
  0x1b   : > { %p495_p1 = scmp.lt.s32.totalorder %s493_s23, %s487_s22 }
  0x1c   : > { %p489_p12 = pnand %p488_p11, %p620_p5 }
  0x1d   : > { %433 = vmatpush3.bf16.msra.mxu0 %v483_v10  ;;  %p496_p2 = por %p495_p1, %p494_p0 }
  0x1e   : > { %434 = vmatprep.subr.bf16.mxu0 %v549_v8  ;;  %p490_p13 = pneg %p489_p12 }
  0x20   : > { %p497_p3 = pnand %p496_p2, %p490_p13 }
  0x21   : > { %435 = vmatpush3.bf16.msra.mxu0 %v484_v11 }
  0xa2   : > { %v226_v2 = vpop.xlane.xlu0 %225 }
  0xa3   : > { %v228_v3 = vmul.f32 0.015625, %v226_v2 }
  0xa5   : > { %v229_v4 = vsub.f32 %v220_v0, %v228_v3 }
  0xa7   : > { %v230_v5 = vmul.f32 %v229_v4, %v229_v4 }
  0xa9   : > { %v231_v6 = vsel %vm223_vm0, %v230_v5, 0.0 }
  0xaa   : > { %232 = vadd.xlane.f32.xlu0 %v231_v6 }
 0x133   : > { %v233_v12 = vpop.xlane.xlu0 %232 }
 0x134   : > { %v234_v13 = vmul.f32 0.015625, %v233_v12 }
 0x136   : > { %v235_v14 = vadd.f32 1e-05, %v234_v13 }
 0x138   : > { %485 = vrsqrt.f32 %v235_v14 }
 0x145   : > { %v486_v15 = vpop.eup %485 }
 0x146   : > { %v237_v17 = vmul.f32 %v486_v15, %v229_v4 }
 0x148   : > { %v244_v19 = vmul.f32 %v413_v16, %v237_v17 }
 0x14a   : > { %v251_v20 = vadd.f32 %v414_v18, %v244_v19 }
 0x14c   : > { %v252_v21 = vsel %vm223_vm0, %v251_v20, 0.0 }
 0x14d   : > { %v253_v22 = vrot.slane %v252_v21, 4 }
 0x14f   : > { %v254_v23 = vadd.f32 %v253_v22, %v252_v21 }
 0x151   : > { %v255_v24 = vrot.slane %v254_v23, 2 }
 0x153   : > { %v256_v25 = vadd.f32 %v255_v24, %v254_v23 }
 0x155   : > { %v257_v26 = vrot.slane %v256_v25, 1 }
 0x157   : > { %v258_v27 = vadd.f32 %v257_v26, %v256_v25 }
 0x159   : > { %v260_v28 = vmul.f32 0.125, %v258_v27 }
 0x15b   : > { %v261_v29 = vpack.c.bf16 %v260_v28, %v260_v28 }
 0x15d   : > { %437 = vmatmul.mubr.msk.bf16.vlgmr.msra.gmra.mxu0 %vm223_vm0, %v261_v29 }
 0x21d   : > { %v332_v31 = vpop.f32.mrf.mxu0 }
 0x21e   : > { %v333_v32 = vadd.f32 %v332_v31, %v270_v30 }
 0x21f   : > { %v438_v33 = vpop.f32.mrf.mxu0 }
 0x220   : > { %339 = vst.msk [vmem:[%s214_s10] sm:$0x1] %vm338_vm2, %v333_v32 }
 0x221   : > { %v335_v34 = vpop.f32.mrf.mxu0 }
 0x222   : > { %500 = shalt.err (!%p497_p3)
}
 0x223   : > { %s501_s25 = scalar_lea.hbm %s665_s14, 16  ;;  %s505_s6 = scalar_lea.hbm %s711_s5, 32 }
 0x224   : > { %p502_p4 = scmp.ne.s32.totalorder %s665_s14, %s501_s25  ;;  %p506_p9 = scmp.lt.s32.totalorder %s665_s14, %s711_s5 }
 0x225   : > { %p507_p10 = scmp.lt.s32.totalorder %s505_s6, %s501_s25 }
 0x226   : > { %p503_p7 = pnand %p502_p4, %p620_p5 }
 0x227   : > { %p508_p11 = por %p507_p10, %p506_p9 }
 0x228   : > { %p504_p8 = pneg %p503_p7 }
 0x22a   : > { %p509_p12 = pnand %p508_p11, %p504_p8 }
 0x22c   : > { %512 = shalt.err (!%p509_p12)
}
 0x22d   : > { %440 = dma.vmem_to_hbm [thread:$0]  (%p620_p5), %s667_s11, 16, %s665_s14, %s341_s15   ;;  %v439_v35 = vpop.f32.mrf.mxu0 }
 0x22e PF: > { %p446_p13 = scmp.ge.s32.totalorder %s547_s21, 2  ;;  %s365_s9 = sand.u32 1, %s535_s18  }
 0x22f   : > { %s366_s10 = scalar_lea.sflag [#allocation3], %s365_s9 }
 0x230   : > { %p443_p0 = pnand %p446_p13, %p624_p6 }
 0x232   : > { %p444_p1 = pneg %p443_p0 }
 0x234   : > { %530 = dma.done.wait (%p444_p1), %s366_s10, 16  }
 0x235   : > { %532 = vsyncadd (%p444_p1), %s366_s10, 4294967280  ;;  %p15_p2 = scmp.ge.s32.totalorder %s607_s24, 4   ;;  %s714_s18 = smov %s539_s19 }
 0x236   : > { %s715_s19 = smov %s543_s20  ;;  %s716_s20 = smov %s618_s27 }
 0x237   : > { %s717_s21 = smov %s607_s24  ;;  %17 = sbr.rel (!%p15_p2) target bundleno = 3 (0x3), region = 75 }
 0x23c   :  { %370 = vsyncpa [#allocation3], 1 }
 0x23d   :  { %372 = vsyncpa [#allocation3 + $0x1], 1 }

// kernel: _lambda_.11
= control target key start
LH: loop header
LB: loop body
LE: loop exit
PB: predicated region body
PF: predicated region fallthrough
CT: control target
= control target key end

     0   :  { %s2272_s29 = smov 0   ;;  %s2551_s0 = inlined_call_operand.vmem [shape: f32[2,8,64], index: 0, kind: input, shape index: {}]   ;;  %s2552_s1 = inlined_call_operand.vmem [shape: f32[1,64], index: 1, kind: input, shape index: {}]   ;;  %s2553_s2 = inlined_call_operand.vmem [shape: f32[1,64], index: 2, kind: input, shape index: {}]   ;;  %s2554_s3 = inlined_call_operand.vmem [shape: bf16[64,192], index: 3, kind: input, shape index: {}]   ;;  %s2555_s4 = inlined_call_operand.vmem [shape: f32[1,192], index: 4, kind: input, shape index: {}]   ;;  %s2556_s5 = inlined_call_operand.vmem [shape: f32[4,1,8,8], index: 5, kind: input, shape index: {}]   ;;  %s2557_s6 = inlined_call_operand.vmem [shape: bf16[64,64], index: 6, kind: input, shape index: {}]   ;;  %s2558_s7 = inlined_call_operand.vmem [shape: f32[1,64], index: 7, kind: input, shape index: {}]   ;;  %s2559_s8 = inlined_call_operand.vmem [shape: f32[1,64], index: 8, kind: input, shape index: {}]   ;;  %s2560_s9 = inlined_call_operand.vmem [shape: f32[1,64], index: 9, kind: input, shape index: {}]   ;;  %s2561_s10 = inlined_call_operand.vmem [shape: bf16[64,256], index: 10, kind: input, shape index: {}]   ;;  %s2562_s11 = inlined_call_operand.vmem [shape: f32[1,256], index: 11, kind: input, shape index: {}]   ;;  %s2563_s12 = inlined_call_operand.vmem [shape: bf16[256,64], index: 12, kind: input, shape index: {}]   ;;  %s2564_s13 = inlined_call_operand.vmem [shape: f32[1,64], index: 13, kind: input, shape index: {}]   ;;  %s2565_s14 = inlined_call_operand.vmem [shape: f32[2,8,64], index: 14, kind: output, shape index: {}]  }
   0x1 LB: > { %s1907_s30 = sadd.s32 4294967295, %s2185_s29   ;;  %p1911_p0 = scmp.ge.s32.totalorder %s2185_s29, 1  ;;  %s2185_s29 = sphi %s2272_s29, %s24_s29  }
   0x2   : > { %p411_p1 = scmp.lt.s32.totalorder %s2185_s29, 3 }
   0x4   : > { %p412_p2 = pnand %p1911_p0, %p411_p1 }
   0x5   : > { %p455_p3 = scmp.lt.s32.totalorder (!%p412_p2), %s1907_s30, 1  ;;  %s2190_s28 = smov (!%p412_p2), 64  }
   0x6   : > { %415 = sbr.rel (%p412_p2) target bundleno = 3835 (0xefb), region = 76  ;;  %s2192_s19 = smov (!%p412_p2), 32  }
   0x7   : > { %s2193_s20 = smov (!%p412_p2), 48   ;;  %s2194_s23 = smov (!%p412_p2), 96  }
   0x8   : > { %s2195_s17 = smov (!%p412_p2), 16  }
   0xb   : > { %s2567_s30 = smov (!%p455_p3, %s1907_s30), 1  ;;  %vm467_vm0 = vcmask 523264   ;;  %v2107_v7 = vld [vmem:[%s2554_s3 + $0x34] ss:$8 sps:$4 sm:$0xff]   ;;  %v2109_v8 = vld [vmem:[%s2554_s3 + $0x30] ss:$8 sps:$4 sm:$0xff]   ;;  %v507_v27 = vlaneseq }
   0xc   : > { %s1912_s15 = sshll.u32 %s2567_s30, 3  ;;  %v2110_v9 = vld [vmem:[%s2554_s3 + $0x24] ss:$8 sps:$4 sm:$0xff]   ;;  %568 = vmatprep.subr.bf16.mxu0 %v2107_v7  ;;  %v2112_v10 = vld [vmem:[%s2554_s3 + $0x20] ss:$8 sps:$4 sm:$0xff]   ;;  %v2187_v11 = vmov 0  }
   0xd   : > { %s458_s18 = scalar_lea.vmem %s2551_s0, %s1912_s15  ;;  %569 = vmatpush1.bf16.msra.mxu0 %v2109_v8  ;;  %592 = vmatprep.mubr.bf16.mxu0 %v2187_v11  ;;  %v2113_v12 = vld [vmem:[%s2554_s3 + $0x14] ss:$8 sps:$4 sm:$0xff]   ;;  %v2115_v13 = vld [vmem:[%s2554_s3 + $0x10] ss:$8 sps:$4 sm:$0xff]   ;;  %v2116_v14 = vld [vmem:[%s2554_s3 + $0x4] ss:$8 sps:$4 sm:$0xff]  }
   0xe   : > { %v2288_v0 = vld [vmem:[%s458_s18] sm:$0xff]  ;;  %570 = vmatprep.subr.bf16.mxu0 %v2110_v9  ;;  %v2188_v26 = vmov 0.0   ;;  %v2328_v28 = vshrl.u32 %v507_v27, 7  ;;  %vm2189_vm1 = vmmov 0   ;;  %vm605_vm2 = vcmask 130048   ;;  %s2191_s18 = smov 112  }
   0xf   : > { %v468_v1 = vsel %vm467_vm0, %v2288_v0, 0.0  ;;  %v2118_v15 = vld [vmem:[%s2554_s3] ss:$8 sps:$4 sm:$0xff]   ;;  %2025 = vmatprep.subr.mxu1 %v2188_v26  ;;  %2027 = vmatprep.mubr.msk.f32.mxu1 %vm2189_vm1, %v2188_v26  ;;  %vm680_vm3 = vcmask 64512  }
  0x10   : > { %469 = vadd.xlane.f32.xlu0 %v468_v1  ;;  %v1914_v20 = vld [vmem:[%s2552_s1] ss:$0 sm:$0xff]  ;;  %v509_v29 = vsub.s32 0, %v2328_v28  ;;  %v513_v37 = vsub.s32 1, %v2328_v28  ;;  %v1928_v59 = vld [vmem:[%s2556_s5 + $0x8] sm:$0xff] }
  0x11   : > { %571 = vmatpush1.bf16.msra.mxu0 %v2112_v10  ;;  %v1915_v22 = vld [vmem:[%s2553_s2] ss:$0 sm:$0xff] }
  0x12   : > { %572 = vmatprep.subr.bf16.mxu0 %v2113_v12  ;;  %v505_v30 = vld [vmem:[%s2555_s4] sm:$0x3]  ;;  %v2119_v12 = vld [vmem:[%s2557_s6 + $0x8] sm:$0xff]  }
  0x13   : > { %v510_v31 = vrot.slane %v505_v30, %v509_v29  ;;  %v514_v38 = vrot.slane %v505_v30, %v513_v37  ;;  %v601_v41 = vld [vmem:[%s2556_s5] sm:$0xff] }
  0x15   : > { %573 = vmatpush1.bf16.msra.mxu0 %v2115_v13 }
  0x16   : > { %574 = vmatprep.subr.bf16.mxu0 %v2116_v14  ;;  %v2120_v14 = vld [vmem:[%s2557_s6] sm:$0xff]  }
  0x19   : > { %575 = vmatpush1.bf16.msra.mxu0 %v2118_v15 }
  0x1a   : > { %2045 = vmatprep.subr.bf16.mxu0 %v2188_v26 }
  0x99   : > { %v470_v2 = vpop.xlane.xlu0 %469 }
  0x9a   : > { %v472_v3 = vmul.f32 0.015625, %v470_v2 }
  0x9c   : > { %v473_v4 = vsub.f32 %v2288_v0, %v472_v3 }
  0x9e   : > { %v474_v5 = vmul.f32 %v473_v4, %v473_v4 }
  0xa0   : > { %v475_v6 = vsel %vm467_vm0, %v474_v5, 0.0 }
  0xa1   : > { %476 = vadd.xlane.f32.xlu0 %v475_v6 }
 0x12a   : > { %v477_v16 = vpop.xlane.xlu0 %476 }
 0x12b   : > { %v478_v17 = vmul.f32 0.015625, %v477_v16 }
 0x12d   : > { %v479_v18 = vadd.f32 1e-05, %v478_v17  ;;  %v1936_v17 = vld [vmem:[%s2556_s5 + $0x10] sm:$0xff] }
 0x12f   : > { %2151 = vrsqrt.f32 %v479_v18 }
 0x13c   : > { %v2152_v19 = vpop.eup %2151 }
 0x13d   : > { %v481_v21 = vmul.f32 %v2152_v19, %v473_v4 }
 0x13f   : > { %v488_v23 = vmul.f32 %v1914_v20, %v481_v21 }
 0x141   : > { %v495_v24 = vadd.f32 %v1915_v22, %v488_v23 }
 0x143   : > { %v496_v25 = vpack.c.bf16 %v495_v24, %v495_v24 }
 0x145   : > { %1924 = vmatmul.mubr.msk.bf16.vlgmr.msra.gmra.mxu0 %vm467_vm0, %v496_v25 }
 0x146   : > { %2047 = vmatprep.mubr.msk.bf16.mxu0 %vm2189_vm1, %v2188_v26  ;;  %2046 = vmatpush3.bf16.msra.mxu0 %v2119_v12 }
 0x147   : > { %2051 = vmatprep.subr.bf16.mxu0 %v2188_v26 }
 0x205   : > { %v594_v32 = vpop.f32.mrf.mxu0 }
 0x206   : > { %v2340_v33 = vadd.f32 %v594_v32, %v510_v31 }
 0x207   : > { %v596_v34 = vpop.f32.mrf.mxu0 }
 0x208   : > { %603 = vrot.lane.b32.xlu1 %v2340_v33, %s2190_s28  ;;  %v2348_v40 = vadd.f32 %v596_v34, %v514_v38 }
 0x209   : > { %v598_v35 = vpop.f32.mrf.mxu0 }
 0x20b   : > { %v599_v36 = vpop.f32.mrf.mxu0 }
 0x27a   : > { %v604_v39 = vpop.permute.xlu1 %603 }
 0x27b   : > { %2026 = vmatpush3.xpose.msk.msra.mxu1 %vm605_vm2, %v604_v39 }
 0x27c   : > { %2030 = vmatprep.subr.mxu1 %v2188_v26 }
 0x27e   : > { %2028 = vmatmul.mubr.msk.f32.vlgmr.msra.gmra.mxu1 %vm605_vm2, %v2340_v33 }
 0x27f   : > { %2031 = vmatpush3.msra.mxu1 %v2348_v40  ;;  %2032 = vmatprep.mubr.msk.f32.mxu1 %vm2189_vm1, %v2188_v26 }
 0x280   : > { %2035 = vmatprep.subr.mxu1 %v2188_v26 }
 0x33e   : > { %v676_v42 = vpop.f32.mrf.mxu1 }
 0x33f   : > { %v677_v43 = vadd.f32 %v676_v42, %v601_v41 }
 0x340   : > { %v2029_v44 = vpop.f32.mrf.mxu1 }
 0x341   : > { %v681_v45 = vsel %vm680_vm3, %v677_v43, -inf }
 0x342   : > { %682 = vmax.xlane.f32.xlu1 %v681_v45 }
 0x353   : > { %860 = vrot.lane.b32.xlu1 %v2348_v40, %s2191_s18 }
 0x357   : > { %1041 = vrot.lane.b32.xlu1 %v2340_v33, %s2192_s19 }
 0x3cb   : > { %v683_v46 = vpop.xlane.xlu1 %682 }
 0x3cc   : > { %v684_v47 = vsub.f32 %v677_v43, %v683_v46 }
 0x3ce   : > { %v685_v48 = vmul.f32 1.442695, %v684_v47 }
 0x3cf   : > { %v861_v56 = vpop.permute.xlu1 %860 }
 0x3d0   : > { %2153 = vpow2.f32 %v685_v48  ;;  %v2121_v48 = vld [vmem:[%s2557_s6 + $0x10] sm:$0xff]  }
 0x3d3   : > { %v1042_v6 = vpop.permute.xlu1 %1041 }
 0x3dd   : > { %v2154_v49 = vpop.eup %2153 }
 0x3de   : > { %v687_v50 = vsel %vm680_vm3, %v2154_v49, 0.0 }
 0x3df   : > { %688 = vadd.xlane.f32.xlu0 %v687_v50 }
 0x3f5   : > { %772 = vrot.lane.b32.xlu0 %v2340_v33, %s2193_s20  ;;  %s462_s20 = scalar_lea.vmem %s2565_s14, %s1912_s15 }
 0x3f9   : > { %770 = vrot.lane.b32.xlu0 %v2340_v33, %s2191_s18  ;;  %s2196_s18 = smov 80  }
 0x468   : > { %v689_v51 = vpop.xlane.xlu0 %688 }
 0x469   : > { %2155 = vrcp.f32 %v689_v51 }
 0x46c   : > { %v773_v53 = vpop.permute.xlu0 %772 }
 0x470   : > { %v771_v55 = vpop.permute.xlu0 %770 }
 0x476   : > { %v2156_v52 = vpop.eup %2155 }
 0x477   : > { %v691_v54 = vmul.f32 %v2156_v52, %v2154_v49  ;;  %v1942_v52 = vld [vmem:[%s2556_s5 + $0x18] sm:$0xff] }
 0x479   : > { %2033 = vmatmul.mubr.msk.f32.vlgmr.msra.gmra.mxu1 %vm680_vm3, %v691_v54 }
 0x47a   : > { %2036 = vmatpush3.xpose.msk.msra.mxu1 %vm605_vm2, %v773_v53  ;;  %2037 = vmatprep.mubr.msk.f32.mxu1 %vm2189_vm1, %v2188_v26 }
 0x47b   : > { %2040 = vmatprep.subr.mxu1 %v2188_v26 }
 0x47d   : > { %2038 = vmatmul.mubr.msk.f32.vlgmr.msra.gmra.mxu1 %vm605_vm2, %v771_v55 }
 0x47e   : > { %2041 = vmatpush3.msra.mxu1 %v861_v56  ;;  %2042 = vmatprep.mubr.msk.f32.mxu1 %vm2189_vm1, %v2188_v26 }
 0x47f   : > { %2057 = vmatprep.subr.mxu1 %v2188_v26 }
 0x539   : > { %v761_v57 = vpop.f32.mrf.mxu1 }
 0x53a   : > { %v765_v22 = vpack.c.bf16 %v761_v57, %v761_v57 }
 0x53b   : > { %v2034_v58 = vpop.f32.mrf.mxu1 }
 0x53d   : > { %v844_v60 = vpop.f32.mrf.mxu1 }
 0x53e   : > { %v845_v61 = vadd.f32 %v1928_v59, %v844_v60 }
 0x53f   : > { %v2039_v62 = vpop.f32.mrf.mxu1 }
 0x540   : > { %v848_v63 = vsel %vm680_vm3, %v845_v61, -inf }
 0x541   : > { %849 = vmax.xlane.f32.xlu0 %v848_v63 }
 0x5ca   : > { %v850_v1 = vpop.xlane.xlu0 %849 }
 0x5cb   : > { %v851_v2 = vsub.f32 %v845_v61, %v850_v1 }
 0x5cd   : > { %v852_v3 = vmul.f32 1.442695, %v851_v2 }
 0x5cf   : > { %2157 = vpow2.f32 %v852_v3 }
 0x5dc   : > { %v2158_v4 = vpop.eup %2157 }
 0x5dd   : > { %v854_v5 = vsel %vm680_vm3, %v2158_v4, 0.0 }
 0x5de   : > { %855 = vadd.xlane.f32.xlu1 %v854_v5 }
 0x5ef   : > { %1039 = vrot.lane.b32.xlu1 %v2340_v33, %s2194_s23 }
 0x667   : > { %v856_v7 = vpop.xlane.xlu1 %855 }
 0x668   : > { %2159 = vrcp.f32 %v856_v7 }
 0x66b   : > { %v1040_v10 = vpop.permute.xlu1 %1039 }
 0x675   : > { %v2160_v8 = vpop.eup %2159 }
 0x676   : > { %v858_v9 = vmul.f32 %v2160_v8, %v2158_v4 }
 0x678   : > { %2043 = vmatmul.mubr.msk.f32.vlgmr.msra.gmra.mxu1 %vm680_vm3, %v858_v9 }
 0x679   : > { %2058 = vmatpush3.xpose.msk.msra.mxu1 %vm605_vm2, %v1042_v6  ;;  %2059 = vmatprep.mubr.msk.f32.mxu1 %vm2189_vm1, %v2188_v26 }
 0x67a   : > { %2067 = vmatprep.subr.bf16.mxu1 %v2188_v26 }
 0x67c   : > { %2060 = vmatmul.mubr.msk.f32.vlgmr.msra.gmra.mxu1 %vm605_vm2, %v1040_v10 }
 0x67d   : > { %2069 = vmatprep.mubr.msk.bf16.mxu1 %vm2189_vm1, %v2188_v26  ;;  %2068 = vmatpush3.bf16.msra.mxu1 %v2121_v48  ;;  %v2137_v48 = vld [vmem:[%s2563_s12 + $0x70] sm:$0xff]  }
 0x67e   : > { %2083 = vmatprep.subr.bf16.mxu1 %v2188_v26 }
 0x738   : > { %v932_v13 = vpop.f32.mrf.mxu1 }
 0x739   : > { %v936_v15 = vpack.c.bf16 %v932_v13, %v932_v13  ;;  %v1948_v13 = vld [vmem:[%s2558_s7] ss:$0 sm:$0xff] }
 0x73a   : > { %v2044_v16 = vpop.f32.mrf.mxu1 }
 0x73b   : > { %2048 = vmatmul.mubr.msk.bf16.vlgmr.msra.gmra.mxu0 %vm605_vm2, %v936_v15 }
 0x73c   : > { %v1113_v18 = vpop.f32.mrf.mxu1  ;;  %2052 = vmatpush3.bf16.msra.mxu0 %v2120_v14  ;;  %2053 = vmatprep.mubr.msk.bf16.mxu0 %vm2189_vm1, %v2188_v26 }
 0x73d   : > { %v1114_v19 = vadd.f32 %v1936_v17, %v1113_v18  ;;  %2062 = vmatprep.subr.mxu0 %v2188_v26 }
 0x73e   : > { %v2061_v20 = vpop.f32.mrf.mxu1 }
 0x73f   : > { %v1117_v21 = vsel %vm680_vm3, %v1114_v19, -inf }
 0x740   : > { %1118 = vmax.xlane.f32.xlu0 %v1117_v21 }
 0x743   : > { %2054 = vmatmul.mubr.msk.bf16.vlgmr.msra.gmra.mxu0 %vm605_vm2, %v765_v22 }
 0x744   : > { %2064 = vmatprep.mubr.msk.f32.mxu0 %vm2189_vm1, %v2188_v26 }
 0x756   : > { %1128 = vrot.lane.b32.xlu0 %v2348_v40, %s2194_s23 }
 0x75a   : > { %1261 = vrot.lane.b32.xlu0 %v2340_v33, %s2195_s17 }
 0x75e   : > { %1259 = vrot.lane.b32.xlu0 %v2340_v33, %s2196_s18 }
 0x7c9   : > { %v1119_v23 = vpop.xlane.xlu0 %1118 }
 0x7ca   : > { %v1120_v24 = vsub.f32 %v1114_v19, %v1119_v23 }
 0x7cc   : > { %v1121_v25 = vmul.f32 1.442695, %v1120_v24  ;;  %v2123_v24 = vld [vmem:[%s2561_s10 + $0x30] ss:$8 sps:$4 sm:$0xff]  }
 0x7cd   : > { %v1129_v27 = vpop.permute.xlu0 %1128 }
 0x7ce   : > { %2161 = vpow2.f32 %v1121_v25  ;;  %2063 = vmatpush3.msra.mxu0 %v1129_v27  ;;  %v2128_v25 = vld [vmem:[%s2561_s10 + $0x24] ss:$8 sps:$4 sm:$0xff]   ;;  %v2126_v27 = vld [vmem:[%s2561_s10 + $0x20] ss:$8 sps:$4 sm:$0xff]  }
 0x7cf   : > { %2073 = vmatprep.subr.mxu0 %v2188_v26 }
 0x7d1   : > { %v1262_v45 = vpop.permute.xlu0 %1261 }
 0x7d5   : > { %v1260_v47 = vpop.permute.xlu0 %1259 }
 0x7db   : > { %v2162_v30 = vpop.eup %2161 }
 0x7dc   : > { %v1123_v31 = vsel %vm680_vm3, %v2162_v30, 0.0 }
 0x7dd   : > { %1124 = vadd.xlane.f32.xlu1 %v1123_v31  ;;  %v2129_v31 = vld [vmem:[%s2561_s10 + $0x10] ss:$8 sps:$4 sm:$0xff]  }
 0x7fb   : > { %v982_v32 = vpop.f32.mrf.mxu0 }
 0x7fd   : > { %v2049_v34 = vpop.f32.mrf.mxu0 }
 0x7fe   : > { %v2132_v34 = vld [vmem:[%s2561_s10] ss:$8 sps:$4 sm:$0xff]  }
 0x7ff   : > { %v985_v35 = vpop.f32.mrf.mxu0 }
 0x801   : > { %v2050_v36 = vpop.f32.mrf.mxu0 }
 0x803   : > { %v1031_v38 = vpop.f32.mrf.mxu0 }
 0x804   : > { %v1032_v39 = vadd.f32 %v1031_v38, %v982_v32  ;;  %v2134_v32 = vld [vmem:[%s2561_s10 + $0x4] ss:$8 sps:$4 sm:$0xff]  }
 0x805   : > { %v2055_v41 = vpop.f32.mrf.mxu0 }
 0x806   : > { %v1949_v41 = vld [vmem:[%s2559_s8] ss:$0 sm:$0xff] }
 0x807   : > { %v1034_v33 = vpop.f32.mrf.mxu0 }
 0x809   : > { %v2056_v42 = vpop.f32.mrf.mxu0 }
 0x80a   : > { %v1950_v42 = vld [vmem:[%s2560_s9] ss:$0 sm:$0xff] }
 0x866   : > { %v1125_v43 = vpop.xlane.xlu1 %1124 }
 0x867   : > { %2163 = vrcp.f32 %v1125_v43 }
 0x874   : > { %v2164_v44 = vpop.eup %2163 }
 0x875   : > { %v1127_v46 = vmul.f32 %v2164_v44, %v2162_v30  ;;  %v2131_v30 = vld [vmem:[%s2561_s10 + $0x14] ss:$8 sps:$4 sm:$0xff]  }
 0x877   : > { %2065 = vmatmul.mubr.msk.f32.vlgmr.msra.gmra.mxu0 %vm680_vm3, %v1127_v46  ;;  %v2135_v46 = vld [vmem:[%s2563_s12 + $0x78] sm:$0xff]  }
 0x878   : > { %2074 = vmatpush3.xpose.msk.msra.mxu0 %vm605_vm2, %v1262_v45  ;;  %2075 = vmatprep.mubr.msk.f32.mxu0 %vm2189_vm1, %v2188_v26 }
 0x879   : > { %2078 = vmatprep.subr.mxu0 %v2188_v26 }
 0x87b   : > { %2076 = vmatmul.mubr.msk.f32.vlgmr.msra.gmra.mxu0 %vm605_vm2, %v1260_v47  ;;  %v2136_v47 = vld [vmem:[%s2563_s12 + $0x38] sm:$0xff]  }
 0x87c   : > { %2080 = vmatprep.mubr.msk.f32.mxu0 %vm2189_vm1, %v2188_v26 }
 0x937   : > { %v1200_v49 = vpop.f32.mrf.mxu0 }
 0x938   : > { %v1204_v50 = vpack.c.bf16 %v1200_v49, %v1200_v49  ;;  %v2138_v49 = vld [vmem:[%s2563_s12 + $0x30] sm:$0xff]  }
 0x939   : > { %v2066_v51 = vpop.f32.mrf.mxu0 }
 0x93a   : > { %2070 = vmatmul.mubr.msk.bf16.vlgmr.msra.gmra.mxu1 %vm605_vm2, %v1204_v50  ;;  %v2139_v50 = vld [vmem:[%s2563_s12 + $0x68] sm:$0xff]  }
 0x93b   : > { %v1333_v53 = vpop.f32.mrf.mxu0  ;;  %2085 = vmatprep.mubr.msk.bf16.mxu1 %vm2189_vm1, %v2188_v26  ;;  %v2122_v26 = vld [vmem:[%s2557_s6 + $0x18] sm:$0xff]   ;;  %v2140_v51 = vld [vmem:[%s2563_s12 + $0x28] sm:$0xff]  }
 0x93c   : > { %v1334_v54 = vadd.f32 %v1942_v52, %v1333_v53  ;;  %2084 = vmatpush3.bf16.msra.mxu1 %v2122_v26  ;;  %v2141_v52 = vld [vmem:[%s2563_s12 + $0x60] sm:$0xff]  }
 0x93d   : > { %v2077_v55 = vpop.f32.mrf.mxu0  ;;  %2003 = vmatprep.subr.bf16.mxu1 %v2135_v46  ;;  %v2142_v53 = vld [vmem:[%s2563_s12 + $0x20] sm:$0xff]  }
 0x93e   : > { %v1337_v56 = vsel %vm680_vm3, %v1334_v54, -inf  ;;  %v2144_v55 = vld [vmem:[%s2563_s12 + $0x18] sm:$0xff]   ;;  %v1524_v26 = vld [vmem:[%s2562_s11] sm:$0x3] }
 0x93f   : > { %1338 = vmax.xlane.f32.xlu0 %v1337_v56  ;;  %v2145_v56 = vld [vmem:[%s2563_s12 + $0x50] sm:$0xff]  }
 0x9c8   : > { %v1339_v57 = vpop.xlane.xlu0 %1338 }
 0x9c9   : > { %v1340_v58 = vsub.f32 %v1334_v54, %v1339_v57  ;;  %v2143_v54 = vld [vmem:[%s2563_s12 + $0x58] sm:$0xff]   ;;  %v2146_v57 = vld [vmem:[%s2563_s12 + $0x10] sm:$0xff]  }
 0x9cb   : > { %v1341_v59 = vmul.f32 1.442695, %v1340_v58  ;;  %v2147_v58 = vld [vmem:[%s2563_s12 + $0x48] sm:$0xff]  }
 0x9cd   : > { %2165 = vpow2.f32 %v1341_v59  ;;  %v2148_v59 = vld [vmem:[%s2563_s12 + $0x8] sm:$0xff]  }
 0x9da   : > { %v2166_v60 = vpop.eup %2165 }
 0x9db   : > { %v1343_v61 = vsel %vm680_vm3, %v2166_v60, 0.0 }
 0x9dc   : > { %1344 = vadd.xlane.f32.xlu1 %v1343_v61  ;;  %v2150_v61 = vld [vmem:[%s2563_s12] sm:$0xff]  }
 0x9ed   : > { %1348 = vrot.lane.b32.xlu1 %v2348_v40, %s2196_s18 }
 0x9fa   : > { %v1250_v62 = vpop.f32.mrf.mxu1 }
 0x9fb   : > { %v1256_v63 = vadd.f32 %v1250_v62, %v1032_v39  ;;  %v1529_v62 = vrot.slane %v1524_v26, %v509_v29 }
 0x9fc   : > { %v2071_v1 = vpop.f32.mrf.mxu1 }
 0x9fe   : > { %v1253_v2 = vpop.f32.mrf.mxu1 }
 0xa00   : > { %v2072_v3 = vpop.f32.mrf.mxu1 }
 0xa65   : > { %v1345_v4 = vpop.xlane.xlu1 %1344 }
 0xa66   : > { %2167 = vrcp.f32 %v1345_v4 }
 0xa69   : > { %v1349_v5 = vpop.permute.xlu1 %1348 }
 0xa6a   : > { %2079 = vmatpush3.msra.mxu0 %v1349_v5 }
 0xa73   : > { %v2168_v6 = vpop.eup %2167 }
 0xa74   : > { %v1347_v7 = vmul.f32 %v2168_v6, %v2166_v60  ;;  %v2149_v60 = vld [vmem:[%s2563_s12 + $0x40] sm:$0xff]  }
 0xa76   : > { %2081 = vmatmul.mubr.msk.f32.vlgmr.msra.gmra.mxu0 %vm680_vm3, %v1347_v7 }
 0xa77   : > { %1611 = vmatprep.mubr.bf16.mxu0 %v2187_v11 }
 0xb36   : > { %v1420_v40 = vpop.f32.mrf.mxu0 }
 0xb37   : > { %v1424_v8 = vpack.c.bf16 %v1420_v40, %v1420_v40 }
 0xb38   : > { %v2082_v9 = vpop.f32.mrf.mxu0 }
 0xb39   : > { %2086 = vmatmul.mubr.msk.bf16.vlgmr.msra.gmra.mxu1 %vm605_vm2, %v1424_v8 }
 0xb3a   : > { %2004 = vmatpush3.bf16.msra.mxu1 %v2136_v47 }
 0xb3b   : > { %2005 = vmatprep.subr.bf16.mxu1 %v2137_v48 }
 0xb3e   : > { %2006 = vmatpush3.bf16.msra.mxu1 %v2138_v49 }
 0xb3f   : > { %2007 = vmatprep.subr.bf16.mxu1 %v2139_v50 }
 0xb42   : > { %2008 = vmatpush3.bf16.msra.mxu1 %v2140_v51 }
 0xb43   : > { %2009 = vmatprep.subr.bf16.mxu1 %v2141_v52 }
 0xb46   : > { %2010 = vmatpush3.bf16.msra.mxu1 %v2142_v53 }
 0xb47   : > { %2011 = vmatprep.subr.bf16.mxu1 %v2143_v54 }
 0xb4a   : > { %2012 = vmatpush3.bf16.msra.mxu1 %v2144_v55 }
 0xb4b   : > { %2013 = vmatprep.subr.bf16.mxu1 %v2145_v56 }
 0xb4e   : > { %2014 = vmatpush3.bf16.msra.mxu1 %v2146_v57 }
 0xb4f   : > { %2015 = vmatprep.subr.bf16.mxu1 %v2147_v58 }
 0xb52   : > { %2016 = vmatpush3.bf16.msra.mxu1 %v2148_v59 }
 0xb53   : > { %2017 = vmatprep.subr.bf16.mxu1 %v2149_v60 }
 0xb56   : > { %2018 = vmatpush3.bf16.msra.mxu1 %v2150_v61 }
 0xbf9   : > { %v1470_v10 = vpop.f32.mrf.mxu1 }
 0xbfa   : > { %v1476_v12 = vadd.f32 %v1470_v10, %v1256_v63  ;;  %v1533_v63 = vrot.slane %v1524_v26, %v513_v37 }
 0xbfb   : > { %v2087_v14 = vpop.f32.mrf.mxu1 }
 0xbfc   : > { %v1477_v15 = vadd.f32 %v1476_v12, %v2288_v0  ;;  %v2125_v0 = vld [vmem:[%s2561_s10 + $0x34] ss:$8 sps:$4 sm:$0xff]  }
 0xbfd   : > { %v1473_v16 = vpop.f32.mrf.mxu1  ;;  %1587 = vmatprep.subr.bf16.mxu0 %v2125_v0 }
 0xbfe   : > { %v2446_v17 = vadd.f32 %v1948_v13, %v1477_v15  ;;  %1588 = vmatpush1.bf16.msra.mxu0 %v2123_v24 }
 0xbff   : > { %v2088_v18 = vpop.f32.mrf.mxu1  ;;  %1589 = vmatprep.subr.bf16.mxu0 %v2128_v25 }
 0xc00   : > { %v1488_v11 = vsel %vm467_vm0, %v2446_v17, 0.0 }
 0xc01   : > { %1489 = vadd.xlane.f32.xlu1 %v1488_v11 }
 0xc02   : > { %1590 = vmatpush1.bf16.msra.mxu0 %v2126_v27 }
 0xc03   : > { %1591 = vmatprep.subr.bf16.mxu0 %v2131_v30 }
 0xc06   : > { %1592 = vmatpush1.bf16.msra.mxu0 %v2129_v31 }
 0xc07   : > { %1593 = vmatprep.subr.bf16.mxu0 %v2134_v32 }
 0xc0a   : > { %1594 = vmatpush1.bf16.msra.mxu0 %v2132_v34 }
 0xc8a   : > { %v1490_v19 = vpop.xlane.xlu1 %1489 }
 0xc8b   : > { %v1491_v20 = vmul.f32 0.015625, %v1490_v19 }
 0xc8d   : > { %v1492_v21 = vsub.f32 %v2446_v17, %v1491_v20 }
 0xc8f   : > { %v1493_v22 = vmul.f32 %v1492_v21, %v1492_v21 }
 0xc91   : > { %v1494_v23 = vsel %vm467_vm0, %v1493_v22, 0.0 }
 0xc92   : > { %1495 = vadd.xlane.f32.xlu0 %v1494_v23 }
 0xd1b   : > { %v1496_v35 = vpop.xlane.xlu0 %1495 }
 0xd1c   : > { %v1497_v36 = vmul.f32 0.015625, %v1496_v35 }
 0xd1e   : > { %v1498_v38 = vadd.f32 1e-05, %v1497_v36 }
 0xd20   : > { %2169 = vrsqrt.f32 %v1498_v38 }
 0xd2d   : > { %v2170_v39 = vpop.eup %2169 }
 0xd2e   : > { %v1500_v33 = vmul.f32 %v2170_v39, %v1492_v21 }
 0xd30   : > { %v1507_v43 = vmul.f32 %v1949_v41, %v1500_v33 }
 0xd32   : > { %v1514_v44 = vadd.f32 %v1950_v42, %v1507_v43 }
 0xd34   : > { %v1515_v45 = vpack.c.bf16 %v1514_v44, %v1514_v44 }
 0xd36   : > { %1959 = vmatmul.mubr.msk.bf16.vlgmr.msra.gmra.mxu0 %vm467_vm0, %v1515_v45 }
 0xdf6   : > { %v1613_v1 = vpop.f32.mrf.mxu0 }
 0xdf7   : > { %v1614_v2 = vadd.f32 %v1613_v1, %v1529_v62  ;;  %v1976_v62 = vld [vmem:[%s2564_s13] ss:$0 sm:$0xff] }
 0xdf8   : > { %v1615_v3 = vpop.f32.mrf.mxu0 }
 0xdf9   : > { %v1622_v4 = vmul.f32 0.70710677, %v1614_v2  ;;  %v1616_v5 = vadd.f32 %v1615_v3, %v1533_v63  ;;  %v1620_v52 = vmul.f32 0.5, %v1614_v2 }
 0xdfa   : > { %v1617_v6 = vpop.f32.mrf.mxu0 }
 0xdfb   : > { %v1624_v7 = vand.u32 2147483647, %v1622_v4  ;;  %v1623_v40 = vmul.f32 0.70710677, %v1616_v5  ;;  %vm1664_vm4 = vcmp.ge.f32.partialorder %v1622_v4, 0.0  ;;  %v1621_v54 = vmul.f32 0.5, %v1616_v5 }
 0xdfc   : > { %v1618_v8 = vpop.f32.mrf.mxu0 }
 0xdfd   : > { %v1626_v9 = vmul.f32 0.3275911, %v1624_v7  ;;  %v1625_v10 = vand.u32 2147483647, %v1623_v40  ;;  %v1652_v29 = vsub.f32 0.0, %v1624_v7  ;;  %vm1665_vm5 = vcmp.ge.f32.partialorder %v1623_v40, 0.0 }
 0xdff   : > { %v1628_v12 = vadd.f32 1.0, %v1626_v9  ;;  %v1627_v13 = vmul.f32 0.3275911, %v1625_v10  ;;  %v1653_v15 = vsub.f32 0.0, %v1625_v10  ;;  %v1654_v28 = vmul.f32 %v1652_v29, %v1624_v7 }
 0xe01   : > { %2171 = vrcp.f32 %v1628_v12  ;;  %v1629_v14 = vadd.f32 1.0, %v1627_v13  ;;  %v1655_v16 = vmul.f32 %v1653_v15, %v1625_v10  ;;  %v1656_v11 = vmul.f32 1.442695, %v1654_v28 }
 0xe03   : > { %2173 = vrcp.f32 %v1629_v14  ;;  %v1658_v21 = vmul.f32 1.442695, %v1655_v16 }
 0xe04   : > { %2175 = vpow2.f32 %v1656_v11 }
 0xe05   : > { %2177 = vpow2.f32 %v1658_v21 }
 0xe0e   : > { %v2172_v37 = vpop.eup %2171 }
 0xe0f   : > { %v1634_v18 = vmul.f32 1.0614054, %v2172_v37 }
 0xe10   : > { %v2174_v19 = vpop.eup %2173 }
 0xe11   : > { %v1636_v20 = vadd.f32 -1.4531521, %v1634_v18  ;;  %v1635_v22 = vmul.f32 1.0614054, %v2174_v19  ;;  %v2176_v41 = vpop.eup %2175 }
 0xe12   : > { %v2178_v44 = vpop.eup %2177 }
 0xe13   : > { %v1638_v23 = vmul.f32 %v2172_v37, %v1636_v20  ;;  %v1637_v0 = vadd.f32 -1.4531521, %v1635_v22 }
 0xe15   : > { %v1640_v24 = vadd.f32 1.4214138, %v1638_v23  ;;  %v1639_v25 = vmul.f32 %v2174_v19, %v1637_v0 }
 0xe17   : > { %v1642_v27 = vmul.f32 %v2172_v37, %v1640_v24  ;;  %v1641_v30 = vadd.f32 1.4214138, %v1639_v25 }
 0xe19   : > { %v1644_v31 = vadd.f32 -0.28449672, %v1642_v27  ;;  %v1643_v32 = vmul.f32 %v2174_v19, %v1641_v30 }
 0xe1b   : > { %v1646_v34 = vmul.f32 %v2172_v37, %v1644_v31  ;;  %v1645_v35 = vadd.f32 -0.28449672, %v1643_v32 }
 0xe1d   : > { %v1648_v36 = vadd.f32 0.2548296, %v1646_v34  ;;  %v1647_v38 = vmul.f32 %v2174_v19, %v1645_v35 }
 0xe1f   : > { %v1650_v39 = vmul.f32 %v2172_v37, %v1648_v36  ;;  %v1649_v33 = vadd.f32 0.2548296, %v1647_v38 }
 0xe21   : > { %v1660_v42 = vmul.f32 %v2176_v41, %v1650_v39  ;;  %v1651_v43 = vmul.f32 %v2174_v19, %v1649_v33 }
 0xe23   : > { %v1662_v45 = vsub.f32 1.0, %v1660_v42  ;;  %v1661_v46 = vmul.f32 %v2178_v44, %v1651_v43 }
 0xe25   : > { %v1666_v47 = vsub.f32 0.0, %v1662_v45  ;;  %v1663_v48 = vsub.f32 1.0, %v1661_v46 }
 0xe27   : > { %v1668_v49 = vsel %vm1664_vm4, %v1662_v45, %v1666_v47  ;;  %v1667_v51 = vsub.f32 0.0, %v1663_v48 }
 0xe28   : > { %v1670_v50 = vadd.f32 1.0, %v1668_v49 }
 0xe29   : > { %v1669_v53 = vsel %vm1665_vm5, %v1663_v48, %v1667_v51 }
 0xe2a   : > { %v1671_v55 = vadd.f32 1.0, %v1669_v53  ;;  %v1672_v56 = vmul.f32 %v1670_v50, %v1620_v52 }
 0xe2c   : > { %v1673_v57 = vmul.f32 %v1671_v55, %v1621_v54  ;;  %v1674_v59 = vpack.c.bf16 %v1672_v56, %v1672_v56 }
 0xe2e   : > { %v1675_v58 = vpack.c.bf16 %v1673_v57, %v1673_v57 }
 0xe30   : > { %1836 = vmatprep.mubr.bf16.mxu1 %v1675_v58 }
 0xe31   : > { %1837 = vmatmul.mubr.bf16.vlgmr.msra.gmra.mxu1 %v1674_v59 }
 0xef1   : > { %v2019_v60 = vpop.f32.mrf.mxu1 }
 0xef3   : > { %v2020_v61 = vpop.f32.mrf.mxu1 }
 0xef4   : > { %v2021_v26 = vadd.f32 %v2020_v61, %v2019_v60 }
 0xef5   : > { %v2022_v63 = vpop.f32.mrf.mxu1 }
 0xef6   : > { %v1844_v1 = vadd.f32 %v2021_v26, %v2446_v17 }
 0xef7   : > { %v2023_v2 = vpop.f32.mrf.mxu1 }
 0xef8   : > { %v1852_v3 = vadd.f32 %v1976_v62, %v1844_v1 }
 0xefa   : > { %1853 = vst.msk [vmem:[%s462_s20] sm:$0xff] %vm467_vm0, %v1852_v3 }
 0xefb PF: > { %s24_s29 = sadd.s32 1, %s2185_s29  }
 0xefc   : > { %p21_p4 = scmp.ge.s32.totalorder %s24_s29, 4  }
 0xefe   :  { %23 = sbr.rel (!%p21_p4) target bundleno = 1 (0x1), region = 109 }

</bundles_post_ra>
